<compile_context>
chip_gen: v7x
topology: tpu7x:2x2x1
jax: 0.10.0
libtpu: 0.0.40
codegen_flags: <defaults>
</compile_context>

<pallas_src>
import jax
import jax.numpy as jnp
from jax.experimental import pallas as pl
from jax.experimental.pallas import tpu as pltpu


# --------------------------------------------------------------------------- #
# Static parameter-packing layout
# --------------------------------------------------------------------------- #
def _scale_param_offsets(conv_sz_list, M):
    """Static offsets of each per-scale parameter inside the packed SMEM vector."""
    offs = []
    base = 0
    for k in conv_sz_list:
        w1 = base; base += M * M * k     # Conv1d(M->M) weight, index (o*M + i)*k + t
        b1 = base; base += M             # Conv1d(M->M) bias
        g1 = base; base += M             # folded BN scale
        be1 = base; base += M            # folded BN bias
        w2 = base; base += M * k         # Conv1d(M->1) weight, index i*k + t
        b2 = base; base += 1             # Conv1d(M->1) bias
        offs.append((w1, b1, g1, be1, w2, b2))
    return offs, base


# --------------------------------------------------------------------------- #
# Pallas kernel
# --------------------------------------------------------------------------- #
def make_kernel(conv_sz_list, TB, M, D, S):
    max_pad = max(k // 2 for k in conv_sz_list)
    offs, _ = _scale_param_offsets(conv_sz_list, M)

    def kernel(x_ref, cs_ref, fc_ref, out_ref):
        xv = x_ref[...].astype(jnp.float32)                       # (TB, M, D)
        if max_pad > 0:
            zpad = jnp.zeros((TB, M, max_pad), jnp.float32)
            xpad = jnp.concatenate([zpad, xv, zpad], axis=-1)     # (TB, M, D + 2*max_pad)
        else:
            xpad = xv

        z_list = []
        for s, k in enumerate(conv_sz_list):
            p = k // 2
            w1o, b1o, g1o, be1o, w2o, b2o = offs[s]

            # Conv1d(M -> M, k, padding=p) -> ReLU -> BatchNorm1d (eval, folded).
            # Fully unrolled VPU multiply-adds, D on the lane axis.
            ys = []
            for o in range(M):
                acc = jnp.zeros((TB, D), jnp.float32)
                for i in range(M):
                    xi = xpad[:, i, :]                            # (TB, D + 2*max_pad)
                    for t in range(k):
                        a = max_pad - p + t                       # static lane shift
                        acc = acc + cs_ref[w1o + (o * M + i) * k + t] * xi[:, a:a + D]
                acc = acc + cs_ref[b1o + o]
                acc = jnp.maximum(acc, 0.0)
                acc = acc * cs_ref[g1o + o] + cs_ref[be1o + o]
                ys.append(acc)

            # Conv1d(M -> 1, k, padding=p) -> ReLU, again unrolled on the VPU.
            zacc = jnp.zeros((TB, D), jnp.float32)
            for i in range(M):
                if p > 0:
                    zp = jnp.zeros((TB, p), jnp.float32)
                    yp = jnp.concatenate([zp, ys[i], zp], axis=-1)    # (TB, D + 2p)
                else:
                    yp = ys[i]
                for t in range(k):
                    zacc = zacc + cs_ref[w2o + i * k + t] * yp[:, t:t + D]
            zacc = zacc + cs_ref[b2o]
            z_list.append(jnp.maximum(zacc, 0.0))

        # torch.cat(x_list, 1).view(B, -1) ordering; kept in vregs (no scratch).
        z = jnp.concatenate(z_list, axis=-1)                      # (TB, S*D)

        # to_z_emb: Linear -> ReLU -> BatchNorm1d (eval, folded) -> Linear -> ReLU
        fc1_w = fc_ref[0:S * D, :]                                # (S*D, D)
        fc2_w = fc_ref[S * D:(S + 1) * D, :]                      # (D, D)
        r = (S + 1) * D
        fc1_b = fc_ref[r + 0:r + 1, :]                            # (1, D)
        gf = fc_ref[r + 1:r + 2, :]
        bf = fc_ref[r + 2:r + 3, :]
        fc2_b = fc_ref[r + 3:r + 4, :]

        h = jnp.dot(z, fc1_w, preferred_element_type=jnp.float32) + fc1_b
        h = jnp.maximum(h, 0.0)
        h = h * gf + bf
        h = jnp.dot(h, fc2_w, preferred_element_type=jnp.float32) + fc2_b
        out_ref[...] = jnp.maximum(h, 0.0).astype(out_ref.dtype)

    return kernel


# --------------------------------------------------------------------------- #
# Wrapper: parameter packing + pallas_call
# --------------------------------------------------------------------------- #
def pack_params(params, conv_sz_list, M, D, eps=1e-5):
    """Pack all module parameters into one SMEM scalar vector + one VMEM slab."""
    S = len(conv_sz_list)
    sc = []
    for s, _k in enumerate(conv_sz_list):
        p = params['scales'][s]
        g = p['bn_gamma'] / jnp.sqrt(p['bn_var'] + eps)
        be = p['bn_beta'] - p['bn_mean'] * g
        sc += [p['w1'].reshape(-1), p['b1'].reshape(-1), g.reshape(-1),
               be.reshape(-1), p['w2'].reshape(-1), p['b2'].reshape(-1)]
    conv_scalars = jnp.concatenate(sc).astype(jnp.float32)

    gf = params['fc_bn_gamma'] / jnp.sqrt(params['fc_bn_var'] + eps)
    bf = params['fc_bn_beta'] - params['fc_bn_mean'] * gf
    fc_slab = jnp.concatenate([
        params['fc1_w'].T,                  # (S*D, D)
        params['fc2_w'].T,                  # (D, D)
        params['fc1_b'].reshape(1, D),
        gf.reshape(1, D),
        bf.reshape(1, D),
        params['fc2_b'].reshape(1, D),
    ], axis=0).astype(jnp.float32)          # ((S+1)*D + 4, D)
    return conv_scalars, fc_slab


def multi_scale_z_conv(x, params, conv_sz_list, block_b=None):
    """x: (B, n_modality, feat_dim) in PyTorch NCL layout. Returns (B, feat_dim)."""
    B, M, D = x.shape
    S = len(conv_sz_list)
    # One grid step at toy sizes; at production batch sizes keep the double-buffered
    # input block well below v7x's ~32 MiB scoped VMEM (512 rows is tiny here).
    if block_b is None:
        block_b = B if B <= 512 else 512    # 512 is a multiple of 8
    TB = block_b

    conv_scalars, fc_slab = pack_params(params, conv_sz_list, M, D)
    kernel = make_kernel(tuple(conv_sz_list), TB, M, D, S)

    return pl.pallas_call(
        kernel,
        out_shape=jax.ShapeDtypeStruct((B, D), jnp.float32),
        grid=(pl.cdiv(B, TB),),
        in_specs=[
            pl.BlockSpec((TB, M, D), lambda b: (b, 0, 0)),              # batch block of x
            pl.BlockSpec(memory_space=pltpu.MemorySpace.SMEM),          # packed conv/BN scalars
            pl.BlockSpec(memory_space=pltpu.MemorySpace.VMEM),          # packed FC slab
        ],
        out_specs=pl.BlockSpec((TB, D), lambda b: (b, 0)),
        compiler_params=pltpu.CompilerParams(dimension_semantics=("parallel",)),
    )(x.astype(jnp.float32), conv_scalars, fc_slab)


# --------------------------------------------------------------------------- #
# Deterministic parameter init (synthetic; shapes follow the module __init__)
# --------------------------------------------------------------------------- #
def init_params(key, M, conv_sz_list, D):
    S = len(conv_sz_list)
    keys = iter(jax.random.split(key, 16 * (S + 1) + 4))

    def rnd(shape, scale=0.3):
        return (scale * jax.random.normal(next(keys), shape)).astype(jnp.float32)

    def pos(shape):
        return (0.5 + jax.random.uniform(next(keys), shape)).astype(jnp.float32)

    scales = []
    for k in conv_sz_list:
        scales.append(dict(
            w1=rnd((M, M, k)), b1=rnd((M,)),
            bn_gamma=1.0 + rnd((M,), 0.1), bn_beta=rnd((M,), 0.1),
            bn_mean=rnd((M,), 0.1), bn_var=pos((M,)),
            w2=rnd((1, M, k)), b2=rnd((1,)),
        ))
    return dict(
        scales=scales,
        fc1_w=rnd((D, S * D)), fc1_b=rnd((D,)),
        fc_bn_gamma=1.0 + rnd((D,), 0.1), fc_bn_beta=rnd((D,), 0.1),
        fc_bn_mean=rnd((D,), 0.1), fc_bn_var=pos((D,)),
        fc2_w=rnd((D, D)), fc2_b=rnd((D,)),
    )


# --------------------------------------------------------------------------- #
# Pure-JAX reference (mirrors the PyTorch forward, eval-mode BN)
# --------------------------------------------------------------------------- #
def _conv1d_ref(x, w, b, pad):
    B, Ci, D = x.shape
    Co, _, K = w.shape
    xp = jnp.pad(x, ((0, 0), (0, 0), (pad, pad)))
    out = jnp.zeros((B, Co, D), jnp.float32)
    for t in range(K):
        out = out + jnp.einsum('bid,oi->bod', xp[:, :, t:t + D], w[:, :, t])
    return out + b[None, :, None]


def reference_forward(x, params, conv_sz_list):
    eps = 1e-5
    B = x.shape[0]
    zs = []
    for s, k in enumerate(conv_sz_list):
        p = params['scales'][s]
        pad = k // 2
        y = jnp.maximum(_conv1d_ref(x, p['w1'], p['b1'], pad), 0.0)
        g = p['bn_gamma'] / jnp.sqrt(p['bn_var'] + eps)
        y = (y - p['bn_mean'][None, :, None]) * g[None, :, None] + p['bn_beta'][None, :, None]
        z = jnp.maximum(_conv1d_ref(y, p['w2'], p['b2'], pad), 0.0)
        zs.append(z)
    zc = jnp.concatenate(zs, axis=1).reshape(B, -1)
    h = jnp.maximum(zc @ params['fc1_w'].T + params['fc1_b'], 0.0)
    g = params['fc_bn_gamma'] / jnp.sqrt(params['fc_bn_var'] + eps)
    h = (h - params['fc_bn_mean']) * g + params['fc_bn_beta']
    h = jnp.maximum(h @ params['fc2_w'].T + params['fc2_b'], 0.0)
    return h


# --------------------------------------------------------------------------- #
if __name__ == "__main__":
    B, M, D = 2, 4, 32                 # batch, n_modality, feat_dim
    conv_sz_list = (1, 3, 5)           # odd kernel sizes (module assumes length-preserving convs)

    key = jax.random.PRNGKey(0)
    kx, kp = jax.random.split(key)
    x = jax.random.normal(kx, (B, M, D), dtype=jnp.float32)
    params = init_params(kp, M, conv_sz_list, D)

    out = multi_scale_z_conv(x, params, conv_sz_list)
    out = jax.block_until_ready(out)

    ref = reference_forward(x, params, conv_sz_list)
    err = float(jnp.max(jnp.abs(out - ref)))
    assert out.shape == (B, D), out.shape
    assert err < 1e-4, f"max abs err {err}"
    print("KERNEL_OK")
</pallas_src>

<mosaic_0001>
module attributes {stable_mosaic.version = 11 : i64} {
  func.func @kernel(%arg0: i32, %arg1: memref<2x4x32xf32, #tpu.memory_space<vmem>>, %arg2: memref<219xf32, #tpu.memory_space<smem>>, %arg3: memref<132x32xf32, #tpu.memory_space<vmem>>, %arg4: memref<2x32xf32, #tpu.memory_space<vmem>>) attributes {dimension_semantics = [#tpu.dimension_semantics<parallel>], iteration_bounds = array<i64: 1>, scalar_prefetch = 0 : i64, scratch_operands = 0 : i64, tpu.core_type = #tpu.core_type<tc>, window_params = [{transform_indices = @transform_0, window_bounds = array<i64: 2, 4, 32>}, {transform_indices = @transform_1, window_bounds = array<i64: 219>}, {pipeline_mode = #tpu.pipeline_mode<synchronous>, transform_indices = @transform_2, window_bounds = array<i64: 132, 32>}, {transform_indices = @transform_3, window_bounds = array<i64: 2, 32>}]} {
    %c0 = arith.constant 0 : index
    %c0_0 = arith.constant 0 : index
    %c0_1 = arith.constant 0 : index
    %0 = vector.load %arg1[%c0, %c0_0, %c0_1] : memref<2x4x32xf32, #tpu.memory_space<vmem>>, vector<2x4x32xf32>
    %cst = arith.constant 0.000000e+00 : f32
    %1 = vector.broadcast %cst : f32 to vector<2x4x2xf32>
    %2 = tpu.concatenate %1, %0, %1 in 2 : vector<2x4x2xf32>, vector<2x4x32xf32>, vector<2x4x2xf32> -> vector<2x4x36xf32>
    %cst_2 = arith.constant 0.000000e+00 : f32
    %3 = vector.broadcast %cst_2 : f32 to vector<2x32xf32>
    %4 = vector.extract_strided_slice %2 {offsets = [0, 0, 0], sizes = [2, 1, 36], strides = [1, 1, 1]} : vector<2x4x36xf32> to vector<2x1x36xf32>
    %5 = vector.shape_cast %4 : vector<2x1x36xf32> to vector<2x36xf32>
    %c0_3 = arith.constant 0 : index
    %6 = memref.load %arg2[%c0_3] : memref<219xf32, #tpu.memory_space<smem>>
    %7 = vector.extract_strided_slice %5 {offsets = [0, 2], sizes = [2, 32], strides = [1, 1]} : vector<2x36xf32> to vector<2x32xf32>
    %8 = vector.broadcast %6 : f32 to vector<2x32xf32>
    %9 = arith.mulf %8, %7 : vector<2x32xf32>
    %10 = arith.addf %3, %9 : vector<2x32xf32>
    %11 = vector.extract_strided_slice %2 {offsets = [0, 1, 0], sizes = [2, 1, 36], strides = [1, 1, 1]} : vector<2x4x36xf32> to vector<2x1x36xf32>
    %12 = vector.shape_cast %11 : vector<2x1x36xf32> to vector<2x36xf32>
    %c1 = arith.constant 1 : index
    %13 = memref.load %arg2[%c1] : memref<219xf32, #tpu.memory_space<smem>>
    %14 = vector.extract_strided_slice %12 {offsets = [0, 2], sizes = [2, 32], strides = [1, 1]} : vector<2x36xf32> to vector<2x32xf32>
    %15 = vector.broadcast %13 : f32 to vector<2x32xf32>
    %16 = arith.mulf %15, %14 : vector<2x32xf32>
    %17 = arith.addf %10, %16 : vector<2x32xf32>
    %18 = vector.extract_strided_slice %2 {offsets = [0, 2, 0], sizes = [2, 1, 36], strides = [1, 1, 1]} : vector<2x4x36xf32> to vector<2x1x36xf32>
    %19 = vector.shape_cast %18 : vector<2x1x36xf32> to vector<2x36xf32>
    %c2 = arith.constant 2 : index
    %20 = memref.load %arg2[%c2] : memref<219xf32, #tpu.memory_space<smem>>
    %21 = vector.extract_strided_slice %19 {offsets = [0, 2], sizes = [2, 32], strides = [1, 1]} : vector<2x36xf32> to vector<2x32xf32>
    %22 = vector.broadcast %20 : f32 to vector<2x32xf32>
    %23 = arith.mulf %22, %21 : vector<2x32xf32>
    %24 = arith.addf %17, %23 : vector<2x32xf32>
    %25 = vector.extract_strided_slice %2 {offsets = [0, 3, 0], sizes = [2, 1, 36], strides = [1, 1, 1]} : vector<2x4x36xf32> to vector<2x1x36xf32>
    %26 = vector.shape_cast %25 : vector<2x1x36xf32> to vector<2x36xf32>
    %c3 = arith.constant 3 : index
    %27 = memref.load %arg2[%c3] : memref<219xf32, #tpu.memory_space<smem>>
    %28 = vector.extract_strided_slice %26 {offsets = [0, 2], sizes = [2, 32], strides = [1, 1]} : vector<2x36xf32> to vector<2x32xf32>
    %29 = vector.broadcast %27 : f32 to vector<2x32xf32>
    %30 = arith.mulf %29, %28 : vector<2x32xf32>
    %31 = arith.addf %24, %30 : vector<2x32xf32>
    %c16 = arith.constant 16 : index
    %32 = memref.load %arg2[%c16] : memref<219xf32, #tpu.memory_space<smem>>
    %33 = vector.broadcast %32 : f32 to vector<2x32xf32>
    %34 = arith.addf %31, %33 : vector<2x32xf32>
    %cst_4 = arith.constant 0.000000e+00 : f32
    %35 = vector.broadcast %cst_4 : f32 to vector<2x32xf32>
    %36 = arith.maximumf %34, %35 : vector<2x32xf32>
    %c20 = arith.constant 20 : index
    %37 = memref.load %arg2[%c20] : memref<219xf32, #tpu.memory_space<smem>>
    %38 = vector.broadcast %37 : f32 to vector<2x32xf32>
    %39 = arith.mulf %36, %38 : vector<2x32xf32>
    %c24 = arith.constant 24 : index
    %40 = memref.load %arg2[%c24] : memref<219xf32, #tpu.memory_space<smem>>
    %41 = vector.broadcast %40 : f32 to vector<2x32xf32>
    %42 = arith.addf %39, %41 : vector<2x32xf32>
    %cst_5 = arith.constant 0.000000e+00 : f32
    %43 = vector.broadcast %cst_5 : f32 to vector<2x32xf32>
    %44 = vector.extract_strided_slice %2 {offsets = [0, 0, 0], sizes = [2, 1, 36], strides = [1, 1, 1]} : vector<2x4x36xf32> to vector<2x1x36xf32>
    %45 = vector.shape_cast %44 : vector<2x1x36xf32> to vector<2x36xf32>
    %c4 = arith.constant 4 : index
    %46 = memref.load %arg2[%c4] : memref<219xf32, #tpu.memory_space<smem>>
    %47 = vector.extract_strided_slice %45 {offsets = [0, 2], sizes = [2, 32], strides = [1, 1]} : vector<2x36xf32> to vector<2x32xf32>
    %48 = vector.broadcast %46 : f32 to vector<2x32xf32>
    %49 = arith.mulf %48, %47 : vector<2x32xf32>
    %50 = arith.addf %43, %49 : vector<2x32xf32>
    %51 = vector.extract_strided_slice %2 {offsets = [0, 1, 0], sizes = [2, 1, 36], strides = [1, 1, 1]} : vector<2x4x36xf32> to vector<2x1x36xf32>
    %52 = vector.shape_cast %51 : vector<2x1x36xf32> to vector<2x36xf32>
    %c5 = arith.constant 5 : index
    %53 = memref.load %arg2[%c5] : memref<219xf32, #tpu.memory_space<smem>>
    %54 = vector.extract_strided_slice %52 {offsets = [0, 2], sizes = [2, 32], strides = [1, 1]} : vector<2x36xf32> to vector<2x32xf32>
    %55 = vector.broadcast %53 : f32 to vector<2x32xf32>
    %56 = arith.mulf %55, %54 : vector<2x32xf32>
    %57 = arith.addf %50, %56 : vector<2x32xf32>
    %58 = vector.extract_strided_slice %2 {offsets = [0, 2, 0], sizes = [2, 1, 36], strides = [1, 1, 1]} : vector<2x4x36xf32> to vector<2x1x36xf32>
    %59 = vector.shape_cast %58 : vector<2x1x36xf32> to vector<2x36xf32>
    %c6 = arith.constant 6 : index
    %60 = memref.load %arg2[%c6] : memref<219xf32, #tpu.memory_space<smem>>
    %61 = vector.extract_strided_slice %59 {offsets = [0, 2], sizes = [2, 32], strides = [1, 1]} : vector<2x36xf32> to vector<2x32xf32>
    %62 = vector.broadcast %60 : f32 to vector<2x32xf32>
    %63 = arith.mulf %62, %61 : vector<2x32xf32>
    %64 = arith.addf %57, %63 : vector<2x32xf32>
    %65 = vector.extract_strided_slice %2 {offsets = [0, 3, 0], sizes = [2, 1, 36], strides = [1, 1, 1]} : vector<2x4x36xf32> to vector<2x1x36xf32>
    %66 = vector.shape_cast %65 : vector<2x1x36xf32> to vector<2x36xf32>
    %c7 = arith.constant 7 : index
    %67 = memref.load %arg2[%c7] : memref<219xf32, #tpu.memory_space<smem>>
    %68 = vector.extract_strided_slice %66 {offsets = [0, 2], sizes = [2, 32], strides = [1, 1]} : vector<2x36xf32> to vector<2x32xf32>
    %69 = vector.broadcast %67 : f32 to vector<2x32xf32>
    %70 = arith.mulf %69, %68 : vector<2x32xf32>
    %71 = arith.addf %64, %70 : vector<2x32xf32>
    %c17 = arith.constant 17 : index
    %72 = memref.load %arg2[%c17] : memref<219xf32, #tpu.memory_space<smem>>
    %73 = vector.broadcast %72 : f32 to vector<2x32xf32>
    %74 = arith.addf %71, %73 : vector<2x32xf32>
    %cst_6 = arith.constant 0.000000e+00 : f32
    %75 = vector.broadcast %cst_6 : f32 to vector<2x32xf32>
    %76 = arith.maximumf %74, %75 : vector<2x32xf32>
    %c21 = arith.constant 21 : index
    %77 = memref.load %arg2[%c21] : memref<219xf32, #tpu.memory_space<smem>>
    %78 = vector.broadcast %77 : f32 to vector<2x32xf32>
    %79 = arith.mulf %76, %78 : vector<2x32xf32>
    %c25 = arith.constant 25 : index
    %80 = memref.load %arg2[%c25] : memref<219xf32, #tpu.memory_space<smem>>
    %81 = vector.broadcast %80 : f32 to vector<2x32xf32>
    %82 = arith.addf %79, %81 : vector<2x32xf32>
    %cst_7 = arith.constant 0.000000e+00 : f32
    %83 = vector.broadcast %cst_7 : f32 to vector<2x32xf32>
    %84 = vector.extract_strided_slice %2 {offsets = [0, 0, 0], sizes = [2, 1, 36], strides = [1, 1, 1]} : vector<2x4x36xf32> to vector<2x1x36xf32>
    %85 = vector.shape_cast %84 : vector<2x1x36xf32> to vector<2x36xf32>
    %c8 = arith.constant 8 : index
    %86 = memref.load %arg2[%c8] : memref<219xf32, #tpu.memory_space<smem>>
    %87 = vector.extract_strided_slice %85 {offsets = [0, 2], sizes = [2, 32], strides = [1, 1]} : vector<2x36xf32> to vector<2x32xf32>
    %88 = vector.broadcast %86 : f32 to vector<2x32xf32>
    %89 = arith.mulf %88, %87 : vector<2x32xf32>
    %90 = arith.addf %83, %89 : vector<2x32xf32>
    %91 = vector.extract_strided_slice %2 {offsets = [0, 1, 0], sizes = [2, 1, 36], strides = [1, 1, 1]} : vector<2x4x36xf32> to vector<2x1x36xf32>
    %92 = vector.shape_cast %91 : vector<2x1x36xf32> to vector<2x36xf32>
    %c9 = arith.constant 9 : index
    %93 = memref.load %arg2[%c9] : memref<219xf32, #tpu.memory_space<smem>>
    %94 = vector.extract_strided_slice %92 {offsets = [0, 2], sizes = [2, 32], strides = [1, 1]} : vector<2x36xf32> to vector<2x32xf32>
    %95 = vector.broadcast %93 : f32 to vector<2x32xf32>
    %96 = arith.mulf %95, %94 : vector<2x32xf32>
    %97 = arith.addf %90, %96 : vector<2x32xf32>
    %98 = vector.extract_strided_slice %2 {offsets = [0, 2, 0], sizes = [2, 1, 36], strides = [1, 1, 1]} : vector<2x4x36xf32> to vector<2x1x36xf32>
    %99 = vector.shape_cast %98 : vector<2x1x36xf32> to vector<2x36xf32>
    %c10 = arith.constant 10 : index
    %100 = memref.load %arg2[%c10] : memref<219xf32, #tpu.memory_space<smem>>
    %101 = vector.extract_strided_slice %99 {offsets = [0, 2], sizes = [2, 32], strides = [1, 1]} : vector<2x36xf32> to vector<2x32xf32>
    %102 = vector.broadcast %100 : f32 to vector<2x32xf32>
    %103 = arith.mulf %102, %101 : vector<2x32xf32>
    %104 = arith.addf %97, %103 : vector<2x32xf32>
    %105 = vector.extract_strided_slice %2 {offsets = [0, 3, 0], sizes = [2, 1, 36], strides = [1, 1, 1]} : vector<2x4x36xf32> to vector<2x1x36xf32>
    %106 = vector.shape_cast %105 : vector<2x1x36xf32> to vector<2x36xf32>
    %c11 = arith.constant 11 : index
    %107 = memref.load %arg2[%c11] : memref<219xf32, #tpu.memory_space<smem>>
    %108 = vector.extract_strided_slice %106 {offsets = [0, 2], sizes = [2, 32], strides = [1, 1]} : vector<2x36xf32> to vector<2x32xf32>
    %109 = vector.broadcast %107 : f32 to vector<2x32xf32>
    %110 = arith.mulf %109, %108 : vector<2x32xf32>
    %111 = arith.addf %104, %110 : vector<2x32xf32>
    %c18 = arith.constant 18 : index
    %112 = memref.load %arg2[%c18] : memref<219xf32, #tpu.memory_space<smem>>
    %113 = vector.broadcast %112 : f32 to vector<2x32xf32>
    %114 = arith.addf %111, %113 : vector<2x32xf32>
    %cst_8 = arith.constant 0.000000e+00 : f32
    %115 = vector.broadcast %cst_8 : f32 to vector<2x32xf32>
    %116 = arith.maximumf %114, %115 : vector<2x32xf32>
    %c22 = arith.constant 22 : index
    %117 = memref.load %arg2[%c22] : memref<219xf32, #tpu.memory_space<smem>>
    %118 = vector.broadcast %117 : f32 to vector<2x32xf32>
    %119 = arith.mulf %116, %118 : vector<2x32xf32>
    %c26 = arith.constant 26 : index
    %120 = memref.load %arg2[%c26] : memref<219xf32, #tpu.memory_space<smem>>
    %121 = vector.broadcast %120 : f32 to vector<2x32xf32>
    %122 = arith.addf %119, %121 : vector<2x32xf32>
    %cst_9 = arith.constant 0.000000e+00 : f32
    %123 = vector.broadcast %cst_9 : f32 to vector<2x32xf32>
    %124 = vector.extract_strided_slice %2 {offsets = [0, 0, 0], sizes = [2, 1, 36], strides = [1, 1, 1]} : vector<2x4x36xf32> to vector<2x1x36xf32>
    %125 = vector.shape_cast %124 : vector<2x1x36xf32> to vector<2x36xf32>
    %c12 = arith.constant 12 : index
    %126 = memref.load %arg2[%c12] : memref<219xf32, #tpu.memory_space<smem>>
    %127 = vector.extract_strided_slice %125 {offsets = [0, 2], sizes = [2, 32], strides = [1, 1]} : vector<2x36xf32> to vector<2x32xf32>
    %128 = vector.broadcast %126 : f32 to vector<2x32xf32>
    %129 = arith.mulf %128, %127 : vector<2x32xf32>
    %130 = arith.addf %123, %129 : vector<2x32xf32>
    %131 = vector.extract_strided_slice %2 {offsets = [0, 1, 0], sizes = [2, 1, 36], strides = [1, 1, 1]} : vector<2x4x36xf32> to vector<2x1x36xf32>
    %132 = vector.shape_cast %131 : vector<2x1x36xf32> to vector<2x36xf32>
    %c13 = arith.constant 13 : index
    %133 = memref.load %arg2[%c13] : memref<219xf32, #tpu.memory_space<smem>>
    %134 = vector.extract_strided_slice %132 {offsets = [0, 2], sizes = [2, 32], strides = [1, 1]} : vector<2x36xf32> to vector<2x32xf32>
    %135 = vector.broadcast %133 : f32 to vector<2x32xf32>
    %136 = arith.mulf %135, %134 : vector<2x32xf32>
    %137 = arith.addf %130, %136 : vector<2x32xf32>
    %138 = vector.extract_strided_slice %2 {offsets = [0, 2, 0], sizes = [2, 1, 36], strides = [1, 1, 1]} : vector<2x4x36xf32> to vector<2x1x36xf32>
    %139 = vector.shape_cast %138 : vector<2x1x36xf32> to vector<2x36xf32>
    %c14 = arith.constant 14 : index
    %140 = memref.load %arg2[%c14] : memref<219xf32, #tpu.memory_space<smem>>
    %141 = vector.extract_strided_slice %139 {offsets = [0, 2], sizes = [2, 32], strides = [1, 1]} : vector<2x36xf32> to vector<2x32xf32>
    %142 = vector.broadcast %140 : f32 to vector<2x32xf32>
    %143 = arith.mulf %142, %141 : vector<2x32xf32>
    %144 = arith.addf %137, %143 : vector<2x32xf32>
    %145 = vector.extract_strided_slice %2 {offsets = [0, 3, 0], sizes = [2, 1, 36], strides = [1, 1, 1]} : vector<2x4x36xf32> to vector<2x1x36xf32>
    %146 = vector.shape_cast %145 : vector<2x1x36xf32> to vector<2x36xf32>
    %c15 = arith.constant 15 : index
    %147 = memref.load %arg2[%c15] : memref<219xf32, #tpu.memory_space<smem>>
    %148 = vector.extract_strided_slice %146 {offsets = [0, 2], sizes = [2, 32], strides = [1, 1]} : vector<2x36xf32> to vector<2x32xf32>
    %149 = vector.broadcast %147 : f32 to vector<2x32xf32>
    %150 = arith.mulf %149, %148 : vector<2x32xf32>
    %151 = arith.addf %144, %150 : vector<2x32xf32>
    %c19 = arith.constant 19 : index
    %152 = memref.load %arg2[%c19] : memref<219xf32, #tpu.memory_space<smem>>
    %153 = vector.broadcast %152 : f32 to vector<2x32xf32>
    %154 = arith.addf %151, %153 : vector<2x32xf32>
    %cst_10 = arith.constant 0.000000e+00 : f32
    %155 = vector.broadcast %cst_10 : f32 to vector<2x32xf32>
    %156 = arith.maximumf %154, %155 : vector<2x32xf32>
    %c23 = arith.constant 23 : index
    %157 = memref.load %arg2[%c23] : memref<219xf32, #tpu.memory_space<smem>>
    %158 = vector.broadcast %157 : f32 to vector<2x32xf32>
    %159 = arith.mulf %156, %158 : vector<2x32xf32>
    %c27 = arith.constant 27 : index
    %160 = memref.load %arg2[%c27] : memref<219xf32, #tpu.memory_space<smem>>
    %161 = vector.broadcast %160 : f32 to vector<2x32xf32>
    %162 = arith.addf %159, %161 : vector<2x32xf32>
    %cst_11 = arith.constant 0.000000e+00 : f32
    %163 = vector.broadcast %cst_11 : f32 to vector<2x32xf32>
    %c28 = arith.constant 28 : index
    %164 = memref.load %arg2[%c28] : memref<219xf32, #tpu.memory_space<smem>>
    %165 = vector.broadcast %164 : f32 to vector<2x32xf32>
    %166 = arith.mulf %165, %42 : vector<2x32xf32>
    %167 = arith.addf %163, %166 : vector<2x32xf32>
    %c29 = arith.constant 29 : index
    %168 = memref.load %arg2[%c29] : memref<219xf32, #tpu.memory_space<smem>>
    %169 = vector.broadcast %168 : f32 to vector<2x32xf32>
    %170 = arith.mulf %169, %82 : vector<2x32xf32>
    %171 = arith.addf %167, %170 : vector<2x32xf32>
    %c30 = arith.constant 30 : index
    %172 = memref.load %arg2[%c30] : memref<219xf32, #tpu.memory_space<smem>>
    %173 = vector.broadcast %172 : f32 to vector<2x32xf32>
    %174 = arith.mulf %173, %122 : vector<2x32xf32>
    %175 = arith.addf %171, %174 : vector<2x32xf32>
    %c31 = arith.constant 31 : index
    %176 = memref.load %arg2[%c31] : memref<219xf32, #tpu.memory_space<smem>>
    %177 = vector.broadcast %176 : f32 to vector<2x32xf32>
    %178 = arith.mulf %177, %162 : vector<2x32xf32>
    %179 = arith.addf %175, %178 : vector<2x32xf32>
    %c32 = arith.constant 32 : index
    %180 = memref.load %arg2[%c32] : memref<219xf32, #tpu.memory_space<smem>>
    %181 = vector.broadcast %180 : f32 to vector<2x32xf32>
    %182 = arith.addf %179, %181 : vector<2x32xf32>
    %cst_12 = arith.constant 0.000000e+00 : f32
    %183 = vector.broadcast %cst_12 : f32 to vector<2x32xf32>
    %184 = arith.maximumf %182, %183 : vector<2x32xf32>
    %cst_13 = arith.constant 0.000000e+00 : f32
    %185 = vector.broadcast %cst_13 : f32 to vector<2x32xf32>
    %186 = vector.extract_strided_slice %2 {offsets = [0, 0, 0], sizes = [2, 1, 36], strides = [1, 1, 1]} : vector<2x4x36xf32> to vector<2x1x36xf32>
    %187 = vector.shape_cast %186 : vector<2x1x36xf32> to vector<2x36xf32>
    %c33 = arith.constant 33 : index
    %188 = memref.load %arg2[%c33] : memref<219xf32, #tpu.memory_space<smem>>
    %189 = vector.extract_strided_slice %187 {offsets = [0, 1], sizes = [2, 32], strides = [1, 1]} : vector<2x36xf32> to vector<2x32xf32>
    %190 = vector.broadcast %188 : f32 to vector<2x32xf32>
    %191 = arith.mulf %190, %189 : vector<2x32xf32>
    %192 = arith.addf %185, %191 : vector<2x32xf32>
    %c34 = arith.constant 34 : index
    %193 = memref.load %arg2[%c34] : memref<219xf32, #tpu.memory_space<smem>>
    %194 = vector.extract_strided_slice %187 {offsets = [0, 2], sizes = [2, 32], strides = [1, 1]} : vector<2x36xf32> to vector<2x32xf32>
    %195 = vector.broadcast %193 : f32 to vector<2x32xf32>
    %196 = arith.mulf %195, %194 : vector<2x32xf32>
    %197 = arith.addf %192, %196 : vector<2x32xf32>
    %c35 = arith.constant 35 : index
    %198 = memref.load %arg2[%c35] : memref<219xf32, #tpu.memory_space<smem>>
    %199 = vector.extract_strided_slice %187 {offsets = [0, 3], sizes = [2, 32], strides = [1, 1]} : vector<2x36xf32> to vector<2x32xf32>
    %200 = vector.broadcast %198 : f32 to vector<2x32xf32>
    %201 = arith.mulf %200, %199 : vector<2x32xf32>
    %202 = arith.addf %197, %201 : vector<2x32xf32>
    %203 = vector.extract_strided_slice %2 {offsets = [0, 1, 0], sizes = [2, 1, 36], strides = [1, 1, 1]} : vector<2x4x36xf32> to vector<2x1x36xf32>
    %204 = vector.shape_cast %203 : vector<2x1x36xf32> to vector<2x36xf32>
    %c36 = arith.constant 36 : index
    %205 = memref.load %arg2[%c36] : memref<219xf32, #tpu.memory_space<smem>>
    %206 = vector.extract_strided_slice %204 {offsets = [0, 1], sizes = [2, 32], strides = [1, 1]} : vector<2x36xf32> to vector<2x32xf32>
    %207 = vector.broadcast %205 : f32 to vector<2x32xf32>
    %208 = arith.mulf %207, %206 : vector<2x32xf32>
    %209 = arith.addf %202, %208 : vector<2x32xf32>
    %c37 = arith.constant 37 : index
    %210 = memref.load %arg2[%c37] : memref<219xf32, #tpu.memory_space<smem>>
    %211 = vector.extract_strided_slice %204 {offsets = [0, 2], sizes = [2, 32], strides = [1, 1]} : vector<2x36xf32> to vector<2x32xf32>
    %212 = vector.broadcast %210 : f32 to vector<2x32xf32>
    %213 = arith.mulf %212, %211 : vector<2x32xf32>
    %214 = arith.addf %209, %213 : vector<2x32xf32>
    %c38 = arith.constant 38 : index
    %215 = memref.load %arg2[%c38] : memref<219xf32, #tpu.memory_space<smem>>
    %216 = vector.extract_strided_slice %204 {offsets = [0, 3], sizes = [2, 32], strides = [1, 1]} : vector<2x36xf32> to vector<2x32xf32>
    %217 = vector.broadcast %215 : f32 to vector<2x32xf32>
    %218 = arith.mulf %217, %216 : vector<2x32xf32>
    %219 = arith.addf %214, %218 : vector<2x32xf32>
    %220 = vector.extract_strided_slice %2 {offsets = [0, 2, 0], sizes = [2, 1, 36], strides = [1, 1, 1]} : vector<2x4x36xf32> to vector<2x1x36xf32>
    %221 = vector.shape_cast %220 : vector<2x1x36xf32> to vector<2x36xf32>
    %c39 = arith.constant 39 : index
    %222 = memref.load %arg2[%c39] : memref<219xf32, #tpu.memory_space<smem>>
    %223 = vector.extract_strided_slice %221 {offsets = [0, 1], sizes = [2, 32], strides = [1, 1]} : vector<2x36xf32> to vector<2x32xf32>
    %224 = vector.broadcast %222 : f32 to vector<2x32xf32>
    %225 = arith.mulf %224, %223 : vector<2x32xf32>
    %226 = arith.addf %219, %225 : vector<2x32xf32>
    %c40 = arith.constant 40 : index
    %227 = memref.load %arg2[%c40] : memref<219xf32, #tpu.memory_space<smem>>
    %228 = vector.extract_strided_slice %221 {offsets = [0, 2], sizes = [2, 32], strides = [1, 1]} : vector<2x36xf32> to vector<2x32xf32>
    %229 = vector.broadcast %227 : f32 to vector<2x32xf32>
    %230 = arith.mulf %229, %228 : vector<2x32xf32>
    %231 = arith.addf %226, %230 : vector<2x32xf32>
    %c41 = arith.constant 41 : index
    %232 = memref.load %arg2[%c41] : memref<219xf32, #tpu.memory_space<smem>>
    %233 = vector.extract_strided_slice %221 {offsets = [0, 3], sizes = [2, 32], strides = [1, 1]} : vector<2x36xf32> to vector<2x32xf32>
    %234 = vector.broadcast %232 : f32 to vector<2x32xf32>
    %235 = arith.mulf %234, %233 : vector<2x32xf32>
    %236 = arith.addf %231, %235 : vector<2x32xf32>
    %237 = vector.extract_strided_slice %2 {offsets = [0, 3, 0], sizes = [2, 1, 36], strides = [1, 1, 1]} : vector<2x4x36xf32> to vector<2x1x36xf32>
    %238 = vector.shape_cast %237 : vector<2x1x36xf32> to vector<2x36xf32>
    %c42 = arith.constant 42 : index
    %239 = memref.load %arg2[%c42] : memref<219xf32, #tpu.memory_space<smem>>
    %240 = vector.extract_strided_slice %238 {offsets = [0, 1], sizes = [2, 32], strides = [1, 1]} : vector<2x36xf32> to vector<2x32xf32>
    %241 = vector.broadcast %239 : f32 to vector<2x32xf32>
    %242 = arith.mulf %241, %240 : vector<2x32xf32>
    %243 = arith.addf %236, %242 : vector<2x32xf32>
    %c43 = arith.constant 43 : index
    %244 = memref.load %arg2[%c43] : memref<219xf32, #tpu.memory_space<smem>>
    %245 = vector.extract_strided_slice %238 {offsets = [0, 2], sizes = [2, 32], strides = [1, 1]} : vector<2x36xf32> to vector<2x32xf32>
    %246 = vector.broadcast %244 : f32 to vector<2x32xf32>
    %247 = arith.mulf %246, %245 : vector<2x32xf32>
    %248 = arith.addf %243, %247 : vector<2x32xf32>
    %c44 = arith.constant 44 : index
    %249 = memref.load %arg2[%c44] : memref<219xf32, #tpu.memory_space<smem>>
    %250 = vector.extract_strided_slice %238 {offsets = [0, 3], sizes = [2, 32], strides = [1, 1]} : vector<2x36xf32> to vector<2x32xf32>
    %251 = vector.broadcast %249 : f32 to vector<2x32xf32>
    %252 = arith.mulf %251, %250 : vector<2x32xf32>
    %253 = arith.addf %248, %252 : vector<2x32xf32>
    %c81 = arith.constant 81 : index
    %254 = memref.load %arg2[%c81] : memref<219xf32, #tpu.memory_space<smem>>
    %255 = vector.broadcast %254 : f32 to vector<2x32xf32>
    %256 = arith.addf %253, %255 : vector<2x32xf32>
    %cst_14 = arith.constant 0.000000e+00 : f32
    %257 = vector.broadcast %cst_14 : f32 to vector<2x32xf32>
    %258 = arith.maximumf %256, %257 : vector<2x32xf32>
    %c85 = arith.constant 85 : index
    %259 = memref.load %arg2[%c85] : memref<219xf32, #tpu.memory_space<smem>>
    %260 = vector.broadcast %259 : f32 to vector<2x32xf32>
    %261 = arith.mulf %258, %260 : vector<2x32xf32>
    %c89 = arith.constant 89 : index
    %262 = memref.load %arg2[%c89] : memref<219xf32, #tpu.memory_space<smem>>
    %263 = vector.broadcast %262 : f32 to vector<2x32xf32>
    %264 = arith.addf %261, %263 : vector<2x32xf32>
    %cst_15 = arith.constant 0.000000e+00 : f32
    %265 = vector.broadcast %cst_15 : f32 to vector<2x32xf32>
    %266 = vector.extract_strided_slice %2 {offsets = [0, 0, 0], sizes = [2, 1, 36], strides = [1, 1, 1]} : vector<2x4x36xf32> to vector<2x1x36xf32>
    %267 = vector.shape_cast %266 : vector<2x1x36xf32> to vector<2x36xf32>
    %c45 = arith.constant 45 : index
    %268 = memref.load %arg2[%c45] : memref<219xf32, #tpu.memory_space<smem>>
    %269 = vector.extract_strided_slice %267 {offsets = [0, 1], sizes = [2, 32], strides = [1, 1]} : vector<2x36xf32> to vector<2x32xf32>
    %270 = vector.broadcast %268 : f32 to vector<2x32xf32>
    %271 = arith.mulf %270, %269 : vector<2x32xf32>
    %272 = arith.addf %265, %271 : vector<2x32xf32>
    %c46 = arith.constant 46 : index
    %273 = memref.load %arg2[%c46] : memref<219xf32, #tpu.memory_space<smem>>
    %274 = vector.extract_strided_slice %267 {offsets = [0, 2], sizes = [2, 32], strides = [1, 1]} : vector<2x36xf32> to vector<2x32xf32>
    %275 = vector.broadcast %273 : f32 to vector<2x32xf32>
    %276 = arith.mulf %275, %274 : vector<2x32xf32>
    %277 = arith.addf %272, %276 : vector<2x32xf32>
    %c47 = arith.constant 47 : index
    %278 = memref.load %arg2[%c47] : memref<219xf32, #tpu.memory_space<smem>>
    %279 = vector.extract_strided_slice %267 {offsets = [0, 3], sizes = [2, 32], strides = [1, 1]} : vector<2x36xf32> to vector<2x32xf32>
    %280 = vector.broadcast %278 : f32 to vector<2x32xf32>
    %281 = arith.mulf %280, %279 : vector<2x32xf32>
    %282 = arith.addf %277, %281 : vector<2x32xf32>
    %283 = vector.extract_strided_slice %2 {offsets = [0, 1, 0], sizes = [2, 1, 36], strides = [1, 1, 1]} : vector<2x4x36xf32> to vector<2x1x36xf32>
    %284 = vector.shape_cast %283 : vector<2x1x36xf32> to vector<2x36xf32>
    %c48 = arith.constant 48 : index
    %285 = memref.load %arg2[%c48] : memref<219xf32, #tpu.memory_space<smem>>
    %286 = vector.extract_strided_slice %284 {offsets = [0, 1], sizes = [2, 32], strides = [1, 1]} : vector<2x36xf32> to vector<2x32xf32>
    %287 = vector.broadcast %285 : f32 to vector<2x32xf32>
    %288 = arith.mulf %287, %286 : vector<2x32xf32>
    %289 = arith.addf %282, %288 : vector<2x32xf32>
    %c49 = arith.constant 49 : index
    %290 = memref.load %arg2[%c49] : memref<219xf32, #tpu.memory_space<smem>>
    %291 = vector.extract_strided_slice %284 {offsets = [0, 2], sizes = [2, 32], strides = [1, 1]} : vector<2x36xf32> to vector<2x32xf32>
    %292 = vector.broadcast %290 : f32 to vector<2x32xf32>
    %293 = arith.mulf %292, %291 : vector<2x32xf32>
    %294 = arith.addf %289, %293 : vector<2x32xf32>
    %c50 = arith.constant 50 : index
    %295 = memref.load %arg2[%c50] : memref<219xf32, #tpu.memory_space<smem>>
    %296 = vector.extract_strided_slice %284 {offsets = [0, 3], sizes = [2, 32], strides = [1, 1]} : vector<2x36xf32> to vector<2x32xf32>
    %297 = vector.broadcast %295 : f32 to vector<2x32xf32>
    %298 = arith.mulf %297, %296 : vector<2x32xf32>
    %299 = arith.addf %294, %298 : vector<2x32xf32>
    %300 = vector.extract_strided_slice %2 {offsets = [0, 2, 0], sizes = [2, 1, 36], strides = [1, 1, 1]} : vector<2x4x36xf32> to vector<2x1x36xf32>
    %301 = vector.shape_cast %300 : vector<2x1x36xf32> to vector<2x36xf32>
    %c51 = arith.constant 51 : index
    %302 = memref.load %arg2[%c51] : memref<219xf32, #tpu.memory_space<smem>>
    %303 = vector.extract_strided_slice %301 {offsets = [0, 1], sizes = [2, 32], strides = [1, 1]} : vector<2x36xf32> to vector<2x32xf32>
    %304 = vector.broadcast %302 : f32 to vector<2x32xf32>
    %305 = arith.mulf %304, %303 : vector<2x32xf32>
    %306 = arith.addf %299, %305 : vector<2x32xf32>
    %c52 = arith.constant 52 : index
    %307 = memref.load %arg2[%c52] : memref<219xf32, #tpu.memory_space<smem>>
    %308 = vector.extract_strided_slice %301 {offsets = [0, 2], sizes = [2, 32], strides = [1, 1]} : vector<2x36xf32> to vector<2x32xf32>
    %309 = vector.broadcast %307 : f32 to vector<2x32xf32>
    %310 = arith.mulf %309, %308 : vector<2x32xf32>
    %311 = arith.addf %306, %310 : vector<2x32xf32>
    %c53 = arith.constant 53 : index
    %312 = memref.load %arg2[%c53] : memref<219xf32, #tpu.memory_space<smem>>
    %313 = vector.extract_strided_slice %301 {offsets = [0, 3], sizes = [2, 32], strides = [1, 1]} : vector<2x36xf32> to vector<2x32xf32>
    %314 = vector.broadcast %312 : f32 to vector<2x32xf32>
    %315 = arith.mulf %314, %313 : vector<2x32xf32>
    %316 = arith.addf %311, %315 : vector<2x32xf32>
    %317 = vector.extract_strided_slice %2 {offsets = [0, 3, 0], sizes = [2, 1, 36], strides = [1, 1, 1]} : vector<2x4x36xf32> to vector<2x1x36xf32>
    %318 = vector.shape_cast %317 : vector<2x1x36xf32> to vector<2x36xf32>
    %c54 = arith.constant 54 : index
    %319 = memref.load %arg2[%c54] : memref<219xf32, #tpu.memory_space<smem>>
    %320 = vector.extract_strided_slice %318 {offsets = [0, 1], sizes = [2, 32], strides = [1, 1]} : vector<2x36xf32> to vector<2x32xf32>
    %321 = vector.broadcast %319 : f32 to vector<2x32xf32>
    %322 = arith.mulf %321, %320 : vector<2x32xf32>
    %323 = arith.addf %316, %322 : vector<2x32xf32>
    %c55 = arith.constant 55 : index
    %324 = memref.load %arg2[%c55] : memref<219xf32, #tpu.memory_space<smem>>
    %325 = vector.extract_strided_slice %318 {offsets = [0, 2], sizes = [2, 32], strides = [1, 1]} : vector<2x36xf32> to vector<2x32xf32>
    %326 = vector.broadcast %324 : f32 to vector<2x32xf32>
    %327 = arith.mulf %326, %325 : vector<2x32xf32>
    %328 = arith.addf %323, %327 : vector<2x32xf32>
    %c56 = arith.constant 56 : index
    %329 = memref.load %arg2[%c56] : memref<219xf32, #tpu.memory_space<smem>>
    %330 = vector.extract_strided_slice %318 {offsets = [0, 3], sizes = [2, 32], strides = [1, 1]} : vector<2x36xf32> to vector<2x32xf32>
    %331 = vector.broadcast %329 : f32 to vector<2x32xf32>
    %332 = arith.mulf %331, %330 : vector<2x32xf32>
    %333 = arith.addf %328, %332 : vector<2x32xf32>
    %c82 = arith.constant 82 : index
    %334 = memref.load %arg2[%c82] : memref<219xf32, #tpu.memory_space<smem>>
    %335 = vector.broadcast %334 : f32 to vector<2x32xf32>
    %336 = arith.addf %333, %335 : vector<2x32xf32>
    %cst_16 = arith.constant 0.000000e+00 : f32
    %337 = vector.broadcast %cst_16 : f32 to vector<2x32xf32>
    %338 = arith.maximumf %336, %337 : vector<2x32xf32>
    %c86 = arith.constant 86 : index
    %339 = memref.load %arg2[%c86] : memref<219xf32, #tpu.memory_space<smem>>
    %340 = vector.broadcast %339 : f32 to vector<2x32xf32>
    %341 = arith.mulf %338, %340 : vector<2x32xf32>
    %c90 = arith.constant 90 : index
    %342 = memref.load %arg2[%c90] : memref<219xf32, #tpu.memory_space<smem>>
    %343 = vector.broadcast %342 : f32 to vector<2x32xf32>
    %344 = arith.addf %341, %343 : vector<2x32xf32>
    %cst_17 = arith.constant 0.000000e+00 : f32
    %345 = vector.broadcast %cst_17 : f32 to vector<2x32xf32>
    %346 = vector.extract_strided_slice %2 {offsets = [0, 0, 0], sizes = [2, 1, 36], strides = [1, 1, 1]} : vector<2x4x36xf32> to vector<2x1x36xf32>
    %347 = vector.shape_cast %346 : vector<2x1x36xf32> to vector<2x36xf32>
    %c57 = arith.constant 57 : index
    %348 = memref.load %arg2[%c57] : memref<219xf32, #tpu.memory_space<smem>>
    %349 = vector.extract_strided_slice %347 {offsets = [0, 1], sizes = [2, 32], strides = [1, 1]} : vector<2x36xf32> to vector<2x32xf32>
    %350 = vector.broadcast %348 : f32 to vector<2x32xf32>
    %351 = arith.mulf %350, %349 : vector<2x32xf32>
    %352 = arith.addf %345, %351 : vector<2x32xf32>
    %c58 = arith.constant 58 : index
    %353 = memref.load %arg2[%c58] : memref<219xf32, #tpu.memory_space<smem>>
    %354 = vector.extract_strided_slice %347 {offsets = [0, 2], sizes = [2, 32], strides = [1, 1]} : vector<2x36xf32> to vector<2x32xf32>
    %355 = vector.broadcast %353 : f32 to vector<2x32xf32>
    %356 = arith.mulf %355, %354 : vector<2x32xf32>
    %357 = arith.addf %352, %356 : vector<2x32xf32>
    %c59 = arith.constant 59 : index
    %358 = memref.load %arg2[%c59] : memref<219xf32, #tpu.memory_space<smem>>
    %359 = vector.extract_strided_slice %347 {offsets = [0, 3], sizes = [2, 32], strides = [1, 1]} : vector<2x36xf32> to vector<2x32xf32>
    %360 = vector.broadcast %358 : f32 to vector<2x32xf32>
    %361 = arith.mulf %360, %359 : vector<2x32xf32>
    %362 = arith.addf %357, %361 : vector<2x32xf32>
    %363 = vector.extract_strided_slice %2 {offsets = [0, 1, 0], sizes = [2, 1, 36], strides = [1, 1, 1]} : vector<2x4x36xf32> to vector<2x1x36xf32>
    %364 = vector.shape_cast %363 : vector<2x1x36xf32> to vector<2x36xf32>
    %c60 = arith.constant 60 : index
    %365 = memref.load %arg2[%c60] : memref<219xf32, #tpu.memory_space<smem>>
    %366 = vector.extract_strided_slice %364 {offsets = [0, 1], sizes = [2, 32], strides = [1, 1]} : vector<2x36xf32> to vector<2x32xf32>
    %367 = vector.broadcast %365 : f32 to vector<2x32xf32>
    %368 = arith.mulf %367, %366 : vector<2x32xf32>
    %369 = arith.addf %362, %368 : vector<2x32xf32>
    %c61 = arith.constant 61 : index
    %370 = memref.load %arg2[%c61] : memref<219xf32, #tpu.memory_space<smem>>
    %371 = vector.extract_strided_slice %364 {offsets = [0, 2], sizes = [2, 32], strides = [1, 1]} : vector<2x36xf32> to vector<2x32xf32>
    %372 = vector.broadcast %370 : f32 to vector<2x32xf32>
    %373 = arith.mulf %372, %371 : vector<2x32xf32>
    %374 = arith.addf %369, %373 : vector<2x32xf32>
    %c62 = arith.constant 62 : index
    %375 = memref.load %arg2[%c62] : memref<219xf32, #tpu.memory_space<smem>>
    %376 = vector.extract_strided_slice %364 {offsets = [0, 3], sizes = [2, 32], strides = [1, 1]} : vector<2x36xf32> to vector<2x32xf32>
    %377 = vector.broadcast %375 : f32 to vector<2x32xf32>
    %378 = arith.mulf %377, %376 : vector<2x32xf32>
    %379 = arith.addf %374, %378 : vector<2x32xf32>
    %380 = vector.extract_strided_slice %2 {offsets = [0, 2, 0], sizes = [2, 1, 36], strides = [1, 1, 1]} : vector<2x4x36xf32> to vector<2x1x36xf32>
    %381 = vector.shape_cast %380 : vector<2x1x36xf32> to vector<2x36xf32>
    %c63 = arith.constant 63 : index
    %382 = memref.load %arg2[%c63] : memref<219xf32, #tpu.memory_space<smem>>
    %383 = vector.extract_strided_slice %381 {offsets = [0, 1], sizes = [2, 32], strides = [1, 1]} : vector<2x36xf32> to vector<2x32xf32>
    %384 = vector.broadcast %382 : f32 to vector<2x32xf32>
    %385 = arith.mulf %384, %383 : vector<2x32xf32>
    %386 = arith.addf %379, %385 : vector<2x32xf32>
    %c64 = arith.constant 64 : index
    %387 = memref.load %arg2[%c64] : memref<219xf32, #tpu.memory_space<smem>>
    %388 = vector.extract_strided_slice %381 {offsets = [0, 2], sizes = [2, 32], strides = [1, 1]} : vector<2x36xf32> to vector<2x32xf32>
    %389 = vector.broadcast %387 : f32 to vector<2x32xf32>
    %390 = arith.mulf %389, %388 : vector<2x32xf32>
    %391 = arith.addf %386, %390 : vector<2x32xf32>
    %c65 = arith.constant 65 : index
    %392 = memref.load %arg2[%c65] : memref<219xf32, #tpu.memory_space<smem>>
    %393 = vector.extract_strided_slice %381 {offsets = [0, 3], sizes = [2, 32], strides = [1, 1]} : vector<2x36xf32> to vector<2x32xf32>
    %394 = vector.broadcast %392 : f32 to vector<2x32xf32>
    %395 = arith.mulf %394, %393 : vector<2x32xf32>
    %396 = arith.addf %391, %395 : vector<2x32xf32>
    %397 = vector.extract_strided_slice %2 {offsets = [0, 3, 0], sizes = [2, 1, 36], strides = [1, 1, 1]} : vector<2x4x36xf32> to vector<2x1x36xf32>
    %398 = vector.shape_cast %397 : vector<2x1x36xf32> to vector<2x36xf32>
    %c66 = arith.constant 66 : index
    %399 = memref.load %arg2[%c66] : memref<219xf32, #tpu.memory_space<smem>>
    %400 = vector.extract_strided_slice %398 {offsets = [0, 1], sizes = [2, 32], strides = [1, 1]} : vector<2x36xf32> to vector<2x32xf32>
    %401 = vector.broadcast %399 : f32 to vector<2x32xf32>
    %402 = arith.mulf %401, %400 : vector<2x32xf32>
    %403 = arith.addf %396, %402 : vector<2x32xf32>
    %c67 = arith.constant 67 : index
    %404 = memref.load %arg2[%c67] : memref<219xf32, #tpu.memory_space<smem>>
    %405 = vector.extract_strided_slice %398 {offsets = [0, 2], sizes = [2, 32], strides = [1, 1]} : vector<2x36xf32> to vector<2x32xf32>
    %406 = vector.broadcast %404 : f32 to vector<2x32xf32>
    %407 = arith.mulf %406, %405 : vector<2x32xf32>
    %408 = arith.addf %403, %407 : vector<2x32xf32>
    %c68 = arith.constant 68 : index
    %409 = memref.load %arg2[%c68] : memref<219xf32, #tpu.memory_space<smem>>
    %410 = vector.extract_strided_slice %398 {offsets = [0, 3], sizes = [2, 32], strides = [1, 1]} : vector<2x36xf32> to vector<2x32xf32>
    %411 = vector.broadcast %409 : f32 to vector<2x32xf32>
    %412 = arith.mulf %411, %410 : vector<2x32xf32>
    %413 = arith.addf %408, %412 : vector<2x32xf32>
    %c83 = arith.constant 83 : index
    %414 = memref.load %arg2[%c83] : memref<219xf32, #tpu.memory_space<smem>>
    %415 = vector.broadcast %414 : f32 to vector<2x32xf32>
    %416 = arith.addf %413, %415 : vector<2x32xf32>
    %cst_18 = arith.constant 0.000000e+00 : f32
    %417 = vector.broadcast %cst_18 : f32 to vector<2x32xf32>
    %418 = arith.maximumf %416, %417 : vector<2x32xf32>
    %c87 = arith.constant 87 : index
    %419 = memref.load %arg2[%c87] : memref<219xf32, #tpu.memory_space<smem>>
    %420 = vector.broadcast %419 : f32 to vector<2x32xf32>
    %421 = arith.mulf %418, %420 : vector<2x32xf32>
    %c91 = arith.constant 91 : index
    %422 = memref.load %arg2[%c91] : memref<219xf32, #tpu.memory_space<smem>>
    %423 = vector.broadcast %422 : f32 to vector<2x32xf32>
    %424 = arith.addf %421, %423 : vector<2x32xf32>
    %cst_19 = arith.constant 0.000000e+00 : f32
    %425 = vector.broadcast %cst_19 : f32 to vector<2x32xf32>
    %426 = vector.extract_strided_slice %2 {offsets = [0, 0, 0], sizes = [2, 1, 36], strides = [1, 1, 1]} : vector<2x4x36xf32> to vector<2x1x36xf32>
    %427 = vector.shape_cast %426 : vector<2x1x36xf32> to vector<2x36xf32>
    %c69 = arith.constant 69 : index
    %428 = memref.load %arg2[%c69] : memref<219xf32, #tpu.memory_space<smem>>
    %429 = vector.extract_strided_slice %427 {offsets = [0, 1], sizes = [2, 32], strides = [1, 1]} : vector<2x36xf32> to vector<2x32xf32>
    %430 = vector.broadcast %428 : f32 to vector<2x32xf32>
    %431 = arith.mulf %430, %429 : vector<2x32xf32>
    %432 = arith.addf %425, %431 : vector<2x32xf32>
    %c70 = arith.constant 70 : index
    %433 = memref.load %arg2[%c70] : memref<219xf32, #tpu.memory_space<smem>>
    %434 = vector.extract_strided_slice %427 {offsets = [0, 2], sizes = [2, 32], strides = [1, 1]} : vector<2x36xf32> to vector<2x32xf32>
    %435 = vector.broadcast %433 : f32 to vector<2x32xf32>
    %436 = arith.mulf %435, %434 : vector<2x32xf32>
    %437 = arith.addf %432, %436 : vector<2x32xf32>
    %c71 = arith.constant 71 : index
    %438 = memref.load %arg2[%c71] : memref<219xf32, #tpu.memory_space<smem>>
    %439 = vector.extract_strided_slice %427 {offsets = [0, 3], sizes = [2, 32], strides = [1, 1]} : vector<2x36xf32> to vector<2x32xf32>
    %440 = vector.broadcast %438 : f32 to vector<2x32xf32>
    %441 = arith.mulf %440, %439 : vector<2x32xf32>
    %442 = arith.addf %437, %441 : vector<2x32xf32>
    %443 = vector.extract_strided_slice %2 {offsets = [0, 1, 0], sizes = [2, 1, 36], strides = [1, 1, 1]} : vector<2x4x36xf32> to vector<2x1x36xf32>
    %444 = vector.shape_cast %443 : vector<2x1x36xf32> to vector<2x36xf32>
    %c72 = arith.constant 72 : index
    %445 = memref.load %arg2[%c72] : memref<219xf32, #tpu.memory_space<smem>>
    %446 = vector.extract_strided_slice %444 {offsets = [0, 1], sizes = [2, 32], strides = [1, 1]} : vector<2x36xf32> to vector<2x32xf32>
    %447 = vector.broadcast %445 : f32 to vector<2x32xf32>
    %448 = arith.mulf %447, %446 : vector<2x32xf32>
    %449 = arith.addf %442, %448 : vector<2x32xf32>
    %c73 = arith.constant 73 : index
    %450 = memref.load %arg2[%c73] : memref<219xf32, #tpu.memory_space<smem>>
    %451 = vector.extract_strided_slice %444 {offsets = [0, 2], sizes = [2, 32], strides = [1, 1]} : vector<2x36xf32> to vector<2x32xf32>
    %452 = vector.broadcast %450 : f32 to vector<2x32xf32>
    %453 = arith.mulf %452, %451 : vector<2x32xf32>
    %454 = arith.addf %449, %453 : vector<2x32xf32>
    %c74 = arith.constant 74 : index
    %455 = memref.load %arg2[%c74] : memref<219xf32, #tpu.memory_space<smem>>
    %456 = vector.extract_strided_slice %444 {offsets = [0, 3], sizes = [2, 32], strides = [1, 1]} : vector<2x36xf32> to vector<2x32xf32>
    %457 = vector.broadcast %455 : f32 to vector<2x32xf32>
    %458 = arith.mulf %457, %456 : vector<2x32xf32>
    %459 = arith.addf %454, %458 : vector<2x32xf32>
    %460 = vector.extract_strided_slice %2 {offsets = [0, 2, 0], sizes = [2, 1, 36], strides = [1, 1, 1]} : vector<2x4x36xf32> to vector<2x1x36xf32>
    %461 = vector.shape_cast %460 : vector<2x1x36xf32> to vector<2x36xf32>
    %c75 = arith.constant 75 : index
    %462 = memref.load %arg2[%c75] : memref<219xf32, #tpu.memory_space<smem>>
    %463 = vector.extract_strided_slice %461 {offsets = [0, 1], sizes = [2, 32], strides = [1, 1]} : vector<2x36xf32> to vector<2x32xf32>
    %464 = vector.broadcast %462 : f32 to vector<2x32xf32>
    %465 = arith.mulf %464, %463 : vector<2x32xf32>
    %466 = arith.addf %459, %465 : vector<2x32xf32>
    %c76 = arith.constant 76 : index
    %467 = memref.load %arg2[%c76] : memref<219xf32, #tpu.memory_space<smem>>
    %468 = vector.extract_strided_slice %461 {offsets = [0, 2], sizes = [2, 32], strides = [1, 1]} : vector<2x36xf32> to vector<2x32xf32>
    %469 = vector.broadcast %467 : f32 to vector<2x32xf32>
    %470 = arith.mulf %469, %468 : vector<2x32xf32>
    %471 = arith.addf %466, %470 : vector<2x32xf32>
    %c77 = arith.constant 77 : index
    %472 = memref.load %arg2[%c77] : memref<219xf32, #tpu.memory_space<smem>>
    %473 = vector.extract_strided_slice %461 {offsets = [0, 3], sizes = [2, 32], strides = [1, 1]} : vector<2x36xf32> to vector<2x32xf32>
    %474 = vector.broadcast %472 : f32 to vector<2x32xf32>
    %475 = arith.mulf %474, %473 : vector<2x32xf32>
    %476 = arith.addf %471, %475 : vector<2x32xf32>
    %477 = vector.extract_strided_slice %2 {offsets = [0, 3, 0], sizes = [2, 1, 36], strides = [1, 1, 1]} : vector<2x4x36xf32> to vector<2x1x36xf32>
    %478 = vector.shape_cast %477 : vector<2x1x36xf32> to vector<2x36xf32>
    %c78 = arith.constant 78 : index
    %479 = memref.load %arg2[%c78] : memref<219xf32, #tpu.memory_space<smem>>
    %480 = vector.extract_strided_slice %478 {offsets = [0, 1], sizes = [2, 32], strides = [1, 1]} : vector<2x36xf32> to vector<2x32xf32>
    %481 = vector.broadcast %479 : f32 to vector<2x32xf32>
    %482 = arith.mulf %481, %480 : vector<2x32xf32>
    %483 = arith.addf %476, %482 : vector<2x32xf32>
    %c79 = arith.constant 79 : index
    %484 = memref.load %arg2[%c79] : memref<219xf32, #tpu.memory_space<smem>>
    %485 = vector.extract_strided_slice %478 {offsets = [0, 2], sizes = [2, 32], strides = [1, 1]} : vector<2x36xf32> to vector<2x32xf32>
    %486 = vector.broadcast %484 : f32 to vector<2x32xf32>
    %487 = arith.mulf %486, %485 : vector<2x32xf32>
    %488 = arith.addf %483, %487 : vector<2x32xf32>
    %c80 = arith.constant 80 : index
    %489 = memref.load %arg2[%c80] : memref<219xf32, #tpu.memory_space<smem>>
    %490 = vector.extract_strided_slice %478 {offsets = [0, 3], sizes = [2, 32], strides = [1, 1]} : vector<2x36xf32> to vector<2x32xf32>
    %491 = vector.broadcast %489 : f32 to vector<2x32xf32>
    %492 = arith.mulf %491, %490 : vector<2x32xf32>
    %493 = arith.addf %488, %492 : vector<2x32xf32>
    %c84 = arith.constant 84 : index
    %494 = memref.load %arg2[%c84] : memref<219xf32, #tpu.memory_space<smem>>
    %495 = vector.broadcast %494 : f32 to vector<2x32xf32>
    %496 = arith.addf %493, %495 : vector<2x32xf32>
    %cst_20 = arith.constant 0.000000e+00 : f32
    %497 = vector.broadcast %cst_20 : f32 to vector<2x32xf32>
    %498 = arith.maximumf %496, %497 : vector<2x32xf32>
    %c88 = arith.constant 88 : index
    %499 = memref.load %arg2[%c88] : memref<219xf32, #tpu.memory_space<smem>>
    %500 = vector.broadcast %499 : f32 to vector<2x32xf32>
    %501 = arith.mulf %498, %500 : vector<2x32xf32>
    %c92 = arith.constant 92 : index
    %502 = memref.load %arg2[%c92] : memref<219xf32, #tpu.memory_space<smem>>
    %503 = vector.broadcast %502 : f32 to vector<2x32xf32>
    %504 = arith.addf %501, %503 : vector<2x32xf32>
    %cst_21 = arith.constant 0.000000e+00 : f32
    %505 = vector.broadcast %cst_21 : f32 to vector<2x32xf32>
    %cst_22 = arith.constant 0.000000e+00 : f32
    %506 = vector.broadcast %cst_22 : f32 to vector<2x1xf32>
    %507 = tpu.concatenate %506, %264, %506 in 1 : vector<2x1xf32>, vector<2x32xf32>, vector<2x1xf32> -> vector<2x34xf32>
    %c93 = arith.constant 93 : index
    %508 = memref.load %arg2[%c93] : memref<219xf32, #tpu.memory_space<smem>>
    %509 = vector.extract_strided_slice %507 {offsets = [0, 0], sizes = [2, 32], strides = [1, 1]} : vector<2x34xf32> to vector<2x32xf32>
    %510 = vector.broadcast %508 : f32 to vector<2x32xf32>
    %511 = arith.mulf %510, %509 : vector<2x32xf32>
    %512 = arith.addf %505, %511 : vector<2x32xf32>
    %c94 = arith.constant 94 : index
    %513 = memref.load %arg2[%c94] : memref<219xf32, #tpu.memory_space<smem>>
    %514 = vector.extract_strided_slice %507 {offsets = [0, 1], sizes = [2, 32], strides = [1, 1]} : vector<2x34xf32> to vector<2x32xf32>
    %515 = vector.broadcast %513 : f32 to vector<2x32xf32>
    %516 = arith.mulf %515, %514 : vector<2x32xf32>
    %517 = arith.addf %512, %516 : vector<2x32xf32>
    %c95 = arith.constant 95 : index
    %518 = memref.load %arg2[%c95] : memref<219xf32, #tpu.memory_space<smem>>
    %519 = vector.extract_strided_slice %507 {offsets = [0, 2], sizes = [2, 32], strides = [1, 1]} : vector<2x34xf32> to vector<2x32xf32>
    %520 = vector.broadcast %518 : f32 to vector<2x32xf32>
    %521 = arith.mulf %520, %519 : vector<2x32xf32>
    %522 = arith.addf %517, %521 : vector<2x32xf32>
    %cst_23 = arith.constant 0.000000e+00 : f32
    %523 = vector.broadcast %cst_23 : f32 to vector<2x1xf32>
    %524 = tpu.concatenate %523, %344, %523 in 1 : vector<2x1xf32>, vector<2x32xf32>, vector<2x1xf32> -> vector<2x34xf32>
    %c96 = arith.constant 96 : index
    %525 = memref.load %arg2[%c96] : memref<219xf32, #tpu.memory_space<smem>>
    %526 = vector.extract_strided_slice %524 {offsets = [0, 0], sizes = [2, 32], strides = [1, 1]} : vector<2x34xf32> to vector<2x32xf32>
    %527 = vector.broadcast %525 : f32 to vector<2x32xf32>
    %528 = arith.mulf %527, %526 : vector<2x32xf32>
    %529 = arith.addf %522, %528 : vector<2x32xf32>
    %c97 = arith.constant 97 : index
    %530 = memref.load %arg2[%c97] : memref<219xf32, #tpu.memory_space<smem>>
    %531 = vector.extract_strided_slice %524 {offsets = [0, 1], sizes = [2, 32], strides = [1, 1]} : vector<2x34xf32> to vector<2x32xf32>
    %532 = vector.broadcast %530 : f32 to vector<2x32xf32>
    %533 = arith.mulf %532, %531 : vector<2x32xf32>
    %534 = arith.addf %529, %533 : vector<2x32xf32>
    %c98 = arith.constant 98 : index
    %535 = memref.load %arg2[%c98] : memref<219xf32, #tpu.memory_space<smem>>
    %536 = vector.extract_strided_slice %524 {offsets = [0, 2], sizes = [2, 32], strides = [1, 1]} : vector<2x34xf32> to vector<2x32xf32>
    %537 = vector.broadcast %535 : f32 to vector<2x32xf32>
    %538 = arith.mulf %537, %536 : vector<2x32xf32>
    %539 = arith.addf %534, %538 : vector<2x32xf32>
    %cst_24 = arith.constant 0.000000e+00 : f32
    %540 = vector.broadcast %cst_24 : f32 to vector<2x1xf32>
    %541 = tpu.concatenate %540, %424, %540 in 1 : vector<2x1xf32>, vector<2x32xf32>, vector<2x1xf32> -> vector<2x34xf32>
    %c99 = arith.constant 99 : index
    %542 = memref.load %arg2[%c99] : memref<219xf32, #tpu.memory_space<smem>>
    %543 = vector.extract_strided_slice %541 {offsets = [0, 0], sizes = [2, 32], strides = [1, 1]} : vector<2x34xf32> to vector<2x32xf32>
    %544 = vector.broadcast %542 : f32 to vector<2x32xf32>
    %545 = arith.mulf %544, %543 : vector<2x32xf32>
    %546 = arith.addf %539, %545 : vector<2x32xf32>
    %c100 = arith.constant 100 : index
    %547 = memref.load %arg2[%c100] : memref<219xf32, #tpu.memory_space<smem>>
    %548 = vector.extract_strided_slice %541 {offsets = [0, 1], sizes = [2, 32], strides = [1, 1]} : vector<2x34xf32> to vector<2x32xf32>
    %549 = vector.broadcast %547 : f32 to vector<2x32xf32>
    %550 = arith.mulf %549, %548 : vector<2x32xf32>
    %551 = arith.addf %546, %550 : vector<2x32xf32>
    %c101 = arith.constant 101 : index
    %552 = memref.load %arg2[%c101] : memref<219xf32, #tpu.memory_space<smem>>
    %553 = vector.extract_strided_slice %541 {offsets = [0, 2], sizes = [2, 32], strides = [1, 1]} : vector<2x34xf32> to vector<2x32xf32>
    %554 = vector.broadcast %552 : f32 to vector<2x32xf32>
    %555 = arith.mulf %554, %553 : vector<2x32xf32>
    %556 = arith.addf %551, %555 : vector<2x32xf32>
    %cst_25 = arith.constant 0.000000e+00 : f32
    %557 = vector.broadcast %cst_25 : f32 to vector<2x1xf32>
    %558 = tpu.concatenate %557, %504, %557 in 1 : vector<2x1xf32>, vector<2x32xf32>, vector<2x1xf32> -> vector<2x34xf32>
    %c102 = arith.constant 102 : index
    %559 = memref.load %arg2[%c102] : memref<219xf32, #tpu.memory_space<smem>>
    %560 = vector.extract_strided_slice %558 {offsets = [0, 0], sizes = [2, 32], strides = [1, 1]} : vector<2x34xf32> to vector<2x32xf32>
    %561 = vector.broadcast %559 : f32 to vector<2x32xf32>
    %562 = arith.mulf %561, %560 : vector<2x32xf32>
    %563 = arith.addf %556, %562 : vector<2x32xf32>
    %c103 = arith.constant 103 : index
    %564 = memref.load %arg2[%c103] : memref<219xf32, #tpu.memory_space<smem>>
    %565 = vector.extract_strided_slice %558 {offsets = [0, 1], sizes = [2, 32], strides = [1, 1]} : vector<2x34xf32> to vector<2x32xf32>
    %566 = vector.broadcast %564 : f32 to vector<2x32xf32>
    %567 = arith.mulf %566, %565 : vector<2x32xf32>
    %568 = arith.addf %563, %567 : vector<2x32xf32>
    %c104 = arith.constant 104 : index
    %569 = memref.load %arg2[%c104] : memref<219xf32, #tpu.memory_space<smem>>
    %570 = vector.extract_strided_slice %558 {offsets = [0, 2], sizes = [2, 32], strides = [1, 1]} : vector<2x34xf32> to vector<2x32xf32>
    %571 = vector.broadcast %569 : f32 to vector<2x32xf32>
    %572 = arith.mulf %571, %570 : vector<2x32xf32>
    %573 = arith.addf %568, %572 : vector<2x32xf32>
    %c105 = arith.constant 105 : index
    %574 = memref.load %arg2[%c105] : memref<219xf32, #tpu.memory_space<smem>>
    %575 = vector.broadcast %574 : f32 to vector<2x32xf32>
    %576 = arith.addf %573, %575 : vector<2x32xf32>
    %cst_26 = arith.constant 0.000000e+00 : f32
    %577 = vector.broadcast %cst_26 : f32 to vector<2x32xf32>
    %578 = arith.maximumf %576, %577 : vector<2x32xf32>
    %cst_27 = arith.constant 0.000000e+00 : f32
    %579 = vector.broadcast %cst_27 : f32 to vector<2x32xf32>
    %580 = vector.extract_strided_slice %2 {offsets = [0, 0, 0], sizes = [2, 1, 36], strides = [1, 1, 1]} : vector<2x4x36xf32> to vector<2x1x36xf32>
    %581 = vector.shape_cast %580 : vector<2x1x36xf32> to vector<2x36xf32>
    %c106 = arith.constant 106 : index
    %582 = memref.load %arg2[%c106] : memref<219xf32, #tpu.memory_space<smem>>
    %583 = vector.extract_strided_slice %581 {offsets = [0, 0], sizes = [2, 32], strides = [1, 1]} : vector<2x36xf32> to vector<2x32xf32>
    %584 = vector.broadcast %582 : f32 to vector<2x32xf32>
    %585 = arith.mulf %584, %583 : vector<2x32xf32>
    %586 = arith.addf %579, %585 : vector<2x32xf32>
    %c107 = arith.constant 107 : index
    %587 = memref.load %arg2[%c107] : memref<219xf32, #tpu.memory_space<smem>>
    %588 = vector.extract_strided_slice %581 {offsets = [0, 1], sizes = [2, 32], strides = [1, 1]} : vector<2x36xf32> to vector<2x32xf32>
    %589 = vector.broadcast %587 : f32 to vector<2x32xf32>
    %590 = arith.mulf %589, %588 : vector<2x32xf32>
    %591 = arith.addf %586, %590 : vector<2x32xf32>
    %c108 = arith.constant 108 : index
    %592 = memref.load %arg2[%c108] : memref<219xf32, #tpu.memory_space<smem>>
    %593 = vector.extract_strided_slice %581 {offsets = [0, 2], sizes = [2, 32], strides = [1, 1]} : vector<2x36xf32> to vector<2x32xf32>
    %594 = vector.broadcast %592 : f32 to vector<2x32xf32>
    %595 = arith.mulf %594, %593 : vector<2x32xf32>
    %596 = arith.addf %591, %595 : vector<2x32xf32>
    %c109 = arith.constant 109 : index
    %597 = memref.load %arg2[%c109] : memref<219xf32, #tpu.memory_space<smem>>
    %598 = vector.extract_strided_slice %581 {offsets = [0, 3], sizes = [2, 32], strides = [1, 1]} : vector<2x36xf32> to vector<2x32xf32>
    %599 = vector.broadcast %597 : f32 to vector<2x32xf32>
    %600 = arith.mulf %599, %598 : vector<2x32xf32>
    %601 = arith.addf %596, %600 : vector<2x32xf32>
    %c110 = arith.constant 110 : index
    %602 = memref.load %arg2[%c110] : memref<219xf32, #tpu.memory_space<smem>>
    %603 = vector.extract_strided_slice %581 {offsets = [0, 4], sizes = [2, 32], strides = [1, 1]} : vector<2x36xf32> to vector<2x32xf32>
    %604 = vector.broadcast %602 : f32 to vector<2x32xf32>
    %605 = arith.mulf %604, %603 : vector<2x32xf32>
    %606 = arith.addf %601, %605 : vector<2x32xf32>
    %607 = vector.extract_strided_slice %2 {offsets = [0, 1, 0], sizes = [2, 1, 36], strides = [1, 1, 1]} : vector<2x4x36xf32> to vector<2x1x36xf32>
    %608 = vector.shape_cast %607 : vector<2x1x36xf32> to vector<2x36xf32>
    %c111 = arith.constant 111 : index
    %609 = memref.load %arg2[%c111] : memref<219xf32, #tpu.memory_space<smem>>
    %610 = vector.extract_strided_slice %608 {offsets = [0, 0], sizes = [2, 32], strides = [1, 1]} : vector<2x36xf32> to vector<2x32xf32>
    %611 = vector.broadcast %609 : f32 to vector<2x32xf32>
    %612 = arith.mulf %611, %610 : vector<2x32xf32>
    %613 = arith.addf %606, %612 : vector<2x32xf32>
    %c112 = arith.constant 112 : index
    %614 = memref.load %arg2[%c112] : memref<219xf32, #tpu.memory_space<smem>>
    %615 = vector.extract_strided_slice %608 {offsets = [0, 1], sizes = [2, 32], strides = [1, 1]} : vector<2x36xf32> to vector<2x32xf32>
    %616 = vector.broadcast %614 : f32 to vector<2x32xf32>
    %617 = arith.mulf %616, %615 : vector<2x32xf32>
    %618 = arith.addf %613, %617 : vector<2x32xf32>
    %c113 = arith.constant 113 : index
    %619 = memref.load %arg2[%c113] : memref<219xf32, #tpu.memory_space<smem>>
    %620 = vector.extract_strided_slice %608 {offsets = [0, 2], sizes = [2, 32], strides = [1, 1]} : vector<2x36xf32> to vector<2x32xf32>
    %621 = vector.broadcast %619 : f32 to vector<2x32xf32>
    %622 = arith.mulf %621, %620 : vector<2x32xf32>
    %623 = arith.addf %618, %622 : vector<2x32xf32>
    %c114 = arith.constant 114 : index
    %624 = memref.load %arg2[%c114] : memref<219xf32, #tpu.memory_space<smem>>
    %625 = vector.extract_strided_slice %608 {offsets = [0, 3], sizes = [2, 32], strides = [1, 1]} : vector<2x36xf32> to vector<2x32xf32>
    %626 = vector.broadcast %624 : f32 to vector<2x32xf32>
    %627 = arith.mulf %626, %625 : vector<2x32xf32>
    %628 = arith.addf %623, %627 : vector<2x32xf32>
    %c115 = arith.constant 115 : index
    %629 = memref.load %arg2[%c115] : memref<219xf32, #tpu.memory_space<smem>>
    %630 = vector.extract_strided_slice %608 {offsets = [0, 4], sizes = [2, 32], strides = [1, 1]} : vector<2x36xf32> to vector<2x32xf32>
    %631 = vector.broadcast %629 : f32 to vector<2x32xf32>
    %632 = arith.mulf %631, %630 : vector<2x32xf32>
    %633 = arith.addf %628, %632 : vector<2x32xf32>
    %634 = vector.extract_strided_slice %2 {offsets = [0, 2, 0], sizes = [2, 1, 36], strides = [1, 1, 1]} : vector<2x4x36xf32> to vector<2x1x36xf32>
    %635 = vector.shape_cast %634 : vector<2x1x36xf32> to vector<2x36xf32>
    %c116 = arith.constant 116 : index
    %636 = memref.load %arg2[%c116] : memref<219xf32, #tpu.memory_space<smem>>
    %637 = vector.extract_strided_slice %635 {offsets = [0, 0], sizes = [2, 32], strides = [1, 1]} : vector<2x36xf32> to vector<2x32xf32>
    %638 = vector.broadcast %636 : f32 to vector<2x32xf32>
    %639 = arith.mulf %638, %637 : vector<2x32xf32>
    %640 = arith.addf %633, %639 : vector<2x32xf32>
    %c117 = arith.constant 117 : index
    %641 = memref.load %arg2[%c117] : memref<219xf32, #tpu.memory_space<smem>>
    %642 = vector.extract_strided_slice %635 {offsets = [0, 1], sizes = [2, 32], strides = [1, 1]} : vector<2x36xf32> to vector<2x32xf32>
    %643 = vector.broadcast %641 : f32 to vector<2x32xf32>
    %644 = arith.mulf %643, %642 : vector<2x32xf32>
    %645 = arith.addf %640, %644 : vector<2x32xf32>
    %c118 = arith.constant 118 : index
    %646 = memref.load %arg2[%c118] : memref<219xf32, #tpu.memory_space<smem>>
    %647 = vector.extract_strided_slice %635 {offsets = [0, 2], sizes = [2, 32], strides = [1, 1]} : vector<2x36xf32> to vector<2x32xf32>
    %648 = vector.broadcast %646 : f32 to vector<2x32xf32>
    %649 = arith.mulf %648, %647 : vector<2x32xf32>
    %650 = arith.addf %645, %649 : vector<2x32xf32>
    %c119 = arith.constant 119 : index
    %651 = memref.load %arg2[%c119] : memref<219xf32, #tpu.memory_space<smem>>
    %652 = vector.extract_strided_slice %635 {offsets = [0, 3], sizes = [2, 32], strides = [1, 1]} : vector<2x36xf32> to vector<2x32xf32>
    %653 = vector.broadcast %651 : f32 to vector<2x32xf32>
    %654 = arith.mulf %653, %652 : vector<2x32xf32>
    %655 = arith.addf %650, %654 : vector<2x32xf32>
    %c120 = arith.constant 120 : index
    %656 = memref.load %arg2[%c120] : memref<219xf32, #tpu.memory_space<smem>>
    %657 = vector.extract_strided_slice %635 {offsets = [0, 4], sizes = [2, 32], strides = [1, 1]} : vector<2x36xf32> to vector<2x32xf32>
    %658 = vector.broadcast %656 : f32 to vector<2x32xf32>
    %659 = arith.mulf %658, %657 : vector<2x32xf32>
    %660 = arith.addf %655, %659 : vector<2x32xf32>
    %661 = vector.extract_strided_slice %2 {offsets = [0, 3, 0], sizes = [2, 1, 36], strides = [1, 1, 1]} : vector<2x4x36xf32> to vector<2x1x36xf32>
    %662 = vector.shape_cast %661 : vector<2x1x36xf32> to vector<2x36xf32>
    %c121 = arith.constant 121 : index
    %663 = memref.load %arg2[%c121] : memref<219xf32, #tpu.memory_space<smem>>
    %664 = vector.extract_strided_slice %662 {offsets = [0, 0], sizes = [2, 32], strides = [1, 1]} : vector<2x36xf32> to vector<2x32xf32>
    %665 = vector.broadcast %663 : f32 to vector<2x32xf32>
    %666 = arith.mulf %665, %664 : vector<2x32xf32>
    %667 = arith.addf %660, %666 : vector<2x32xf32>
    %c122 = arith.constant 122 : index
    %668 = memref.load %arg2[%c122] : memref<219xf32, #tpu.memory_space<smem>>
    %669 = vector.extract_strided_slice %662 {offsets = [0, 1], sizes = [2, 32], strides = [1, 1]} : vector<2x36xf32> to vector<2x32xf32>
    %670 = vector.broadcast %668 : f32 to vector<2x32xf32>
    %671 = arith.mulf %670, %669 : vector<2x32xf32>
    %672 = arith.addf %667, %671 : vector<2x32xf32>
    %c123 = arith.constant 123 : index
    %673 = memref.load %arg2[%c123] : memref<219xf32, #tpu.memory_space<smem>>
    %674 = vector.extract_strided_slice %662 {offsets = [0, 2], sizes = [2, 32], strides = [1, 1]} : vector<2x36xf32> to vector<2x32xf32>
    %675 = vector.broadcast %673 : f32 to vector<2x32xf32>
    %676 = arith.mulf %675, %674 : vector<2x32xf32>
    %677 = arith.addf %672, %676 : vector<2x32xf32>
    %c124 = arith.constant 124 : index
    %678 = memref.load %arg2[%c124] : memref<219xf32, #tpu.memory_space<smem>>
    %679 = vector.extract_strided_slice %662 {offsets = [0, 3], sizes = [2, 32], strides = [1, 1]} : vector<2x36xf32> to vector<2x32xf32>
    %680 = vector.broadcast %678 : f32 to vector<2x32xf32>
    %681 = arith.mulf %680, %679 : vector<2x32xf32>
    %682 = arith.addf %677, %681 : vector<2x32xf32>
    %c125 = arith.constant 125 : index
    %683 = memref.load %arg2[%c125] : memref<219xf32, #tpu.memory_space<smem>>
    %684 = vector.extract_strided_slice %662 {offsets = [0, 4], sizes = [2, 32], strides = [1, 1]} : vector<2x36xf32> to vector<2x32xf32>
    %685 = vector.broadcast %683 : f32 to vector<2x32xf32>
    %686 = arith.mulf %685, %684 : vector<2x32xf32>
    %687 = arith.addf %682, %686 : vector<2x32xf32>
    %c186 = arith.constant 186 : index
    %688 = memref.load %arg2[%c186] : memref<219xf32, #tpu.memory_space<smem>>
    %689 = vector.broadcast %688 : f32 to vector<2x32xf32>
    %690 = arith.addf %687, %689 : vector<2x32xf32>
    %cst_28 = arith.constant 0.000000e+00 : f32
    %691 = vector.broadcast %cst_28 : f32 to vector<2x32xf32>
    %692 = arith.maximumf %690, %691 : vector<2x32xf32>
    %c190 = arith.constant 190 : index
    %693 = memref.load %arg2[%c190] : memref<219xf32, #tpu.memory_space<smem>>
    %694 = vector.broadcast %693 : f32 to vector<2x32xf32>
    %695 = arith.mulf %692, %694 : vector<2x32xf32>
    %c194 = arith.constant 194 : index
    %696 = memref.load %arg2[%c194] : memref<219xf32, #tpu.memory_space<smem>>
    %697 = vector.broadcast %696 : f32 to vector<2x32xf32>
    %698 = arith.addf %695, %697 : vector<2x32xf32>
    %cst_29 = arith.constant 0.000000e+00 : f32
    %699 = vector.broadcast %cst_29 : f32 to vector<2x32xf32>
    %700 = vector.extract_strided_slice %2 {offsets = [0, 0, 0], sizes = [2, 1, 36], strides = [1, 1, 1]} : vector<2x4x36xf32> to vector<2x1x36xf32>
    %701 = vector.shape_cast %700 : vector<2x1x36xf32> to vector<2x36xf32>
    %c126 = arith.constant 126 : index
    %702 = memref.load %arg2[%c126] : memref<219xf32, #tpu.memory_space<smem>>
    %703 = vector.extract_strided_slice %701 {offsets = [0, 0], sizes = [2, 32], strides = [1, 1]} : vector<2x36xf32> to vector<2x32xf32>
    %704 = vector.broadcast %702 : f32 to vector<2x32xf32>
    %705 = arith.mulf %704, %703 : vector<2x32xf32>
    %706 = arith.addf %699, %705 : vector<2x32xf32>
    %c127 = arith.constant 127 : index
    %707 = memref.load %arg2[%c127] : memref<219xf32, #tpu.memory_space<smem>>
    %708 = vector.extract_strided_slice %701 {offsets = [0, 1], sizes = [2, 32], strides = [1, 1]} : vector<2x36xf32> to vector<2x32xf32>
    %709 = vector.broadcast %707 : f32 to vector<2x32xf32>
    %710 = arith.mulf %709, %708 : vector<2x32xf32>
    %711 = arith.addf %706, %710 : vector<2x32xf32>
    %c128 = arith.constant 128 : index
    %712 = memref.load %arg2[%c128] : memref<219xf32, #tpu.memory_space<smem>>
    %713 = vector.extract_strided_slice %701 {offsets = [0, 2], sizes = [2, 32], strides = [1, 1]} : vector<2x36xf32> to vector<2x32xf32>
    %714 = vector.broadcast %712 : f32 to vector<2x32xf32>
    %715 = arith.mulf %714, %713 : vector<2x32xf32>
    %716 = arith.addf %711, %715 : vector<2x32xf32>
    %c129 = arith.constant 129 : index
    %717 = memref.load %arg2[%c129] : memref<219xf32, #tpu.memory_space<smem>>
    %718 = vector.extract_strided_slice %701 {offsets = [0, 3], sizes = [2, 32], strides = [1, 1]} : vector<2x36xf32> to vector<2x32xf32>
    %719 = vector.broadcast %717 : f32 to vector<2x32xf32>
    %720 = arith.mulf %719, %718 : vector<2x32xf32>
    %721 = arith.addf %716, %720 : vector<2x32xf32>
    %c130 = arith.constant 130 : index
    %722 = memref.load %arg2[%c130] : memref<219xf32, #tpu.memory_space<smem>>
    %723 = vector.extract_strided_slice %701 {offsets = [0, 4], sizes = [2, 32], strides = [1, 1]} : vector<2x36xf32> to vector<2x32xf32>
    %724 = vector.broadcast %722 : f32 to vector<2x32xf32>
    %725 = arith.mulf %724, %723 : vector<2x32xf32>
    %726 = arith.addf %721, %725 : vector<2x32xf32>
    %727 = vector.extract_strided_slice %2 {offsets = [0, 1, 0], sizes = [2, 1, 36], strides = [1, 1, 1]} : vector<2x4x36xf32> to vector<2x1x36xf32>
    %728 = vector.shape_cast %727 : vector<2x1x36xf32> to vector<2x36xf32>
    %c131 = arith.constant 131 : index
    %729 = memref.load %arg2[%c131] : memref<219xf32, #tpu.memory_space<smem>>
    %730 = vector.extract_strided_slice %728 {offsets = [0, 0], sizes = [2, 32], strides = [1, 1]} : vector<2x36xf32> to vector<2x32xf32>
    %731 = vector.broadcast %729 : f32 to vector<2x32xf32>
    %732 = arith.mulf %731, %730 : vector<2x32xf32>
    %733 = arith.addf %726, %732 : vector<2x32xf32>
    %c132 = arith.constant 132 : index
    %734 = memref.load %arg2[%c132] : memref<219xf32, #tpu.memory_space<smem>>
    %735 = vector.extract_strided_slice %728 {offsets = [0, 1], sizes = [2, 32], strides = [1, 1]} : vector<2x36xf32> to vector<2x32xf32>
    %736 = vector.broadcast %734 : f32 to vector<2x32xf32>
    %737 = arith.mulf %736, %735 : vector<2x32xf32>
    %738 = arith.addf %733, %737 : vector<2x32xf32>
    %c133 = arith.constant 133 : index
    %739 = memref.load %arg2[%c133] : memref<219xf32, #tpu.memory_space<smem>>
    %740 = vector.extract_strided_slice %728 {offsets = [0, 2], sizes = [2, 32], strides = [1, 1]} : vector<2x36xf32> to vector<2x32xf32>
    %741 = vector.broadcast %739 : f32 to vector<2x32xf32>
    %742 = arith.mulf %741, %740 : vector<2x32xf32>
    %743 = arith.addf %738, %742 : vector<2x32xf32>
    %c134 = arith.constant 134 : index
    %744 = memref.load %arg2[%c134] : memref<219xf32, #tpu.memory_space<smem>>
    %745 = vector.extract_strided_slice %728 {offsets = [0, 3], sizes = [2, 32], strides = [1, 1]} : vector<2x36xf32> to vector<2x32xf32>
    %746 = vector.broadcast %744 : f32 to vector<2x32xf32>
    %747 = arith.mulf %746, %745 : vector<2x32xf32>
    %748 = arith.addf %743, %747 : vector<2x32xf32>
    %c135 = arith.constant 135 : index
    %749 = memref.load %arg2[%c135] : memref<219xf32, #tpu.memory_space<smem>>
    %750 = vector.extract_strided_slice %728 {offsets = [0, 4], sizes = [2, 32], strides = [1, 1]} : vector<2x36xf32> to vector<2x32xf32>
    %751 = vector.broadcast %749 : f32 to vector<2x32xf32>
    %752 = arith.mulf %751, %750 : vector<2x32xf32>
    %753 = arith.addf %748, %752 : vector<2x32xf32>
    %754 = vector.extract_strided_slice %2 {offsets = [0, 2, 0], sizes = [2, 1, 36], strides = [1, 1, 1]} : vector<2x4x36xf32> to vector<2x1x36xf32>
    %755 = vector.shape_cast %754 : vector<2x1x36xf32> to vector<2x36xf32>
    %c136 = arith.constant 136 : index
    %756 = memref.load %arg2[%c136] : memref<219xf32, #tpu.memory_space<smem>>
    %757 = vector.extract_strided_slice %755 {offsets = [0, 0], sizes = [2, 32], strides = [1, 1]} : vector<2x36xf32> to vector<2x32xf32>
    %758 = vector.broadcast %756 : f32 to vector<2x32xf32>
    %759 = arith.mulf %758, %757 : vector<2x32xf32>
    %760 = arith.addf %753, %759 : vector<2x32xf32>
    %c137 = arith.constant 137 : index
    %761 = memref.load %arg2[%c137] : memref<219xf32, #tpu.memory_space<smem>>
    %762 = vector.extract_strided_slice %755 {offsets = [0, 1], sizes = [2, 32], strides = [1, 1]} : vector<2x36xf32> to vector<2x32xf32>
    %763 = vector.broadcast %761 : f32 to vector<2x32xf32>
    %764 = arith.mulf %763, %762 : vector<2x32xf32>
    %765 = arith.addf %760, %764 : vector<2x32xf32>
    %c138 = arith.constant 138 : index
    %766 = memref.load %arg2[%c138] : memref<219xf32, #tpu.memory_space<smem>>
    %767 = vector.extract_strided_slice %755 {offsets = [0, 2], sizes = [2, 32], strides = [1, 1]} : vector<2x36xf32> to vector<2x32xf32>
    %768 = vector.broadcast %766 : f32 to vector<2x32xf32>
    %769 = arith.mulf %768, %767 : vector<2x32xf32>
    %770 = arith.addf %765, %769 : vector<2x32xf32>
    %c139 = arith.constant 139 : index
    %771 = memref.load %arg2[%c139] : memref<219xf32, #tpu.memory_space<smem>>
    %772 = vector.extract_strided_slice %755 {offsets = [0, 3], sizes = [2, 32], strides = [1, 1]} : vector<2x36xf32> to vector<2x32xf32>
    %773 = vector.broadcast %771 : f32 to vector<2x32xf32>
    %774 = arith.mulf %773, %772 : vector<2x32xf32>
    %775 = arith.addf %770, %774 : vector<2x32xf32>
    %c140 = arith.constant 140 : index
    %776 = memref.load %arg2[%c140] : memref<219xf32, #tpu.memory_space<smem>>
    %777 = vector.extract_strided_slice %755 {offsets = [0, 4], sizes = [2, 32], strides = [1, 1]} : vector<2x36xf32> to vector<2x32xf32>
    %778 = vector.broadcast %776 : f32 to vector<2x32xf32>
    %779 = arith.mulf %778, %777 : vector<2x32xf32>
    %780 = arith.addf %775, %779 : vector<2x32xf32>
    %781 = vector.extract_strided_slice %2 {offsets = [0, 3, 0], sizes = [2, 1, 36], strides = [1, 1, 1]} : vector<2x4x36xf32> to vector<2x1x36xf32>
    %782 = vector.shape_cast %781 : vector<2x1x36xf32> to vector<2x36xf32>
    %c141 = arith.constant 141 : index
    %783 = memref.load %arg2[%c141] : memref<219xf32, #tpu.memory_space<smem>>
    %784 = vector.extract_strided_slice %782 {offsets = [0, 0], sizes = [2, 32], strides = [1, 1]} : vector<2x36xf32> to vector<2x32xf32>
    %785 = vector.broadcast %783 : f32 to vector<2x32xf32>
    %786 = arith.mulf %785, %784 : vector<2x32xf32>
    %787 = arith.addf %780, %786 : vector<2x32xf32>
    %c142 = arith.constant 142 : index
    %788 = memref.load %arg2[%c142] : memref<219xf32, #tpu.memory_space<smem>>
    %789 = vector.extract_strided_slice %782 {offsets = [0, 1], sizes = [2, 32], strides = [1, 1]} : vector<2x36xf32> to vector<2x32xf32>
    %790 = vector.broadcast %788 : f32 to vector<2x32xf32>
    %791 = arith.mulf %790, %789 : vector<2x32xf32>
    %792 = arith.addf %787, %791 : vector<2x32xf32>
    %c143 = arith.constant 143 : index
    %793 = memref.load %arg2[%c143] : memref<219xf32, #tpu.memory_space<smem>>
    %794 = vector.extract_strided_slice %782 {offsets = [0, 2], sizes = [2, 32], strides = [1, 1]} : vector<2x36xf32> to vector<2x32xf32>
    %795 = vector.broadcast %793 : f32 to vector<2x32xf32>
    %796 = arith.mulf %795, %794 : vector<2x32xf32>
    %797 = arith.addf %792, %796 : vector<2x32xf32>
    %c144 = arith.constant 144 : index
    %798 = memref.load %arg2[%c144] : memref<219xf32, #tpu.memory_space<smem>>
    %799 = vector.extract_strided_slice %782 {offsets = [0, 3], sizes = [2, 32], strides = [1, 1]} : vector<2x36xf32> to vector<2x32xf32>
    %800 = vector.broadcast %798 : f32 to vector<2x32xf32>
    %801 = arith.mulf %800, %799 : vector<2x32xf32>
    %802 = arith.addf %797, %801 : vector<2x32xf32>
    %c145 = arith.constant 145 : index
    %803 = memref.load %arg2[%c145] : memref<219xf32, #tpu.memory_space<smem>>
    %804 = vector.extract_strided_slice %782 {offsets = [0, 4], sizes = [2, 32], strides = [1, 1]} : vector<2x36xf32> to vector<2x32xf32>
    %805 = vector.broadcast %803 : f32 to vector<2x32xf32>
    %806 = arith.mulf %805, %804 : vector<2x32xf32>
    %807 = arith.addf %802, %806 : vector<2x32xf32>
    %c187 = arith.constant 187 : index
    %808 = memref.load %arg2[%c187] : memref<219xf32, #tpu.memory_space<smem>>
    %809 = vector.broadcast %808 : f32 to vector<2x32xf32>
    %810 = arith.addf %807, %809 : vector<2x32xf32>
    %cst_30 = arith.constant 0.000000e+00 : f32
    %811 = vector.broadcast %cst_30 : f32 to vector<2x32xf32>
    %812 = arith.maximumf %810, %811 : vector<2x32xf32>
    %c191 = arith.constant 191 : index
    %813 = memref.load %arg2[%c191] : memref<219xf32, #tpu.memory_space<smem>>
    %814 = vector.broadcast %813 : f32 to vector<2x32xf32>
    %815 = arith.mulf %812, %814 : vector<2x32xf32>
    %c195 = arith.constant 195 : index
    %816 = memref.load %arg2[%c195] : memref<219xf32, #tpu.memory_space<smem>>
    %817 = vector.broadcast %816 : f32 to vector<2x32xf32>
    %818 = arith.addf %815, %817 : vector<2x32xf32>
    %cst_31 = arith.constant 0.000000e+00 : f32
    %819 = vector.broadcast %cst_31 : f32 to vector<2x32xf32>
    %820 = vector.extract_strided_slice %2 {offsets = [0, 0, 0], sizes = [2, 1, 36], strides = [1, 1, 1]} : vector<2x4x36xf32> to vector<2x1x36xf32>
    %821 = vector.shape_cast %820 : vector<2x1x36xf32> to vector<2x36xf32>
    %c146 = arith.constant 146 : index
    %822 = memref.load %arg2[%c146] : memref<219xf32, #tpu.memory_space<smem>>
    %823 = vector.extract_strided_slice %821 {offsets = [0, 0], sizes = [2, 32], strides = [1, 1]} : vector<2x36xf32> to vector<2x32xf32>
    %824 = vector.broadcast %822 : f32 to vector<2x32xf32>
    %825 = arith.mulf %824, %823 : vector<2x32xf32>
    %826 = arith.addf %819, %825 : vector<2x32xf32>
    %c147 = arith.constant 147 : index
    %827 = memref.load %arg2[%c147] : memref<219xf32, #tpu.memory_space<smem>>
    %828 = vector.extract_strided_slice %821 {offsets = [0, 1], sizes = [2, 32], strides = [1, 1]} : vector<2x36xf32> to vector<2x32xf32>
    %829 = vector.broadcast %827 : f32 to vector<2x32xf32>
    %830 = arith.mulf %829, %828 : vector<2x32xf32>
    %831 = arith.addf %826, %830 : vector<2x32xf32>
    %c148 = arith.constant 148 : index
    %832 = memref.load %arg2[%c148] : memref<219xf32, #tpu.memory_space<smem>>
    %833 = vector.extract_strided_slice %821 {offsets = [0, 2], sizes = [2, 32], strides = [1, 1]} : vector<2x36xf32> to vector<2x32xf32>
    %834 = vector.broadcast %832 : f32 to vector<2x32xf32>
    %835 = arith.mulf %834, %833 : vector<2x32xf32>
    %836 = arith.addf %831, %835 : vector<2x32xf32>
    %c149 = arith.constant 149 : index
    %837 = memref.load %arg2[%c149] : memref<219xf32, #tpu.memory_space<smem>>
    %838 = vector.extract_strided_slice %821 {offsets = [0, 3], sizes = [2, 32], strides = [1, 1]} : vector<2x36xf32> to vector<2x32xf32>
    %839 = vector.broadcast %837 : f32 to vector<2x32xf32>
    %840 = arith.mulf %839, %838 : vector<2x32xf32>
    %841 = arith.addf %836, %840 : vector<2x32xf32>
    %c150 = arith.constant 150 : index
    %842 = memref.load %arg2[%c150] : memref<219xf32, #tpu.memory_space<smem>>
    %843 = vector.extract_strided_slice %821 {offsets = [0, 4], sizes = [2, 32], strides = [1, 1]} : vector<2x36xf32> to vector<2x32xf32>
    %844 = vector.broadcast %842 : f32 to vector<2x32xf32>
    %845 = arith.mulf %844, %843 : vector<2x32xf32>
    %846 = arith.addf %841, %845 : vector<2x32xf32>
    %847 = vector.extract_strided_slice %2 {offsets = [0, 1, 0], sizes = [2, 1, 36], strides = [1, 1, 1]} : vector<2x4x36xf32> to vector<2x1x36xf32>
    %848 = vector.shape_cast %847 : vector<2x1x36xf32> to vector<2x36xf32>
    %c151 = arith.constant 151 : index
    %849 = memref.load %arg2[%c151] : memref<219xf32, #tpu.memory_space<smem>>
    %850 = vector.extract_strided_slice %848 {offsets = [0, 0], sizes = [2, 32], strides = [1, 1]} : vector<2x36xf32> to vector<2x32xf32>
    %851 = vector.broadcast %849 : f32 to vector<2x32xf32>
    %852 = arith.mulf %851, %850 : vector<2x32xf32>
    %853 = arith.addf %846, %852 : vector<2x32xf32>
    %c152 = arith.constant 152 : index
    %854 = memref.load %arg2[%c152] : memref<219xf32, #tpu.memory_space<smem>>
    %855 = vector.extract_strided_slice %848 {offsets = [0, 1], sizes = [2, 32], strides = [1, 1]} : vector<2x36xf32> to vector<2x32xf32>
    %856 = vector.broadcast %854 : f32 to vector<2x32xf32>
    %857 = arith.mulf %856, %855 : vector<2x32xf32>
    %858 = arith.addf %853, %857 : vector<2x32xf32>
    %c153 = arith.constant 153 : index
    %859 = memref.load %arg2[%c153] : memref<219xf32, #tpu.memory_space<smem>>
    %860 = vector.extract_strided_slice %848 {offsets = [0, 2], sizes = [2, 32], strides = [1, 1]} : vector<2x36xf32> to vector<2x32xf32>
    %861 = vector.broadcast %859 : f32 to vector<2x32xf32>
    %862 = arith.mulf %861, %860 : vector<2x32xf32>
    %863 = arith.addf %858, %862 : vector<2x32xf32>
    %c154 = arith.constant 154 : index
    %864 = memref.load %arg2[%c154] : memref<219xf32, #tpu.memory_space<smem>>
    %865 = vector.extract_strided_slice %848 {offsets = [0, 3], sizes = [2, 32], strides = [1, 1]} : vector<2x36xf32> to vector<2x32xf32>
    %866 = vector.broadcast %864 : f32 to vector<2x32xf32>
    %867 = arith.mulf %866, %865 : vector<2x32xf32>
    %868 = arith.addf %863, %867 : vector<2x32xf32>
    %c155 = arith.constant 155 : index
    %869 = memref.load %arg2[%c155] : memref<219xf32, #tpu.memory_space<smem>>
    %870 = vector.extract_strided_slice %848 {offsets = [0, 4], sizes = [2, 32], strides = [1, 1]} : vector<2x36xf32> to vector<2x32xf32>
    %871 = vector.broadcast %869 : f32 to vector<2x32xf32>
    %872 = arith.mulf %871, %870 : vector<2x32xf32>
    %873 = arith.addf %868, %872 : vector<2x32xf32>
    %874 = vector.extract_strided_slice %2 {offsets = [0, 2, 0], sizes = [2, 1, 36], strides = [1, 1, 1]} : vector<2x4x36xf32> to vector<2x1x36xf32>
    %875 = vector.shape_cast %874 : vector<2x1x36xf32> to vector<2x36xf32>
    %c156 = arith.constant 156 : index
    %876 = memref.load %arg2[%c156] : memref<219xf32, #tpu.memory_space<smem>>
    %877 = vector.extract_strided_slice %875 {offsets = [0, 0], sizes = [2, 32], strides = [1, 1]} : vector<2x36xf32> to vector<2x32xf32>
    %878 = vector.broadcast %876 : f32 to vector<2x32xf32>
    %879 = arith.mulf %878, %877 : vector<2x32xf32>
    %880 = arith.addf %873, %879 : vector<2x32xf32>
    %c157 = arith.constant 157 : index
    %881 = memref.load %arg2[%c157] : memref<219xf32, #tpu.memory_space<smem>>
    %882 = vector.extract_strided_slice %875 {offsets = [0, 1], sizes = [2, 32], strides = [1, 1]} : vector<2x36xf32> to vector<2x32xf32>
    %883 = vector.broadcast %881 : f32 to vector<2x32xf32>
    %884 = arith.mulf %883, %882 : vector<2x32xf32>
    %885 = arith.addf %880, %884 : vector<2x32xf32>
    %c158 = arith.constant 158 : index
    %886 = memref.load %arg2[%c158] : memref<219xf32, #tpu.memory_space<smem>>
    %887 = vector.extract_strided_slice %875 {offsets = [0, 2], sizes = [2, 32], strides = [1, 1]} : vector<2x36xf32> to vector<2x32xf32>
    %888 = vector.broadcast %886 : f32 to vector<2x32xf32>
    %889 = arith.mulf %888, %887 : vector<2x32xf32>
    %890 = arith.addf %885, %889 : vector<2x32xf32>
    %c159 = arith.constant 159 : index
    %891 = memref.load %arg2[%c159] : memref<219xf32, #tpu.memory_space<smem>>
    %892 = vector.extract_strided_slice %875 {offsets = [0, 3], sizes = [2, 32], strides = [1, 1]} : vector<2x36xf32> to vector<2x32xf32>
    %893 = vector.broadcast %891 : f32 to vector<2x32xf32>
    %894 = arith.mulf %893, %892 : vector<2x32xf32>
    %895 = arith.addf %890, %894 : vector<2x32xf32>
    %c160 = arith.constant 160 : index
    %896 = memref.load %arg2[%c160] : memref<219xf32, #tpu.memory_space<smem>>
    %897 = vector.extract_strided_slice %875 {offsets = [0, 4], sizes = [2, 32], strides = [1, 1]} : vector<2x36xf32> to vector<2x32xf32>
    %898 = vector.broadcast %896 : f32 to vector<2x32xf32>
    %899 = arith.mulf %898, %897 : vector<2x32xf32>
    %900 = arith.addf %895, %899 : vector<2x32xf32>
    %901 = vector.extract_strided_slice %2 {offsets = [0, 3, 0], sizes = [2, 1, 36], strides = [1, 1, 1]} : vector<2x4x36xf32> to vector<2x1x36xf32>
    %902 = vector.shape_cast %901 : vector<2x1x36xf32> to vector<2x36xf32>
    %c161 = arith.constant 161 : index
    %903 = memref.load %arg2[%c161] : memref<219xf32, #tpu.memory_space<smem>>
    %904 = vector.extract_strided_slice %902 {offsets = [0, 0], sizes = [2, 32], strides = [1, 1]} : vector<2x36xf32> to vector<2x32xf32>
    %905 = vector.broadcast %903 : f32 to vector<2x32xf32>
    %906 = arith.mulf %905, %904 : vector<2x32xf32>
    %907 = arith.addf %900, %906 : vector<2x32xf32>
    %c162 = arith.constant 162 : index
    %908 = memref.load %arg2[%c162] : memref<219xf32, #tpu.memory_space<smem>>
    %909 = vector.extract_strided_slice %902 {offsets = [0, 1], sizes = [2, 32], strides = [1, 1]} : vector<2x36xf32> to vector<2x32xf32>
    %910 = vector.broadcast %908 : f32 to vector<2x32xf32>
    %911 = arith.mulf %910, %909 : vector<2x32xf32>
    %912 = arith.addf %907, %911 : vector<2x32xf32>
    %c163 = arith.constant 163 : index
    %913 = memref.load %arg2[%c163] : memref<219xf32, #tpu.memory_space<smem>>
    %914 = vector.extract_strided_slice %902 {offsets = [0, 2], sizes = [2, 32], strides = [1, 1]} : vector<2x36xf32> to vector<2x32xf32>
    %915 = vector.broadcast %913 : f32 to vector<2x32xf32>
    %916 = arith.mulf %915, %914 : vector<2x32xf32>
    %917 = arith.addf %912, %916 : vector<2x32xf32>
    %c164 = arith.constant 164 : index
    %918 = memref.load %arg2[%c164] : memref<219xf32, #tpu.memory_space<smem>>
    %919 = vector.extract_strided_slice %902 {offsets = [0, 3], sizes = [2, 32], strides = [1, 1]} : vector<2x36xf32> to vector<2x32xf32>
    %920 = vector.broadcast %918 : f32 to vector<2x32xf32>
    %921 = arith.mulf %920, %919 : vector<2x32xf32>
    %922 = arith.addf %917, %921 : vector<2x32xf32>
    %c165 = arith.constant 165 : index
    %923 = memref.load %arg2[%c165] : memref<219xf32, #tpu.memory_space<smem>>
    %924 = vector.extract_strided_slice %902 {offsets = [0, 4], sizes = [2, 32], strides = [1, 1]} : vector<2x36xf32> to vector<2x32xf32>
    %925 = vector.broadcast %923 : f32 to vector<2x32xf32>
    %926 = arith.mulf %925, %924 : vector<2x32xf32>
    %927 = arith.addf %922, %926 : vector<2x32xf32>
    %c188 = arith.constant 188 : index
    %928 = memref.load %arg2[%c188] : memref<219xf32, #tpu.memory_space<smem>>
    %929 = vector.broadcast %928 : f32 to vector<2x32xf32>
    %930 = arith.addf %927, %929 : vector<2x32xf32>
    %cst_32 = arith.constant 0.000000e+00 : f32
    %931 = vector.broadcast %cst_32 : f32 to vector<2x32xf32>
    %932 = arith.maximumf %930, %931 : vector<2x32xf32>
    %c192 = arith.constant 192 : index
    %933 = memref.load %arg2[%c192] : memref<219xf32, #tpu.memory_space<smem>>
    %934 = vector.broadcast %933 : f32 to vector<2x32xf32>
    %935 = arith.mulf %932, %934 : vector<2x32xf32>
    %c196 = arith.constant 196 : index
    %936 = memref.load %arg2[%c196] : memref<219xf32, #tpu.memory_space<smem>>
    %937 = vector.broadcast %936 : f32 to vector<2x32xf32>
    %938 = arith.addf %935, %937 : vector<2x32xf32>
    %cst_33 = arith.constant 0.000000e+00 : f32
    %939 = vector.broadcast %cst_33 : f32 to vector<2x32xf32>
    %940 = vector.extract_strided_slice %2 {offsets = [0, 0, 0], sizes = [2, 1, 36], strides = [1, 1, 1]} : vector<2x4x36xf32> to vector<2x1x36xf32>
    %941 = vector.shape_cast %940 : vector<2x1x36xf32> to vector<2x36xf32>
    %c166 = arith.constant 166 : index
    %942 = memref.load %arg2[%c166] : memref<219xf32, #tpu.memory_space<smem>>
    %943 = vector.extract_strided_slice %941 {offsets = [0, 0], sizes = [2, 32], strides = [1, 1]} : vector<2x36xf32> to vector<2x32xf32>
    %944 = vector.broadcast %942 : f32 to vector<2x32xf32>
    %945 = arith.mulf %944, %943 : vector<2x32xf32>
    %946 = arith.addf %939, %945 : vector<2x32xf32>
    %c167 = arith.constant 167 : index
    %947 = memref.load %arg2[%c167] : memref<219xf32, #tpu.memory_space<smem>>
    %948 = vector.extract_strided_slice %941 {offsets = [0, 1], sizes = [2, 32], strides = [1, 1]} : vector<2x36xf32> to vector<2x32xf32>
    %949 = vector.broadcast %947 : f32 to vector<2x32xf32>
    %950 = arith.mulf %949, %948 : vector<2x32xf32>
    %951 = arith.addf %946, %950 : vector<2x32xf32>
    %c168 = arith.constant 168 : index
    %952 = memref.load %arg2[%c168] : memref<219xf32, #tpu.memory_space<smem>>
    %953 = vector.extract_strided_slice %941 {offsets = [0, 2], sizes = [2, 32], strides = [1, 1]} : vector<2x36xf32> to vector<2x32xf32>
    %954 = vector.broadcast %952 : f32 to vector<2x32xf32>
    %955 = arith.mulf %954, %953 : vector<2x32xf32>
    %956 = arith.addf %951, %955 : vector<2x32xf32>
    %c169 = arith.constant 169 : index
    %957 = memref.load %arg2[%c169] : memref<219xf32, #tpu.memory_space<smem>>
    %958 = vector.extract_strided_slice %941 {offsets = [0, 3], sizes = [2, 32], strides = [1, 1]} : vector<2x36xf32> to vector<2x32xf32>
    %959 = vector.broadcast %957 : f32 to vector<2x32xf32>
    %960 = arith.mulf %959, %958 : vector<2x32xf32>
    %961 = arith.addf %956, %960 : vector<2x32xf32>
    %c170 = arith.constant 170 : index
    %962 = memref.load %arg2[%c170] : memref<219xf32, #tpu.memory_space<smem>>
    %963 = vector.extract_strided_slice %941 {offsets = [0, 4], sizes = [2, 32], strides = [1, 1]} : vector<2x36xf32> to vector<2x32xf32>
    %964 = vector.broadcast %962 : f32 to vector<2x32xf32>
    %965 = arith.mulf %964, %963 : vector<2x32xf32>
    %966 = arith.addf %961, %965 : vector<2x32xf32>
    %967 = vector.extract_strided_slice %2 {offsets = [0, 1, 0], sizes = [2, 1, 36], strides = [1, 1, 1]} : vector<2x4x36xf32> to vector<2x1x36xf32>
    %968 = vector.shape_cast %967 : vector<2x1x36xf32> to vector<2x36xf32>
    %c171 = arith.constant 171 : index
    %969 = memref.load %arg2[%c171] : memref<219xf32, #tpu.memory_space<smem>>
    %970 = vector.extract_strided_slice %968 {offsets = [0, 0], sizes = [2, 32], strides = [1, 1]} : vector<2x36xf32> to vector<2x32xf32>
    %971 = vector.broadcast %969 : f32 to vector<2x32xf32>
    %972 = arith.mulf %971, %970 : vector<2x32xf32>
    %973 = arith.addf %966, %972 : vector<2x32xf32>
    %c172 = arith.constant 172 : index
    %974 = memref.load %arg2[%c172] : memref<219xf32, #tpu.memory_space<smem>>
    %975 = vector.extract_strided_slice %968 {offsets = [0, 1], sizes = [2, 32], strides = [1, 1]} : vector<2x36xf32> to vector<2x32xf32>
    %976 = vector.broadcast %974 : f32 to vector<2x32xf32>
    %977 = arith.mulf %976, %975 : vector<2x32xf32>
    %978 = arith.addf %973, %977 : vector<2x32xf32>
    %c173 = arith.constant 173 : index
    %979 = memref.load %arg2[%c173] : memref<219xf32, #tpu.memory_space<smem>>
    %980 = vector.extract_strided_slice %968 {offsets = [0, 2], sizes = [2, 32], strides = [1, 1]} : vector<2x36xf32> to vector<2x32xf32>
    %981 = vector.broadcast %979 : f32 to vector<2x32xf32>
    %982 = arith.mulf %981, %980 : vector<2x32xf32>
    %983 = arith.addf %978, %982 : vector<2x32xf32>
    %c174 = arith.constant 174 : index
    %984 = memref.load %arg2[%c174] : memref<219xf32, #tpu.memory_space<smem>>
    %985 = vector.extract_strided_slice %968 {offsets = [0, 3], sizes = [2, 32], strides = [1, 1]} : vector<2x36xf32> to vector<2x32xf32>
    %986 = vector.broadcast %984 : f32 to vector<2x32xf32>
    %987 = arith.mulf %986, %985 : vector<2x32xf32>
    %988 = arith.addf %983, %987 : vector<2x32xf32>
    %c175 = arith.constant 175 : index
    %989 = memref.load %arg2[%c175] : memref<219xf32, #tpu.memory_space<smem>>
    %990 = vector.extract_strided_slice %968 {offsets = [0, 4], sizes = [2, 32], strides = [1, 1]} : vector<2x36xf32> to vector<2x32xf32>
    %991 = vector.broadcast %989 : f32 to vector<2x32xf32>
    %992 = arith.mulf %991, %990 : vector<2x32xf32>
    %993 = arith.addf %988, %992 : vector<2x32xf32>
    %994 = vector.extract_strided_slice %2 {offsets = [0, 2, 0], sizes = [2, 1, 36], strides = [1, 1, 1]} : vector<2x4x36xf32> to vector<2x1x36xf32>
    %995 = vector.shape_cast %994 : vector<2x1x36xf32> to vector<2x36xf32>
    %c176 = arith.constant 176 : index
    %996 = memref.load %arg2[%c176] : memref<219xf32, #tpu.memory_space<smem>>
    %997 = vector.extract_strided_slice %995 {offsets = [0, 0], sizes = [2, 32], strides = [1, 1]} : vector<2x36xf32> to vector<2x32xf32>
    %998 = vector.broadcast %996 : f32 to vector<2x32xf32>
    %999 = arith.mulf %998, %997 : vector<2x32xf32>
    %1000 = arith.addf %993, %999 : vector<2x32xf32>
    %c177 = arith.constant 177 : index
    %1001 = memref.load %arg2[%c177] : memref<219xf32, #tpu.memory_space<smem>>
    %1002 = vector.extract_strided_slice %995 {offsets = [0, 1], sizes = [2, 32], strides = [1, 1]} : vector<2x36xf32> to vector<2x32xf32>
    %1003 = vector.broadcast %1001 : f32 to vector<2x32xf32>
    %1004 = arith.mulf %1003, %1002 : vector<2x32xf32>
    %1005 = arith.addf %1000, %1004 : vector<2x32xf32>
    %c178 = arith.constant 178 : index
    %1006 = memref.load %arg2[%c178] : memref<219xf32, #tpu.memory_space<smem>>
    %1007 = vector.extract_strided_slice %995 {offsets = [0, 2], sizes = [2, 32], strides = [1, 1]} : vector<2x36xf32> to vector<2x32xf32>
    %1008 = vector.broadcast %1006 : f32 to vector<2x32xf32>
    %1009 = arith.mulf %1008, %1007 : vector<2x32xf32>
    %1010 = arith.addf %1005, %1009 : vector<2x32xf32>
    %c179 = arith.constant 179 : index
    %1011 = memref.load %arg2[%c179] : memref<219xf32, #tpu.memory_space<smem>>
    %1012 = vector.extract_strided_slice %995 {offsets = [0, 3], sizes = [2, 32], strides = [1, 1]} : vector<2x36xf32> to vector<2x32xf32>
    %1013 = vector.broadcast %1011 : f32 to vector<2x32xf32>
    %1014 = arith.mulf %1013, %1012 : vector<2x32xf32>
    %1015 = arith.addf %1010, %1014 : vector<2x32xf32>
    %c180 = arith.constant 180 : index
    %1016 = memref.load %arg2[%c180] : memref<219xf32, #tpu.memory_space<smem>>
    %1017 = vector.extract_strided_slice %995 {offsets = [0, 4], sizes = [2, 32], strides = [1, 1]} : vector<2x36xf32> to vector<2x32xf32>
    %1018 = vector.broadcast %1016 : f32 to vector<2x32xf32>
    %1019 = arith.mulf %1018, %1017 : vector<2x32xf32>
    %1020 = arith.addf %1015, %1019 : vector<2x32xf32>
    %1021 = vector.extract_strided_slice %2 {offsets = [0, 3, 0], sizes = [2, 1, 36], strides = [1, 1, 1]} : vector<2x4x36xf32> to vector<2x1x36xf32>
    %1022 = vector.shape_cast %1021 : vector<2x1x36xf32> to vector<2x36xf32>
    %c181 = arith.constant 181 : index
    %1023 = memref.load %arg2[%c181] : memref<219xf32, #tpu.memory_space<smem>>
    %1024 = vector.extract_strided_slice %1022 {offsets = [0, 0], sizes = [2, 32], strides = [1, 1]} : vector<2x36xf32> to vector<2x32xf32>
    %1025 = vector.broadcast %1023 : f32 to vector<2x32xf32>
    %1026 = arith.mulf %1025, %1024 : vector<2x32xf32>
    %1027 = arith.addf %1020, %1026 : vector<2x32xf32>
    %c182 = arith.constant 182 : index
    %1028 = memref.load %arg2[%c182] : memref<219xf32, #tpu.memory_space<smem>>
    %1029 = vector.extract_strided_slice %1022 {offsets = [0, 1], sizes = [2, 32], strides = [1, 1]} : vector<2x36xf32> to vector<2x32xf32>
    %1030 = vector.broadcast %1028 : f32 to vector<2x32xf32>
    %1031 = arith.mulf %1030, %1029 : vector<2x32xf32>
    %1032 = arith.addf %1027, %1031 : vector<2x32xf32>
    %c183 = arith.constant 183 : index
    %1033 = memref.load %arg2[%c183] : memref<219xf32, #tpu.memory_space<smem>>
    %1034 = vector.extract_strided_slice %1022 {offsets = [0, 2], sizes = [2, 32], strides = [1, 1]} : vector<2x36xf32> to vector<2x32xf32>
    %1035 = vector.broadcast %1033 : f32 to vector<2x32xf32>
    %1036 = arith.mulf %1035, %1034 : vector<2x32xf32>
    %1037 = arith.addf %1032, %1036 : vector<2x32xf32>
    %c184 = arith.constant 184 : index
    %1038 = memref.load %arg2[%c184] : memref<219xf32, #tpu.memory_space<smem>>
    %1039 = vector.extract_strided_slice %1022 {offsets = [0, 3], sizes = [2, 32], strides = [1, 1]} : vector<2x36xf32> to vector<2x32xf32>
    %1040 = vector.broadcast %1038 : f32 to vector<2x32xf32>
    %1041 = arith.mulf %1040, %1039 : vector<2x32xf32>
    %1042 = arith.addf %1037, %1041 : vector<2x32xf32>
    %c185 = arith.constant 185 : index
    %1043 = memref.load %arg2[%c185] : memref<219xf32, #tpu.memory_space<smem>>
    %1044 = vector.extract_strided_slice %1022 {offsets = [0, 4], sizes = [2, 32], strides = [1, 1]} : vector<2x36xf32> to vector<2x32xf32>
    %1045 = vector.broadcast %1043 : f32 to vector<2x32xf32>
    %1046 = arith.mulf %1045, %1044 : vector<2x32xf32>
    %1047 = arith.addf %1042, %1046 : vector<2x32xf32>
    %c189 = arith.constant 189 : index
    %1048 = memref.load %arg2[%c189] : memref<219xf32, #tpu.memory_space<smem>>
    %1049 = vector.broadcast %1048 : f32 to vector<2x32xf32>
    %1050 = arith.addf %1047, %1049 : vector<2x32xf32>
    %cst_34 = arith.constant 0.000000e+00 : f32
    %1051 = vector.broadcast %cst_34 : f32 to vector<2x32xf32>
    %1052 = arith.maximumf %1050, %1051 : vector<2x32xf32>
    %c193 = arith.constant 193 : index
    %1053 = memref.load %arg2[%c193] : memref<219xf32, #tpu.memory_space<smem>>
    %1054 = vector.broadcast %1053 : f32 to vector<2x32xf32>
    %1055 = arith.mulf %1052, %1054 : vector<2x32xf32>
    %c197 = arith.constant 197 : index
    %1056 = memref.load %arg2[%c197] : memref<219xf32, #tpu.memory_space<smem>>
    %1057 = vector.broadcast %1056 : f32 to vector<2x32xf32>
    %1058 = arith.addf %1055, %1057 : vector<2x32xf32>
    %cst_35 = arith.constant 0.000000e+00 : f32
    %1059 = vector.broadcast %cst_35 : f32 to vector<2x32xf32>
    %cst_36 = arith.constant 0.000000e+00 : f32
    %1060 = vector.broadcast %cst_36 : f32 to vector<2x2xf32>
    %1061 = tpu.concatenate %1060, %698, %1060 in 1 : vector<2x2xf32>, vector<2x32xf32>, vector<2x2xf32> -> vector<2x36xf32>
    %c198 = arith.constant 198 : index
    %1062 = memref.load %arg2[%c198] : memref<219xf32, #tpu.memory_space<smem>>
    %1063 = vector.extract_strided_slice %1061 {offsets = [0, 0], sizes = [2, 32], strides = [1, 1]} : vector<2x36xf32> to vector<2x32xf32>
    %1064 = vector.broadcast %1062 : f32 to vector<2x32xf32>
    %1065 = arith.mulf %1064, %1063 : vector<2x32xf32>
    %1066 = arith.addf %1059, %1065 : vector<2x32xf32>
    %c199 = arith.constant 199 : index
    %1067 = memref.load %arg2[%c199] : memref<219xf32, #tpu.memory_space<smem>>
    %1068 = vector.extract_strided_slice %1061 {offsets = [0, 1], sizes = [2, 32], strides = [1, 1]} : vector<2x36xf32> to vector<2x32xf32>
    %1069 = vector.broadcast %1067 : f32 to vector<2x32xf32>
    %1070 = arith.mulf %1069, %1068 : vector<2x32xf32>
    %1071 = arith.addf %1066, %1070 : vector<2x32xf32>
    %c200 = arith.constant 200 : index
    %1072 = memref.load %arg2[%c200] : memref<219xf32, #tpu.memory_space<smem>>
    %1073 = vector.extract_strided_slice %1061 {offsets = [0, 2], sizes = [2, 32], strides = [1, 1]} : vector<2x36xf32> to vector<2x32xf32>
    %1074 = vector.broadcast %1072 : f32 to vector<2x32xf32>
    %1075 = arith.mulf %1074, %1073 : vector<2x32xf32>
    %1076 = arith.addf %1071, %1075 : vector<2x32xf32>
    %c201 = arith.constant 201 : index
    %1077 = memref.load %arg2[%c201] : memref<219xf32, #tpu.memory_space<smem>>
    %1078 = vector.extract_strided_slice %1061 {offsets = [0, 3], sizes = [2, 32], strides = [1, 1]} : vector<2x36xf32> to vector<2x32xf32>
    %1079 = vector.broadcast %1077 : f32 to vector<2x32xf32>
    %1080 = arith.mulf %1079, %1078 : vector<2x32xf32>
    %1081 = arith.addf %1076, %1080 : vector<2x32xf32>
    %c202 = arith.constant 202 : index
    %1082 = memref.load %arg2[%c202] : memref<219xf32, #tpu.memory_space<smem>>
    %1083 = vector.extract_strided_slice %1061 {offsets = [0, 4], sizes = [2, 32], strides = [1, 1]} : vector<2x36xf32> to vector<2x32xf32>
    %1084 = vector.broadcast %1082 : f32 to vector<2x32xf32>
    %1085 = arith.mulf %1084, %1083 : vector<2x32xf32>
    %1086 = arith.addf %1081, %1085 : vector<2x32xf32>
    %cst_37 = arith.constant 0.000000e+00 : f32
    %1087 = vector.broadcast %cst_37 : f32 to vector<2x2xf32>
    %1088 = tpu.concatenate %1087, %818, %1087 in 1 : vector<2x2xf32>, vector<2x32xf32>, vector<2x2xf32> -> vector<2x36xf32>
    %c203 = arith.constant 203 : index
    %1089 = memref.load %arg2[%c203] : memref<219xf32, #tpu.memory_space<smem>>
    %1090 = vector.extract_strided_slice %1088 {offsets = [0, 0], sizes = [2, 32], strides = [1, 1]} : vector<2x36xf32> to vector<2x32xf32>
    %1091 = vector.broadcast %1089 : f32 to vector<2x32xf32>
    %1092 = arith.mulf %1091, %1090 : vector<2x32xf32>
    %1093 = arith.addf %1086, %1092 : vector<2x32xf32>
    %c204 = arith.constant 204 : index
    %1094 = memref.load %arg2[%c204] : memref<219xf32, #tpu.memory_space<smem>>
    %1095 = vector.extract_strided_slice %1088 {offsets = [0, 1], sizes = [2, 32], strides = [1, 1]} : vector<2x36xf32> to vector<2x32xf32>
    %1096 = vector.broadcast %1094 : f32 to vector<2x32xf32>
    %1097 = arith.mulf %1096, %1095 : vector<2x32xf32>
    %1098 = arith.addf %1093, %1097 : vector<2x32xf32>
    %c205 = arith.constant 205 : index
    %1099 = memref.load %arg2[%c205] : memref<219xf32, #tpu.memory_space<smem>>
    %1100 = vector.extract_strided_slice %1088 {offsets = [0, 2], sizes = [2, 32], strides = [1, 1]} : vector<2x36xf32> to vector<2x32xf32>
    %1101 = vector.broadcast %1099 : f32 to vector<2x32xf32>
    %1102 = arith.mulf %1101, %1100 : vector<2x32xf32>
    %1103 = arith.addf %1098, %1102 : vector<2x32xf32>
    %c206 = arith.constant 206 : index
    %1104 = memref.load %arg2[%c206] : memref<219xf32, #tpu.memory_space<smem>>
    %1105 = vector.extract_strided_slice %1088 {offsets = [0, 3], sizes = [2, 32], strides = [1, 1]} : vector<2x36xf32> to vector<2x32xf32>
    %1106 = vector.broadcast %1104 : f32 to vector<2x32xf32>
    %1107 = arith.mulf %1106, %1105 : vector<2x32xf32>
    %1108 = arith.addf %1103, %1107 : vector<2x32xf32>
    %c207 = arith.constant 207 : index
    %1109 = memref.load %arg2[%c207] : memref<219xf32, #tpu.memory_space<smem>>
    %1110 = vector.extract_strided_slice %1088 {offsets = [0, 4], sizes = [2, 32], strides = [1, 1]} : vector<2x36xf32> to vector<2x32xf32>
    %1111 = vector.broadcast %1109 : f32 to vector<2x32xf32>
    %1112 = arith.mulf %1111, %1110 : vector<2x32xf32>
    %1113 = arith.addf %1108, %1112 : vector<2x32xf32>
    %cst_38 = arith.constant 0.000000e+00 : f32
    %1114 = vector.broadcast %cst_38 : f32 to vector<2x2xf32>
    %1115 = tpu.concatenate %1114, %938, %1114 in 1 : vector<2x2xf32>, vector<2x32xf32>, vector<2x2xf32> -> vector<2x36xf32>
    %c208 = arith.constant 208 : index
    %1116 = memref.load %arg2[%c208] : memref<219xf32, #tpu.memory_space<smem>>
    %1117 = vector.extract_strided_slice %1115 {offsets = [0, 0], sizes = [2, 32], strides = [1, 1]} : vector<2x36xf32> to vector<2x32xf32>
    %1118 = vector.broadcast %1116 : f32 to vector<2x32xf32>
    %1119 = arith.mulf %1118, %1117 : vector<2x32xf32>
    %1120 = arith.addf %1113, %1119 : vector<2x32xf32>
    %c209 = arith.constant 209 : index
    %1121 = memref.load %arg2[%c209] : memref<219xf32, #tpu.memory_space<smem>>
    %1122 = vector.extract_strided_slice %1115 {offsets = [0, 1], sizes = [2, 32], strides = [1, 1]} : vector<2x36xf32> to vector<2x32xf32>
    %1123 = vector.broadcast %1121 : f32 to vector<2x32xf32>
    %1124 = arith.mulf %1123, %1122 : vector<2x32xf32>
    %1125 = arith.addf %1120, %1124 : vector<2x32xf32>
    %c210 = arith.constant 210 : index
    %1126 = memref.load %arg2[%c210] : memref<219xf32, #tpu.memory_space<smem>>
    %1127 = vector.extract_strided_slice %1115 {offsets = [0, 2], sizes = [2, 32], strides = [1, 1]} : vector<2x36xf32> to vector<2x32xf32>
    %1128 = vector.broadcast %1126 : f32 to vector<2x32xf32>
    %1129 = arith.mulf %1128, %1127 : vector<2x32xf32>
    %1130 = arith.addf %1125, %1129 : vector<2x32xf32>
    %c211 = arith.constant 211 : index
    %1131 = memref.load %arg2[%c211] : memref<219xf32, #tpu.memory_space<smem>>
    %1132 = vector.extract_strided_slice %1115 {offsets = [0, 3], sizes = [2, 32], strides = [1, 1]} : vector<2x36xf32> to vector<2x32xf32>
    %1133 = vector.broadcast %1131 : f32 to vector<2x32xf32>
    %1134 = arith.mulf %1133, %1132 : vector<2x32xf32>
    %1135 = arith.addf %1130, %1134 : vector<2x32xf32>
    %c212 = arith.constant 212 : index
    %1136 = memref.load %arg2[%c212] : memref<219xf32, #tpu.memory_space<smem>>
    %1137 = vector.extract_strided_slice %1115 {offsets = [0, 4], sizes = [2, 32], strides = [1, 1]} : vector<2x36xf32> to vector<2x32xf32>
    %1138 = vector.broadcast %1136 : f32 to vector<2x32xf32>
    %1139 = arith.mulf %1138, %1137 : vector<2x32xf32>
    %1140 = arith.addf %1135, %1139 : vector<2x32xf32>
    %cst_39 = arith.constant 0.000000e+00 : f32
    %1141 = vector.broadcast %cst_39 : f32 to vector<2x2xf32>
    %1142 = tpu.concatenate %1141, %1058, %1141 in 1 : vector<2x2xf32>, vector<2x32xf32>, vector<2x2xf32> -> vector<2x36xf32>
    %c213 = arith.constant 213 : index
    %1143 = memref.load %arg2[%c213] : memref<219xf32, #tpu.memory_space<smem>>
    %1144 = vector.extract_strided_slice %1142 {offsets = [0, 0], sizes = [2, 32], strides = [1, 1]} : vector<2x36xf32> to vector<2x32xf32>
    %1145 = vector.broadcast %1143 : f32 to vector<2x32xf32>
    %1146 = arith.mulf %1145, %1144 : vector<2x32xf32>
    %1147 = arith.addf %1140, %1146 : vector<2x32xf32>
    %c214 = arith.constant 214 : index
    %1148 = memref.load %arg2[%c214] : memref<219xf32, #tpu.memory_space<smem>>
    %1149 = vector.extract_strided_slice %1142 {offsets = [0, 1], sizes = [2, 32], strides = [1, 1]} : vector<2x36xf32> to vector<2x32xf32>
    %1150 = vector.broadcast %1148 : f32 to vector<2x32xf32>
    %1151 = arith.mulf %1150, %1149 : vector<2x32xf32>
    %1152 = arith.addf %1147, %1151 : vector<2x32xf32>
    %c215 = arith.constant 215 : index
    %1153 = memref.load %arg2[%c215] : memref<219xf32, #tpu.memory_space<smem>>
    %1154 = vector.extract_strided_slice %1142 {offsets = [0, 2], sizes = [2, 32], strides = [1, 1]} : vector<2x36xf32> to vector<2x32xf32>
    %1155 = vector.broadcast %1153 : f32 to vector<2x32xf32>
    %1156 = arith.mulf %1155, %1154 : vector<2x32xf32>
    %1157 = arith.addf %1152, %1156 : vector<2x32xf32>
    %c216 = arith.constant 216 : index
    %1158 = memref.load %arg2[%c216] : memref<219xf32, #tpu.memory_space<smem>>
    %1159 = vector.extract_strided_slice %1142 {offsets = [0, 3], sizes = [2, 32], strides = [1, 1]} : vector<2x36xf32> to vector<2x32xf32>
    %1160 = vector.broadcast %1158 : f32 to vector<2x32xf32>
    %1161 = arith.mulf %1160, %1159 : vector<2x32xf32>
    %1162 = arith.addf %1157, %1161 : vector<2x32xf32>
    %c217 = arith.constant 217 : index
    %1163 = memref.load %arg2[%c217] : memref<219xf32, #tpu.memory_space<smem>>
    %1164 = vector.extract_strided_slice %1142 {offsets = [0, 4], sizes = [2, 32], strides = [1, 1]} : vector<2x36xf32> to vector<2x32xf32>
    %1165 = vector.broadcast %1163 : f32 to vector<2x32xf32>
    %1166 = arith.mulf %1165, %1164 : vector<2x32xf32>
    %1167 = arith.addf %1162, %1166 : vector<2x32xf32>
    %c218 = arith.constant 218 : index
    %1168 = memref.load %arg2[%c218] : memref<219xf32, #tpu.memory_space<smem>>
    %1169 = vector.broadcast %1168 : f32 to vector<2x32xf32>
    %1170 = arith.addf %1167, %1169 : vector<2x32xf32>
    %cst_40 = arith.constant 0.000000e+00 : f32
    %1171 = vector.broadcast %cst_40 : f32 to vector<2x32xf32>
    %1172 = arith.maximumf %1170, %1171 : vector<2x32xf32>
    %1173 = tpu.concatenate %184, %578, %1172 in 1 : vector<2x32xf32>, vector<2x32xf32>, vector<2x32xf32> -> vector<2x96xf32>
    %c0_41 = arith.constant 0 : index
    %c0_42 = arith.constant 0 : index
    %1174 = vector.load %arg3[%c0_41, %c0_42] : memref<132x32xf32, #tpu.memory_space<vmem>>, vector<96x32xf32>
    %c96_43 = arith.constant 96 : index
    %c0_44 = arith.constant 0 : index
    %1175 = vector.load %arg3[%c96_43, %c0_44] : memref<132x32xf32, #tpu.memory_space<vmem>>, vector<32x32xf32>
    %c128_45 = arith.constant 128 : index
    %c0_46 = arith.constant 0 : index
    %1176 = vector.load %arg3[%c128_45, %c0_46] : memref<132x32xf32, #tpu.memory_space<vmem>>, vector<1x32xf32>
    %c129_47 = arith.constant 129 : index
    %c0_48 = arith.constant 0 : index
    %1177 = vector.load %arg3[%c129_47, %c0_48] : memref<132x32xf32, #tpu.memory_space<vmem>>, vector<1x32xf32>
    %c130_49 = arith.constant 130 : index
    %c0_50 = arith.constant 0 : index
    %1178 = vector.load %arg3[%c130_49, %c0_50] : memref<132x32xf32, #tpu.memory_space<vmem>>, vector<1x32xf32>
    %c131_51 = arith.constant 131 : index
    %c0_52 = arith.constant 0 : index
    %1179 = vector.load %arg3[%c131_51, %c0_52] : memref<132x32xf32, #tpu.memory_space<vmem>>, vector<1x32xf32>
    %cst_53 = arith.constant dense<0.000000e+00> : vector<2x32xf32>
    %1180 = tpu.matmul %1173, %1174, %cst_53 {dimension_numbers = #tpu.dot_dimension_numbers<[1], [0], [0], [1], [0, 0, 1, 1], [], []>} : vector<2x96xf32>, vector<96x32xf32>, vector<2x32xf32> -> vector<2x32xf32>
    %1181 = vector.broadcast %1176 : vector<1x32xf32> to vector<2x32xf32>
    %1182 = arith.addf %1180, %1181 : vector<2x32xf32>
    %cst_54 = arith.constant 0.000000e+00 : f32
    %1183 = vector.broadcast %cst_54 : f32 to vector<2x32xf32>
    %1184 = arith.maximumf %1182, %1183 : vector<2x32xf32>
    %1185 = vector.broadcast %1177 : vector<1x32xf32> to vector<2x32xf32>
    %1186 = arith.mulf %1184, %1185 : vector<2x32xf32>
    %1187 = vector.broadcast %1178 : vector<1x32xf32> to vector<2x32xf32>
    %1188 = arith.addf %1186, %1187 : vector<2x32xf32>
    %cst_55 = arith.constant dense<0.000000e+00> : vector<2x32xf32>
    %1189 = tpu.matmul %1188, %1175, %cst_55 {dimension_numbers = #tpu.dot_dimension_numbers<[1], [0], [0], [1], [0, 0, 1, 1], [], []>} : vector<2x32xf32>, vector<32x32xf32>, vector<2x32xf32> -> vector<2x32xf32>
    %1190 = vector.broadcast %1179 : vector<1x32xf32> to vector<2x32xf32>
    %1191 = arith.addf %1189, %1190 : vector<2x32xf32>
    %cst_56 = arith.constant 0.000000e+00 : f32
    %1192 = vector.broadcast %cst_56 : f32 to vector<2x32xf32>
    %1193 = arith.maximumf %1191, %1192 : vector<2x32xf32>
    %c0_57 = arith.constant 0 : index
    %c0_58 = arith.constant 0 : index
    %1194 = vector.load %arg4[%c0_57, %c0_58] : memref<2x32xf32, #tpu.memory_space<vmem>>, vector<2x32xf32>
    tpu.vector_store %arg4[%c0_57, %c0_58], %1193 {strides = array<i32>} : memref<2x32xf32, #tpu.memory_space<vmem>>, vector<2x32xf32>,
    return
  }
  func.func @transform_0(%arg0: i32) -> (i32, i32, i32) {
    %c0_i32 = arith.constant 0 : i32
    %c0_i32_0 = arith.constant 0 : i32
    %c0_i32_1 = arith.constant 0 : i32
    return %arg0, %c0_i32, %c0_i32_0 : i32, i32, i32
  }
  func.func @transform_1(%arg0: i32) -> i32 {
    %c0_i32 = arith.constant 0 : i32
    %c0_i32_0 = arith.constant 0 : i32
    return %c0_i32 : i32
  }
  func.func @transform_2(%arg0: i32) -> (i32, i32) {
    %c0_i32 = arith.constant 0 : i32
    %c0_i32_0 = arith.constant 0 : i32
    %c0_i32_1 = arith.constant 0 : i32
    return %c0_i32, %c0_i32_0 : i32, i32
  }
  func.func @transform_3(%arg0: i32) -> (i32, i32) {
    %c0_i32 = arith.constant 0 : i32
    %c0_i32_0 = arith.constant 0 : i32
    return %arg0, %c0_i32 : i32, i32
  }
}

</mosaic_0001>

<bundles_post_ra>
// kernel: tpu_custom_call.1
= control target key start
LH: loop header
LB: loop body
LE: loop exit
PB: predicated region body
PF: predicated region fallthrough
CT: control target
= control target key end

     0   :  { %8 = vsyncpa [#allocation4], 0  ;;  %s5208_s0 = inlined_call_operand.vmem [shape: f32[2,4,32], index: 0, kind: input, shape index: {}]   ;;  %s5209_s1 = inlined_call_operand.vmem [shape: f32[219], index: 1, kind: input, shape index: {}]   ;;  %s5210_s2 = inlined_call_operand.vmem [shape: f32[132,32], index: 2, kind: input, shape index: {}]   ;;  %s5211_s3 = inlined_call_operand.hbm [shape: f32[2,32], index: 3, kind: output, shape index: {}]  }
   0x1   :  { %9 = vsyncpa [#allocation3], 0  ;;  %s18_s14 = sshll.u32 %s5209_s1, 4  ;;  %s19_s14 = int_to_ptr.vmem [resolvable:$true] %s18_s14 }
   0x2   :  { %s3072_s15 = scalar_lea.vmem %s19_s14, 32  ;;  %p3077_p1 = scmp.lt.s32.totalorder %s19_s14, %s19_s14 }
   0x3   :  { %p3073_p0 = scmp.ne.s32.totalorder %s19_s14, %s3072_s15  ;;  %p3078_p2 = scmp.lt.s32.totalorder %s3072_s15, %s3072_s15 }
   0x5   :  { %p3079_p3 = por %p3078_p2, %p3077_p1 }
   0x7   :  { %p3080_p4 = pnand %p3079_p3, %p3073_p0 }
   0x9   :  { %3083 = shalt.err (!%p3080_p4)
}
   0xa   :  { %s3110_s16 = smov [#allocation2]  }
   0xb   :  { %21 = dma.vmem_to_smem %s19_s14, 32, %s3110_s16, [#allocation4]  }
   0xc   :  { %3106 = dma.done.wait [#allocation4], 32  }
   0xd   :  { %3107 = vsyncadd [#allocation4], 4294967264 }
   0xe   :  { %27 = sfence }
   0xf   :  { %v29_v0 = vld [vmem:[%s5208_s0 + $0x4] sm:$0xf]  ;;  %s3111_s19 = smov 2   ;;  %v28_v1 = vld [vmem:[%s5208_s0] sm:$0xf]  ;;  %s2862_s21 = sld [smem:[#allocation2 + $0x6b]] }
  0x10   :  { %34 = vrot.lane.b32.xlu0 %v29_v0, %s3111_s19  ;;  %s2863_s22 = sld [smem:[#allocation2 + $0x6c]]  ;;  %s3153_s23 = sld [smem:[#allocation2 + $0x6d]]  ;;  %vm38_vm0 = vcmask 15360   ;;  %vm41_vm1 = vcmask 277504   ;;  %vm1021_vm2 = vcmask 1041409   ;;  %vm1024_vm3 = vcmask 7168  }
  0x11   :  { %s3155_s24 = sld [smem:[#allocation2 + $0x6e]]  ;;  %s5223_s0 = smov 127   ;;  %vm1026_vm4 = vcmask 269312   ;;  %vm3117_vm5 = vmmov 0   ;;  %vm2548_vm6 = vcmask 261120   ;;  %vm2550_vm7 = vcmask 523264  }
  0x12   :  { %s5225_s25 = smov 126   ;;  %s2885_s26 = sld [smem:[#allocation2 + $0x7f]]  ;;  %vm2576_vm8 = vcmask 785408   ;;  %vm2739_vm9 = vcmask 254976  }
  0x13   :  { %s5219_s27 = smov 125   ;;  %s2886_s28 = sld [smem:[#allocation2 + $0x80]] }
  0x14   :  { %32 = vrot.lane.b32.xlu0 %v28_v1, %s3111_s19  ;;  %s5221_s29 = smov 124   ;;  %s2887_s30 = sld [smem:[#allocation2 + $0x81]] }
  0x15   :  { %v1140_v3 = vstv %s2862_s21  ;;  %s3181_s4 = sld [smem:[#allocation2 + $0x93]]  ;;  %s3187_s5 = sld [smem:[#allocation2 + $0x94]] }
  0x16   :  { %v1154_v4 = vstv %s2863_s22  ;;  %v1168_v10 = vstv %s3153_s23  ;;  %s3194_s6 = sld [smem:[#allocation2 + $0x95]]  ;;  %s2888_s7 = sld [smem:[#allocation2 + $0x82]] }
  0x17   :  { %v1182_v15 = vstv %s3155_s24  ;;  %s3201_s8 = sld [smem:[#allocation2 + $0x96]]  ;;  %s2867_s9 = sld [smem:[#allocation2 + $0x70]] }
  0x18   :  { %v1444_v18 = vstv %s2885_s26  ;;  %s3210_s10 = sld [smem:[#allocation2 + $0xa7]]  ;;  %s3222_s11 = sld [smem:[#allocation2 + $0x71]] }
  0x19   :  { %v1458_v21 = vstv %s2886_s28  ;;  %s3229_s12 = sld [smem:[#allocation2 + $0x72]]  ;;  %s3236_s13 = sld [smem:[#allocation2 + $0x73]] }
  0x1a   :  { %v1472_v24 = vstv %s2887_s30  ;;  %s3240_s14 = sld [smem:[#allocation2 + $0xa8]]  ;;  %s3242_s15 = sld [smem:[#allocation2 + $0x75]] }
  0x1b   :  { %v1748_v27 = vstv %s3181_s4  ;;  %v1762_v30 = vstv %s3187_s5  ;;  %s3249_s16 = sld [smem:[#allocation2 + $0x76]]  ;;  %s3258_s17 = sld [smem:[#allocation2 + $0x85]] }
  0x1c   :  { %v1776_v33 = vstv %s3194_s6  ;;  %v1486_v34 = vstv %s2888_s7  ;;  %s3268_s18 = sld [smem:[#allocation2 + $0x77]]  ;;  %s3270_s1 = sld [smem:[#allocation2 + $0x84]] }
  0x1d   :  { %v1790_v37 = vstv %s3201_s8  ;;  %v1208_v40 = vstv %s2867_s9  ;;  %s3277_s20 = sld [smem:[#allocation2 + $0x86]]  ;;  %s3285_s21 = sld [smem:[#allocation2 + $0x78]] }
  0x1e   :  { %v2052_v41 = vstv %s3210_s10  ;;  %v1224_v48 = vstv %s3222_s11  ;;  %s2893_s22 = sld [smem:[#allocation2 + $0x87]]  ;;  %s3301_s23 = sld [smem:[#allocation2 + $0x7a]] }
  0x1f   :  { %v1240_v52 = vstv %s3229_s12  ;;  %v1256_v56 = vstv %s3236_s13  ;;  %s3307_s24 = sld [smem:[#allocation2 + $0x98]]  ;;  %s2895_s26 = sld [smem:[#allocation2 + $0x89]] }
  0x20   :  { %v2066_v60 = vstv %s3240_s14  ;;  %v1284_v61 = vstv %s3242_s15  ;;  %s2878_s28 = sld [smem:[#allocation2 + $0x7b]]  ;;  %s3327_s30 = sld [smem:[#allocation2 + $0x8a]] }
  0x21   :  { %s3333_s4 = sld [smem:[#allocation2 + $0x99]]  ;;  %s3340_s5 = sld [smem:[#allocation2 + $0x7c]] }
  0x22   :  { %s3347_s6 = sld [smem:[#allocation2 + $0x8b]]  ;;  %s3358_s7 = sld [smem:[#allocation2 + $0x9a]] }
  0x23   :  { %s3377_s8 = sld [smem:[#allocation2 + $0xa9]]  ;;  %s3379_s9 = sld [smem:[#allocation2 + $0x7d]] }
  0x24   :  { %s3392_s10 = sld [smem:[#allocation2 + $0x8c]]  ;;  %s3403_s11 = sld [smem:[#allocation2 + $0x9b]] }
  0x25   :  { %s3423_s12 = sld [smem:[#allocation2 + $0xaa]]  ;;  %s3425_s13 = sld [smem:[#allocation2 + $0x8e]] }
  0x26   :  { %s3436_s14 = sld [smem:[#allocation2 + $0xac]]  ;;  %s3447_s15 = sld [smem:[#allocation2 + $0x8f]] }
  0x82   :  { %v35_v2 = vpop.permute.xlu0 %34 }
  0x83   :  { %v40_v5 = vsel %vm38_vm0, 0.0, %v35_v2  ;;  %v1300_v2 = vstv %s3249_s16  ;;  %s3449_s16 = sld [smem:[#allocation2 + $0x9d]] }
  0x84   :  { %v3159_v6 = vsel %vm41_vm1, %v40_v5, 0.0 }
  0x85   :  { %v1142_v7 = vmul.f32 %v1140_v3, %v3159_v6  ;;  %v1156_v8 = vmul.f32 %v1154_v4, %v3159_v6  ;;  %v1170_v14 = vmul.f32 %v1168_v10, %v3159_v6  ;;  %v1184_v16 = vmul.f32 %v1182_v15, %v3159_v6 }
  0x86   :  { %v33_v9 = vpop.permute.xlu0 %32  ;;  %v1446_v26 = vmul.f32 %v1444_v18, %v3159_v6  ;;  %v1750_v28 = vmul.f32 %v1748_v27, %v3159_v6  ;;  %v1460_v29 = vmul.f32 %v1458_v21, %v3159_v6  ;;  %v1764_v31 = vmul.f32 %v1762_v30, %v3159_v6 }
  0x87   :  { %v39_v11 = vsel %vm38_vm0, 0.0, %v33_v9  ;;  %1147 = vrot.lane.b32.xlu1 %v1142_v7, %s5223_s0  ;;  %1161 = vrot.lane.b32.xlu0 %v1156_v8, %s5225_s25  ;;  %v1474_v32 = vmul.f32 %v1472_v24, %v3159_v6  ;;  %v1778_v35 = vmul.f32 %v1776_v33, %v3159_v6  ;;  %v1488_v36 = vmul.f32 %v1486_v34, %v3159_v6 }
  0x88   :  { %v3168_v12 = vsel %vm41_vm1, %v39_v11, 0.0  ;;  %v1792_v38 = vmul.f32 %v1790_v37, %v3159_v6  ;;  %v1210_v44 = vmul.f32 %v1208_v40, %v3159_v6  ;;  %v2054_v58 = vmul.f32 %v2052_v41, %v3159_v6 }
  0x89   :  { %v1141_v13 = vmul.f32 %v1140_v3, %v3168_v12  ;;  %v1155_v17 = vmul.f32 %v1154_v4, %v3168_v12  ;;  %v1445_v19 = vmul.f32 %v1444_v18, %v3168_v12  ;;  %v1169_v20 = vmul.f32 %v1168_v10, %v3168_v12 }
  0x8a   :  { %v1459_v22 = vmul.f32 %v1458_v21, %v3168_v12  ;;  %v1183_v23 = vmul.f32 %v1182_v15, %v3168_v12  ;;  %v1473_v25 = vmul.f32 %v1472_v24, %v3168_v12  ;;  %v1487_v39 = vmul.f32 %v1486_v34, %v3168_v12 }
  0x8b   :  { %1175 = vrot.lane.b32.xlu0 %v1170_v14, %s5219_s27  ;;  %1145 = vrot.lane.b32.xlu1 %v1141_v13, %s5223_s0  ;;  %v2053_v42 = vmul.f32 %v2052_v41, %v3168_v12  ;;  %v1749_v43 = vmul.f32 %v1748_v27, %v3168_v12  ;;  %v1214_v45 = vrot.slane %v1210_v44, 1  ;;  %v1763_v46 = vmul.f32 %v1762_v30, %v3168_v12 }
  0x8c   :  { %v1209_v47 = vmul.f32 %v1208_v40, %v3168_v12  ;;  %v1777_v50 = vmul.f32 %v1776_v33, %v3168_v12  ;;  %v1225_v51 = vmul.f32 %v1224_v48, %v3168_v12  ;;  %v1791_v54 = vmul.f32 %v1790_v37, %v3168_v12 }
  0x8d   :  { %v1241_v55 = vmul.f32 %v1240_v52, %v3168_v12  ;;  %v1257_v59 = vmul.f32 %v1256_v56, %v3168_v12  ;;  %v2068_v63 = vmul.f32 %v2066_v60, %v3159_v6  ;;  %v1286_v0 = vmul.f32 %v1284_v61, %v3159_v6 }
  0x8e   :  { %v1213_v49 = vrot.slane %v1209_v47, 1  ;;  %v1229_v53 = vrot.slane %v1225_v51, 1  ;;  %v1226_v1 = vmul.f32 %v1224_v48, %v3159_v6  ;;  %v1302_v5 = vmul.f32 %v1300_v2, %v3159_v6 }
  0x8f   :  { %1189 = vrot.lane.b32.xlu0 %v1184_v16, %s5221_s29  ;;  %1159 = vrot.lane.b32.xlu1 %v1155_v17, %s5225_s25  ;;  %v1245_v57 = vrot.slane %v1241_v55, 1  ;;  %v1261_v62 = vrot.slane %v1257_v59, 1  ;;  %v1290_v3 = vrot.slane %v1286_v0, 2  ;;  %v1242_v7 = vmul.f32 %v1240_v52, %v3159_v6 }
  0x90   :  { %v1230_v4 = vrot.slane %v1226_v1, 1  ;;  %v1528_v8 = vstv %s3258_s17  ;;  %v1306_v9 = vrot.slane %v1302_v5, 2  ;;  %v1258_v13 = vmul.f32 %v1256_v56, %v3159_v6  ;;  %s3461_s17 = sld [smem:[#allocation2 + $0x9e]] }
  0x91   :  { %v1246_v10 = vrot.slane %v1242_v7, 1  ;;  %v1530_v11 = vmul.f32 %v1528_v8, %v3159_v6  ;;  %v1316_v14 = vstv %s3268_s18  ;;  %v1512_v15 = vstv %s3270_s1  ;;  %s3472_s18 = sld [smem:[#allocation2 + $0xad]]  ;;  %s3484_s1 = sld [smem:[#allocation2 + $0x90]] }
  0x92   :  { %v1262_v17 = vrot.slane %v1258_v13, 1  ;;  %v1318_v18 = vmul.f32 %v1316_v14, %v3159_v6  ;;  %v1285_v24 = vmul.f32 %v1284_v61, %v3168_v12  ;;  %v1560_v30 = vstv %s2893_s22  ;;  %s3517_s22 = sld [smem:[#allocation2 + $0x91]] }
  0x93   :  { %1449 = vrot.lane.b32.xlu0 %v1445_v19, %s5223_s0  ;;  %1173 = vrot.lane.b32.xlu1 %v1169_v20, %s5219_s27  ;;  %v1534_v16 = vrot.slane %v1530_v11, 1  ;;  %v1514_v19 = vmul.f32 %v1512_v15, %v3159_v6  ;;  %v1544_v20 = vstv %s3277_s20  ;;  %v1562_v33 = vmul.f32 %v1560_v30, %v3159_v6  ;;  %s3495_s20 = sld [smem:[#allocation2 + $0x9f]] }
  0x94   :  { %v1322_v21 = vrot.slane %v1318_v18, 2  ;;  %v1289_v27 = vrot.slane %v1285_v24, 2  ;;  %v1301_v34 = vmul.f32 %v1300_v2, %v3168_v12  ;;  %v1561_v37 = vmul.f32 %v1560_v30, %v3168_v12 }
  0x95   :  { %v1816_v44 = vstv %s3307_s24  ;;  %v1545_v48 = vmul.f32 %v1544_v20, %v3168_v12  ;;  %v1604_v0 = vstv %s3327_s30  ;;  %v1832_v5 = vstv %s3333_s4  ;;  %s3539_s24 = sld [smem:[#allocation2 + $0xaf]]  ;;  %s2924_s30 = sld [smem:[#allocation2 + $0xa3]] }
  0x96   :  { %v1565_v40 = vrot.slane %v1561_v37, 1  ;;  %v1818_v47 = vmul.f32 %v1816_v44, %v3159_v6  ;;  %v1605_v11 = vmul.f32 %v1604_v0, %v3168_v12  ;;  %v1834_v13 = vmul.f32 %v1832_v5, %v3159_v6  ;;  %s2942_s4 = sld [smem:[#allocation2 + $0xb2]] }
  0x97   :  { %1463 = vrot.lane.b32.xlu0 %v1459_v22, %s5225_s25  ;;  %1187 = vrot.lane.b32.xlu1 %v1183_v23, %s5221_s29  ;;  %v1518_v22 = vrot.slane %v1514_v19, 1  ;;  %v1546_v23 = vmul.f32 %v1544_v20, %v3159_v6  ;;  %v1833_v19 = vmul.f32 %v1832_v5, %v3168_v12  ;;  %v2067_v30 = vmul.f32 %v2066_v60, %v3168_v12 }
  0x98   :  { %v1838_v18 = vrot.slane %v1834_v13, 1  ;;  %v2120_v13 = vstv %s3436_s14  ;;  %s3667_s14 = sld [smem:[#allocation2 + $0xb9]] }
  0x99   :  { %v1837_v24 = vrot.slane %v1833_v19, 1 }
  0x9b   :  { %1477 = vrot.lane.b32.xlu0 %v1473_v25, %s5219_s27  ;;  %1451 = vrot.lane.b32.xlu1 %v1446_v26, %s5223_s0  ;;  %v1332_v25 = vstv %s3285_s21  ;;  %v1550_v26 = vrot.slane %v1546_v23, 1  ;;  %s3506_s21 = sld [smem:[#allocation2 + $0xae]] }
  0x9c   :  { %v1333_v52 = vmul.f32 %v1332_v25, %v3168_v12 }
  0x9e   :  { %v1337_v55 = vrot.slane %v1333_v52, 2  ;;  %v1864_v52 = vstv %s3403_s11  ;;  %s3640_s11 = sld [smem:[#allocation2 + $0xb7]] }
  0x9f   :  { %1755 = vrot.lane.b32.xlu0 %v1750_v28, %s5223_s0  ;;  %1465 = vrot.lane.b32.xlu1 %v1460_v29, %s5225_s25  ;;  %v1334_v28 = vmul.f32 %v1332_v25, %v3159_v6  ;;  %v1513_v29 = vmul.f32 %v1512_v15, %v3168_v12 }
  0xa3   :  { %1769 = vrot.lane.b32.xlu0 %v1764_v31, %s5225_s25  ;;  %1479 = vrot.lane.b32.xlu1 %v1474_v32, %s5219_s27  ;;  %v1338_v31 = vrot.slane %v1334_v28, 2  ;;  %v1517_v32 = vrot.slane %v1513_v29, 1 }
  0xa7   :  { %1783 = vrot.lane.b32.xlu0 %v1778_v35, %s5219_s27  ;;  %1493 = vrot.lane.b32.xlu1 %v1488_v36, %s5221_s29  ;;  %v1566_v35 = vrot.slane %v1562_v33, 1  ;;  %v1305_v36 = vrot.slane %v1301_v34, 2 }
  0xab   :  { %1797 = vrot.lane.b32.xlu0 %v1792_v38, %s5221_s29  ;;  %1491 = vrot.lane.b32.xlu1 %v1487_v39, %s5221_s29  ;;  %v1529_v38 = vmul.f32 %v1528_v8, %v3168_v12  ;;  %v1360_v39 = vstv %s3301_s23  ;;  %s3528_s23 = sld [smem:[#allocation2 + $0xa0]] }
  0xac   :  { %v1361_v51 = vmul.f32 %v1360_v39, %v3168_v12 }
  0xad   :  { %v1533_v41 = vrot.slane %v1529_v38, 1  ;;  %v2080_v38 = vstv %s3377_s8  ;;  %s3626_s8 = sld [smem:[#allocation2 + $0xb4]] }
  0xaf   :  { %2057 = vrot.lane.b32.xlu0 %v2053_v42, %s5223_s0  ;;  %1753 = vrot.lane.b32.xlu1 %v1749_v43, %s5223_s0  ;;  %v1362_v42 = vmul.f32 %v1360_v39, %v3159_v6  ;;  %v1317_v43 = vmul.f32 %v1316_v14, %v3168_v12  ;;  %v1392_v14 = vstv %s3340_s5  ;;  %v1408_v39 = vstv %s3379_s9  ;;  %s2925_s5 = sld [smem:[#allocation2 + $0xa4]]  ;;  %s3628_s9 = sld [smem:[#allocation2 + $0xb6]] }
  0xb0   :  { %v1394_v20 = vmul.f32 %v1392_v14, %v3159_v6 }
  0xb2   :  { %v1398_v25 = vrot.slane %v1394_v20, 3  ;;  %v2122_v20 = vmul.f32 %v2120_v13, %v3159_v6 }
  0xb3   :  { %1217 = vrot.lane.b32.xlu0 %v1214_v45, %s5223_s0  ;;  %1767 = vrot.lane.b32.xlu1 %v1763_v46, %s5225_s25  ;;  %v1366_v45 = vrot.slane %v1362_v42, 3  ;;  %v1321_v46 = vrot.slane %v1317_v43, 2  ;;  %v2082_v43 = vmul.f32 %v2080_v38, %v3159_v6 }
  0xb7   :  { %1215 = vrot.lane.b32.xlu0 %v1213_v49, %s5223_s0  ;;  %1781 = vrot.lane.b32.xlu1 %v1777_v50, %s5219_s27  ;;  %v1822_v49 = vrot.slane %v1818_v47, 1  ;;  %v1549_v50 = vrot.slane %v1545_v48, 1 }
  0xbb   :  { %1231 = vrot.lane.b32.xlu0 %v1229_v53, %s5225_s25  ;;  %1795 = vrot.lane.b32.xlu1 %v1791_v54, %s5221_s29  ;;  %v1588_v53 = vstv %s2895_s26  ;;  %v1365_v54 = vrot.slane %v1361_v51, 3  ;;  %s3559_s26 = sld [smem:[#allocation2 + $0xa2]] }
  0xbc   :  { %v1589_v56 = vmul.f32 %v1588_v53, %v3168_v12 }
  0xbe   :  { %v1593_v59 = vrot.slane %v1589_v56, 2 }
  0xbf   :  { %1247 = vrot.lane.b32.xlu0 %v1245_v57, %s5219_s27  ;;  %2059 = vrot.lane.b32.xlu1 %v2054_v58, %s5223_s0  ;;  %v1590_v57 = vmul.f32 %v1588_v53, %v3159_v6  ;;  %v1376_v58 = vstv %s2878_s28  ;;  %s2941_s28 = sld [smem:[#allocation2 + $0xb1]] }
  0xc1   :  { %v1594_v61 = vrot.slane %v1590_v57, 2  ;;  %v1409_v57 = vmul.f32 %v1408_v39, %v3168_v12 }
  0xc3   :  { %1263 = vrot.lane.b32.xlu0 %v1261_v62, %s5221_s29  ;;  %2073 = vrot.lane.b32.xlu1 %v2068_v63, %s5225_s25  ;;  %v1817_v62 = vmul.f32 %v1816_v44, %v3168_v12  ;;  %v1378_v63 = vmul.f32 %v1376_v58, %v3159_v6 }
  0xc5   :  { %v1821_v1 = vrot.slane %v1817_v62, 1  ;;  %v1382_v2 = vrot.slane %v1378_v63, 3  ;;  %v1413_v62 = vrot.slane %v1409_v57, 3 }
  0xc7   :  { %1293 = vrot.lane.b32.xlu0 %v1290_v3, %s5223_s0  ;;  %1233 = vrot.lane.b32.xlu1 %v1230_v4, %s5225_s25  ;;  %v1377_v3 = vmul.f32 %v1376_v58, %v3168_v12  ;;  %v1606_v4 = vmul.f32 %v1604_v0, %v3159_v6  ;;  %v1866_v58 = vmul.f32 %v1864_v52, %v3159_v6 }
  0xc8   :  { %v1865_v0 = vmul.f32 %v1864_v52, %v3168_v12  ;;  %v1696_v52 = vstv %s3484_s1  ;;  %s3748_s1 = sld [smem:[#allocation2 + $0x2e]] }
  0xc9   :  { %v1870_v63 = vrot.slane %v1866_v58, 1 }
  0xca   :  { %v1869_v5 = vrot.slane %v1865_v0, 1  ;;  %v1924_v0 = vstv %s3495_s20  ;;  %s3750_s20 = sld [smem:[#allocation2 + $0x26]] }
  0xcb   :  { %1309 = vrot.lane.b32.xlu0 %v1306_v9, %s5225_s25  ;;  %1249 = vrot.lane.b32.xlu1 %v1246_v10, %s5219_s27  ;;  %v1381_v9 = vrot.slane %v1377_v3, 3  ;;  %v1610_v10 = vrot.slane %v1606_v4, 2 }
  0xcf   :  { %1537 = vrot.lane.b32.xlu0 %v1534_v16, %s5225_s25  ;;  %1265 = vrot.lane.b32.xlu1 %v1262_v17, %s5221_s29  ;;  %v1609_v17 = vrot.slane %v1605_v11, 2 }
  0xd3   :  { %1325 = vrot.lane.b32.xlu0 %v1322_v21, %s5219_s27  ;;  %1521 = vrot.lane.b32.xlu1 %v1518_v22, %s5223_s0  ;;  %v1620_v21 = vstv %s3347_s6  ;;  %s2943_s6 = sld [smem:[#allocation2 + $0xb3]] }
  0xd4   :  { %v1621_v60 = vmul.f32 %v1620_v21, %v3168_v12 }
  0xd6   :  { %v1625_v42 = vrot.slane %v1621_v60, 2 }
  0xd7   :  { %1553 = vrot.lane.b32.xlu0 %v1550_v26, %s5219_s27  ;;  %1291 = vrot.lane.b32.xlu1 %v1289_v27, %s5223_s0  ;;  %v1622_v26 = vmul.f32 %v1620_v21, %v3159_v6  ;;  %v1848_v27 = vstv %s3358_s7  ;;  %v1680_v21 = vstv %s3447_s15  ;;  %s2926_s7 = sld [smem:[#allocation2 + $0xa5]]  ;;  %s3690_s15 = sld [smem:[#allocation2 + $0x22]] }
  0xd8   :  { %v1850_v33 = vmul.f32 %v1848_v27, %v3159_v6  ;;  %v1849_v44 = vmul.f32 %v1848_v27, %v3168_v12  ;;  %v2126_v27 = vrot.slane %v2122_v20, 1 }
  0xda   :  { %v1854_v37 = vrot.slane %v1850_v33, 1  ;;  %v1908_v33 = vstv %s3461_s17  ;;  %s3707_s17 = sld [smem:[#allocation2 + $0x23]] }
  0xdb   :  { %1341 = vrot.lane.b32.xlu0 %v1338_v31, %s5221_s29  ;;  %1519 = vrot.lane.b32.xlu1 %v1517_v32, %s5223_s0  ;;  %v1626_v31 = vrot.slane %v1622_v26, 2  ;;  %v1393_v32 = vmul.f32 %v1392_v14, %v3168_v12 }
  0xdf   :  { %1569 = vrot.lane.b32.xlu0 %v1566_v35, %s5221_s29  ;;  %1307 = vrot.lane.b32.xlu1 %v1305_v36, %s5225_s25  ;;  %v1397_v36 = vrot.slane %v1393_v32, 3 }
  0xe3   :  { %1567 = vrot.lane.b32.xlu0 %v1565_v40, %s5221_s29  ;;  %1535 = vrot.lane.b32.xlu1 %v1533_v41, %s5225_s25 }
  0xe7   :  { %1369 = vrot.lane.b32.xlu0 %v1366_v45, %s5223_s0  ;;  %1323 = vrot.lane.b32.xlu1 %v1321_v46, %s5219_s27  ;;  %v1410_v45 = vmul.f32 %v1408_v39, %v3159_v6  ;;  %v1636_v46 = vstv %s3392_s10  ;;  %v1910_v39 = vmul.f32 %v1908_v33, %v3159_v6  ;;  %s3630_s10 = sld [smem:[#allocation2 + $0x6a]] }
  0xe8   :  { %v1638_v51 = vmul.f32 %v1636_v46, %v3159_v6  ;;  %v1637_v11 = vmul.f32 %v1636_v46, %v3168_v12 }
  0xe9   :  { %v1914_v46 = vrot.slane %v1910_v39, 2 }
  0xea   :  { %v1642_v56 = vrot.slane %v1638_v51, 2  ;;  %v1641_v19 = vrot.slane %v1637_v11, 2  ;;  %v1681_v11 = vmul.f32 %v1680_v21, %v3168_v12 }
  0xeb   :  { %1825 = vrot.lane.b32.xlu0 %v1822_v49, %s5223_s0  ;;  %1551 = vrot.lane.b32.xlu1 %v1549_v50, %s5219_s27  ;;  %v1853_v49 = vrot.slane %v1849_v44, 1  ;;  %v1414_v50 = vrot.slane %v1410_v45, 3 }
  0xef   :  { %1367 = vrot.lane.b32.xlu0 %v1365_v54, %s5223_s0  ;;  %1339 = vrot.lane.b32.xlu1 %v1337_v55, %s5221_s29  ;;  %v2081_v55 = vmul.f32 %v2080_v38, %v3168_v12 }
  0xf3   :  { %1595 = vrot.lane.b32.xlu0 %v1593_v59, %s5223_s0  ;;  %1597 = vrot.lane.b32.xlu1 %v1594_v61, %s5223_s0 }
  0xf7   :  { %1823 = vrot.lane.b32.xlu0 %v1821_v1, %s5223_s0  ;;  %1385 = vrot.lane.b32.xlu1 %v1382_v2, %s5225_s25  ;;  %v2094_v1 = vstv %s3423_s12  ;;  %v1664_v2 = vstv %s3425_s13  ;;  %s3652_s12 = sld [smem:[#allocation2 + $0xb8]]  ;;  %s3657_s13 = sld [smem:[#allocation2 + $0x6f]] }
  0xf9   :  { %v3351_v7 = vpop.permute.xlu1 %1147  ;;  %v3353_v8 = vpop.permute.xlu0 %1161 }
  0xfb   :  { %1383 = vrot.lane.b32.xlu0 %v1381_v9, %s5225_s25  ;;  %1613 = vrot.lane.b32.xlu1 %v1610_v10, %s5225_s25  ;;  %v2096_v9 = vmul.f32 %v2094_v1, %v3159_v6  ;;  %v1666_v10 = vmul.f32 %v1664_v2, %v3159_v6 }
  0xfd   :  { %v3362_v15 = vpop.permute.xlu1 %1145  ;;  %v3364_v16 = vpop.permute.xlu0 %1175 }
  0xff   :  { %1611 = vrot.lane.b32.xlu0 %v1609_v17, %s5225_s25  ;;  %1841 = vrot.lane.b32.xlu1 %v1838_v18, %s5225_s25  ;;  %v1670_v18 = vrot.slane %v1666_v10, 3  ;;  %v1926_v10 = vmul.f32 %v1924_v0, %v3159_v6 }
 0x101   :  { %v3371_v22 = vpop.permute.xlu1 %1159  ;;  %v3373_v23 = vpop.permute.xlu0 %1189  ;;  %v1930_v20 = vrot.slane %v1926_v10, 2 }
 0x103   :  { %1839 = vrot.lane.b32.xlu0 %v1837_v24, %s5225_s25  ;;  %1401 = vrot.lane.b32.xlu1 %v1398_v25, %s5219_s27  ;;  %v1892_v24 = vstv %s3449_s16  ;;  %s3697_s16 = sld [smem:[#allocation2 + $0x74]] }
 0x104   :  { %v1894_v32 = vmul.f32 %v1892_v24, %v3159_v6  ;;  %v1893_v51 = vmul.f32 %v1892_v24, %v3168_v12  ;;  %v1685_v24 = vrot.slane %v1681_v11, 3 }
 0x105   :  { %v3383_v28 = vpop.permute.xlu1 %1173  ;;  %v3385_v29 = vpop.permute.xlu0 %1449 }
 0x106   :  { %v1898_v38 = vrot.slane %v1894_v32, 2  ;;  %v1897_v58 = vrot.slane %v1893_v51, 2 }
 0x107   :  { %2071 = vrot.lane.b32.xlu0 %v2067_v30, %s5225_s25  ;;  %1629 = vrot.lane.b32.xlu1 %v1626_v31, %s5219_s27  ;;  %v2095_v30 = vmul.f32 %v2094_v1, %v3168_v12  ;;  %v1682_v31 = vmul.f32 %v1680_v21, %v3159_v6 }
 0x109   :  { %v3396_v34 = vpop.permute.xlu1 %1187  ;;  %v3398_v35 = vpop.permute.xlu0 %1463  ;;  %v1686_v60 = vrot.slane %v1682_v31, 3  ;;  %v1712_v31 = vstv %s3517_s22  ;;  %s3765_s22 = sld [smem:[#allocation2 + $0x79]] }
 0x10a   :  { %v1714_v39 = vmul.f32 %v1712_v31, %v3159_v6 }
 0x10b   :  { %1399 = vrot.lane.b32.xlu0 %v1397_v36, %s5219_s27  ;;  %1857 = vrot.lane.b32.xlu1 %v1854_v37, %s5219_s27 }
 0x10d   :  { %v3407_v40 = vpop.permute.xlu1 %1451  ;;  %v3409_v41 = vpop.permute.xlu0 %1477 }
 0x10f   :  { %1627 = vrot.lane.b32.xlu0 %v1625_v42, %s5219_s27  ;;  %2087 = vrot.lane.b32.xlu1 %v2082_v43, %s5219_s27  ;;  %v1665_v42 = vmul.f32 %v1664_v2, %v3168_v12  ;;  %v2136_v43 = vstv %s3472_s18  ;;  %s3709_s18 = sld [smem:[#allocation2 + $0x25]] }
 0x111   :  { %v3417_v47 = vpop.permute.xlu1 %1465  ;;  %v3419_v48 = vpop.permute.xlu0 %1755 }
 0x113   :  { %1855 = vrot.lane.b32.xlu0 %v1853_v49, %s5219_s27  ;;  %1417 = vrot.lane.b32.xlu1 %v1414_v50, %s5221_s29  ;;  %v1669_v49 = vrot.slane %v1665_v42, 3  ;;  %v2138_v50 = vmul.f32 %v2136_v43, %v3159_v6  ;;  %v2137_v42 = vmul.f32 %v2136_v43, %v3168_v12  ;;  %v1925_v43 = vmul.f32 %v1924_v0, %v3168_v12 }
 0x115   :  { %v3429_v53 = vpop.permute.xlu1 %1479  ;;  %v3431_v54 = vpop.permute.xlu0 %1769  ;;  %v2142_v57 = vrot.slane %v2138_v50, 1  ;;  %v1718_v50 = vrot.slane %v1714_v39, 3  ;;  %v2141_v51 = vrot.slane %v2137_v42, 1 }
 0x116   :  { %5230 = vst [vmem:[#allocation8_spill] sm:$0xff] %v3431_v54 }
 0x117   :  { %2085 = vrot.lane.b32.xlu0 %v2081_v55, %s5219_s27  ;;  %1645 = vrot.lane.b32.xlu1 %v1642_v56, %s5221_s29 }
 0x119   :  { %v3440_v59 = vpop.permute.xlu1 %1493  ;;  %v3442_v61 = vpop.permute.xlu0 %1783 }
 0x11a   :  { %5231 = vst [vmem:[#allocation9_spill] sm:$0xff] %v3442_v61 }
 0x11b   :  { %1415 = vrot.lane.b32.xlu0 %v1413_v62, %s5221_s29  ;;  %1873 = vrot.lane.b32.xlu1 %v1870_v63, %s5221_s29  ;;  %v1698_v62 = vmul.f32 %v1696_v52, %v3159_v6  ;;  %v2121_v63 = vmul.f32 %v2120_v13, %v3168_v12 }
 0x11d   :  { %v3453_v3 = vpop.permute.xlu1 %1491  ;;  %v3455_v4 = vpop.permute.xlu0 %1797 }
 0x11e   :  { %5232 = vst [vmem:[#allocation10_spill] sm:$0xff] %v3455_v4 }
 0x11f   :  { %1871 = vrot.lane.b32.xlu0 %v1869_v5, %s5221_s29  ;;  %2101 = vrot.lane.b32.xlu1 %v2096_v9, %s5221_s29  ;;  %v1702_v5 = vrot.slane %v1698_v62, 3  ;;  %v2125_v9 = vrot.slane %v2121_v63, 1  ;;  %v2168_v62 = vstv %s3539_s24  ;;  %s3790_s24 = sld [smem:[#allocation2 + $0x3a]] }
 0x120   :  { %v2170_v11 = vmul.f32 %v2168_v62, %v3159_v6 }
 0x121   :  { %v3465_v14 = vpop.permute.xlu1 %1753  ;;  %v3467_v17 = vpop.permute.xlu0 %2057 }
 0x122   :  { %5233 = vst [vmem:[#allocation11_spill] sm:$0xff] %v3465_v14  ;;  %5234 = vst [vmem:[#allocation12_spill] sm:$0xff] %v3467_v17  ;;  %v2174_v0 = vrot.slane %v2170_v11, 1  ;;  %v2196_v11 = vstv %s2941_s28  ;;  %v1134_v17 = vstv %s3630_s10  ;;  %s3797_s28 = sld [smem:[#allocation2 + $0x29]]  ;;  %s3879_s10 = sld [smem:[#allocation2 + $0x83]] }
 0x123   :  { %1673 = vrot.lane.b32.xlu0 %v1670_v18, %s5223_s0  ;;  %1643 = vrot.lane.b32.xlu1 %v1641_v19, %s5221_s29  ;;  %v2152_v18 = vstv %s3506_s21  ;;  %v1136_v61 = vmul.f32 %v1134_v17, %v3159_v6  ;;  %s3763_s21 = sld [smem:[#allocation2 + $0x28]] }
 0x125   :  { %v3476_v25 = vpop.permute.xlu1 %1767  ;;  %v3478_v26 = vpop.permute.xlu0 %1217 }
 0x126   :  { %5235 = vst [vmem:[#allocation13_spill] sm:$0xff] %v3476_v25  ;;  %v2016_v25 = vstv %s2926_s7  ;;  %s3861_s7 = sld [smem:[#allocation2 + $0x2b]] }
 0x127   :  { %2129 = vrot.lane.b32.xlu0 %v2126_v27, %s5223_s0  ;;  %2099 = vrot.lane.b32.xlu1 %v2095_v30, %s5221_s29  ;;  %v2154_v27 = vmul.f32 %v2152_v18, %v3159_v6  ;;  %v1909_v30 = vmul.f32 %v1908_v33, %v3168_v12 }
 0x129   :  { %v3488_v36 = vpop.permute.xlu1 %1781  ;;  %v3490_v37 = vpop.permute.xlu0 %1215 }
 0x12a   :  { %5236 = vst [vmem:[#allocation14_spill] sm:$0xff] %v3488_v36 }
 0x12b   :  { %1689 = vrot.lane.b32.xlu0 %v1686_v60, %s5225_s25  ;;  %1901 = vrot.lane.b32.xlu1 %v1898_v38, %s5223_s0  ;;  %v2158_v60 = vrot.slane %v2154_v27, 1  ;;  %v1913_v38 = vrot.slane %v1909_v30, 2 }
 0x12d   :  { %v3499_v44 = vpop.permute.xlu1 %1795  ;;  %v3501_v45 = vpop.permute.xlu0 %1231 }
 0x12e   :  { %5237 = vst [vmem:[#allocation15_spill] sm:$0xff] %v3499_v44 }
 0x12f   :  { %1917 = vrot.lane.b32.xlu0 %v1914_v46, %s5225_s25  ;;  %1671 = vrot.lane.b32.xlu1 %v1669_v49, %s5223_s0  ;;  %v1940_v46 = vstv %s3528_s23  ;;  %s3775_s23 = sld [smem:[#allocation2 + $0x2f]] }
 0x130   :  { %v1941_v30 = vmul.f32 %v1940_v46, %v3168_v12 }
 0x131   :  { %v3510_v55 = vpop.permute.xlu1 %2059  ;;  %v3512_v56 = vpop.permute.xlu0 %1247 }
 0x132   :  { %5238 = vst [vmem:[#allocation16_spill] sm:$0xff] %v3510_v55  ;;  %v2304_v55 = vstv %s3652_s12  ;;  %s3886_s12 = sld [smem:[#allocation2 + $0xc2]] }
 0x133   :  { %2145 = vrot.lane.b32.xlu0 %v2142_v57, %s5225_s25  ;;  %1899 = vrot.lane.b32.xlu1 %v1897_v58, %s5223_s0  ;;  %v1942_v57 = vmul.f32 %v1940_v46, %v3159_v6  ;;  %v1697_v58 = vmul.f32 %v1696_v52, %v3168_v12  ;;  %v1929_v52 = vrot.slane %v1925_v43, 2 }
 0x135   :  { %v3521_v1 = vpop.permute.xlu1 %2073  ;;  %v3523_v2 = vpop.permute.xlu0 %1263  ;;  %v1701_v10 = vrot.slane %v1697_v58, 3 }
 0x136   :  { %5239 = vst [vmem:[#allocation17_spill] sm:$0xff] %v3521_v1 }
 0x137   :  { %1705 = vrot.lane.b32.xlu0 %v1702_v5, %s5219_s27  ;;  %2127 = vrot.lane.b32.xlu1 %v2125_v9, %s5223_s0  ;;  %v1946_v9 = vrot.slane %v1942_v57, 2 }
 0x139   :  { %v3532_v13 = vpop.permute.xlu1 %1233  ;;  %v3534_v19 = vpop.permute.xlu0 %1293 }
 0x13b   :  { %1933 = vrot.lane.b32.xlu0 %v1930_v20, %s5219_s27  ;;  %1687 = vrot.lane.b32.xlu1 %v1685_v24, %s5225_s25  ;;  %v2153_v20 = vmul.f32 %v2152_v18, %v3168_v12  ;;  %v1713_v18 = vmul.f32 %v1712_v31, %v3168_v12 }
 0x13d   :  { %v3543_v21 = vpop.permute.xlu1 %1249  ;;  %v3545_v32 = vpop.permute.xlu0 %1309  ;;  %v1717_v58 = vrot.slane %v1713_v18, 3 }
 0x13f   :  { %2161 = vrot.lane.b32.xlu0 %v2158_v60, %s5219_s27  ;;  %1915 = vrot.lane.b32.xlu1 %v1913_v38, %s5225_s25  ;;  %v1968_v60 = vstv %s3559_s26  ;;  %v2157_v38 = vrot.slane %v2153_v20, 1  ;;  %s3795_s26 = sld [smem:[#allocation2 + $0x31]] }
 0x141   :  { %v3552_v33 = vpop.permute.xlu1 %1265  ;;  %v3554_v49 = vpop.permute.xlu0 %1537 }
 0x143   :  { %1721 = vrot.lane.b32.xlu0 %v1718_v50, %s5221_s29  ;;  %2143 = vrot.lane.b32.xlu1 %v2141_v51, %s5225_s25  ;;  %v1945_v50 = vrot.slane %v1941_v30, 2  ;;  %v1970_v51 = vmul.f32 %v1968_v60, %v3159_v6  ;;  %v2198_v30 = vmul.f32 %v2196_v11, %v3159_v6 }
 0x145   :  { %v3564_v63 = vpop.permute.xlu1 %1521  ;;  %v3566_v5 = vpop.permute.xlu0 %1325  ;;  %v1974_v43 = vrot.slane %v1970_v51, 3  ;;  %v2202_v18 = vrot.slane %v2198_v30, 2 }
 0x147   :  { %1949 = vrot.lane.b32.xlu0 %v1946_v9, %s5221_s29  ;;  %1703 = vrot.lane.b32.xlu1 %v1701_v10, %s5219_s27  ;;  %v2169_v9 = vmul.f32 %v2168_v62, %v3168_v12  ;;  %v1969_v10 = vmul.f32 %v1968_v60, %v3168_v12 }
 0x149   :  { %v3572_v24 = vpop.permute.xlu1 %1291  ;;  %v3574_v27 = vpop.permute.xlu0 %1553  ;;  %v2173_v20 = vrot.slane %v2169_v9, 1  ;;  %v2212_v9 = vstv %s2942_s4  ;;  %s3829_s4 = sld [smem:[#allocation2 + $0xba]] }
 0x14a   :  { %v2214_v44 = vmul.f32 %v2212_v9, %v3159_v6  ;;  %v2213_v30 = vmul.f32 %v2212_v9, %v3168_v12 }
 0x14b   :  { %1931 = vrot.lane.b32.xlu1 %v1929_v52, %s5219_s27  ;;  %2177 = vrot.lane.b32.xlu0 %v2174_v0, %s5221_s29  ;;  %v1973_v0 = vrot.slane %v1969_v10, 3 }
 0x14c   :  { %v2217_v36 = vrot.slane %v2213_v30, 2 }
 0x14d   :  { %v3580_v39 = vpop.permute.xlu1 %1519  ;;  %v3582_v42 = vpop.permute.xlu0 %1341 }
 0x14f   :  { %2159 = vrot.lane.b32.xlu1 %v2157_v38, %s5219_s27  ;;  %1947 = vrot.lane.b32.xlu0 %v1945_v50, %s5221_s29  ;;  %v2197_v38 = vmul.f32 %v2196_v11, %v3168_v12  ;;  %v1984_v50 = vstv %s2924_s30  ;;  %s3813_s30 = sld [smem:[#allocation2 + $0x32]] }
 0x151   :  { %v3588_v46 = vpop.permute.xlu1 %1307  ;;  %v3590_v57 = vpop.permute.xlu0 %1569  ;;  %v2201_v51 = vrot.slane %v2197_v38, 2  ;;  %v2000_v38 = vstv %s2925_s5  ;;  %s3845_s5 = sld [smem:[#allocation2 + $0x3b]] }
 0x153   :  { %1719 = vrot.lane.b32.xlu1 %v1717_v58, %s5221_s29  ;;  %1977 = vrot.lane.b32.xlu0 %v1974_v43, %s5223_s0  ;;  %v1986_v58 = vmul.f32 %v1984_v50, %v3159_v6  ;;  %v1985_v43 = vmul.f32 %v1984_v50, %v3168_v12 }
 0x155   :  { %v3596_v31 = vpop.permute.xlu1 %1535  ;;  %v3598_v52 = vpop.permute.xlu0 %1567 }
 0x157   :  { %2175 = vrot.lane.b32.xlu1 %v2173_v20, %s5221_s29  ;;  %1975 = vrot.lane.b32.xlu0 %v1973_v0, %s5223_s0  ;;  %v1990_v20 = vrot.slane %v1986_v58, 3  ;;  %v1989_v0 = vrot.slane %v1985_v43, 3  ;;  %v2001_v58 = vmul.f32 %v2000_v38, %v3168_v12  ;;  %v2228_v43 = vstv %s2943_s6  ;;  %s3851_s6 = sld [smem:[#allocation2 + $0x7e]] }
 0x158   :  { %v2230_v30 = vmul.f32 %v2228_v43, %v3159_v6 }
 0x159   :  { %v3604_v62 = vpop.permute.xlu1 %1323  ;;  %v3606_v60 = vpop.permute.xlu0 %1369 }
 0x15a   :  { %v2234_v14 = vrot.slane %v2230_v30, 2 }
 0x15b   :  { %2205 = vrot.lane.b32.xlu1 %v2202_v18, %s5223_s0  ;;  %2203 = vrot.lane.b32.xlu0 %v2201_v51, %s5223_s0  ;;  %v2218_v51 = vrot.slane %v2214_v44, 2 }
 0x15d   :  { %v3612_v10 = vpop.permute.xlu1 %1551  ;;  %v3614_v11 = vpop.permute.xlu0 %1825 }
 0x15e   :  { %5240 = vst [vmem:[#allocation18_spill] sm:$0xff] %v3614_v11  ;;  %v2002_v11 = vmul.f32 %v2000_v38, %v3159_v6  ;;  %v2229_v38 = vmul.f32 %v2228_v43, %v3168_v12  ;;  %v2272_v43 = vstv %s3628_s9  ;;  %s3877_s9 = sld [smem:[#allocation2 + $0x3d]] }
 0x15f   :  { %1993 = vrot.lane.b32.xlu1 %v1990_v20, %s5225_s25  ;;  %1991 = vrot.lane.b32.xlu0 %v1989_v0, %s5225_s25  ;;  %v2005_v0 = vrot.slane %v2001_v58, 3  ;;  %v2017_v58 = vmul.f32 %v2016_v25, %v3168_v12 }
 0x160   :  { %v2006_v20 = vrot.slane %v2002_v11, 3  ;;  %v2233_v4 = vrot.slane %v2229_v38, 2  ;;  %v2018_v11 = vmul.f32 %v2016_v25, %v3159_v6 }
 0x161   :  { %v3620_v50 = vpop.permute.xlu1 %1339  ;;  %v3622_v18 = vpop.permute.xlu0 %1367  ;;  %v2021_v38 = vrot.slane %v2017_v58, 3 }
 0x162   :  { %v2022_v30 = vrot.slane %v2018_v11, 3 }
 0x163   :  { %2221 = vrot.lane.b32.xlu1 %v2218_v51, %s5225_s25  ;;  %2219 = vrot.lane.b32.xlu0 %v2217_v36, %s5225_s25 }
 0x165   :  { %v3634_v9 = vpop.permute.xlu1 %1597  ;;  %v3636_v44 = vpop.permute.xlu0 %1595 }
 0x166   :  { %5241 = vst [vmem:[#allocation19_spill] sm:$0xff] %v3634_v9  ;;  %5242 = vst [vmem:[#allocation20_spill] sm:$0xff] %v3636_v44  ;;  %v2244_v44 = vstv %s3626_s8  ;;  %v2288_v9 = vstv %s3640_s11  ;;  %s3868_s8 = sld [smem:[#allocation2 + $0xbe]]  ;;  %s3883_s11 = sld [smem:[#allocation2 + $0x34]] }
 0x167   :  { %2009 = vrot.lane.b32.xlu1 %v2006_v20, %s5219_s27  ;;  %2007 = vrot.lane.b32.xlu0 %v2005_v0, %s5219_s27  ;;  %v2246_v25 = vmul.f32 %v2244_v44, %v3159_v6  ;;  %v2245_v1 = vmul.f32 %v2244_v44, %v3168_v12  ;;  %v2290_v54 = vmul.f32 %v2288_v9, %v3159_v6 }
 0x168   :  { %v2306_v44 = vmul.f32 %v2304_v55, %v3159_v6 }
 0x169   :  { %v3644_v36 = vpop.permute.xlu1 %1385  ;;  %v3646_v51 = vpop.permute.xlu0 %1823  ;;  %v2250_v58 = vrot.slane %v2246_v25, 2  ;;  %v2320_v25 = vstv %s3667_s14  ;;  %s3918_s14 = sld [smem:[#allocation2 + $0x92]] }
 0x16a   :  { %5243 = vst [vmem:[#allocation21_spill] sm:$0xff] %v3646_v51  ;;  %v2274_v51 = vmul.f32 %v2272_v43, %v3159_v6 }
 0x16b   :  { %2237 = vrot.lane.b32.xlu1 %v2234_v14, %s5219_s27  ;;  %2235 = vrot.lane.b32.xlu0 %v2233_v4, %s5219_s27  ;;  %v1152_v4 = vadd.f32 %v3351_v7, %v1136_v61 }
 0x16d   :  { %v3659_v20 = vpop.permute.xlu1 %1613  ;;  %v3661_v0 = vpop.permute.xlu0 %1383 }
 0x16e   :  { %5244 = vst [vmem:[#allocation22_spill] sm:$0xff] %v3659_v20  ;;  %v2278_v20 = vrot.slane %v2274_v51, 3  ;;  %v2273_v51 = vmul.f32 %v2272_v43, %v3168_v12 }
 0x16f   :  { %2025 = vrot.lane.b32.xlu1 %v2022_v30, %s5221_s29  ;;  %2023 = vrot.lane.b32.xlu0 %v2021_v38, %s5221_s29  ;;  %v1166_v30 = vadd.f32 %v3353_v8, %v1152_v4  ;;  %v1196_v38 = vstv %s3657_s13  ;;  %v1135_v8 = vmul.f32 %v1134_v17, %v3168_v12  ;;  %s3914_s13 = sld [smem:[#allocation2 + $0x2c]] }
 0x170   :  { %v1198_v4 = vmul.f32 %v1196_v38, %v3159_v6  ;;  %v2277_v43 = vrot.slane %v2273_v51, 3 }
 0x171   :  { %v3672_v14 = vpop.permute.xlu1 %1841  ;;  %v3674_v11 = vpop.permute.xlu0 %1611 }
 0x172   :  { %5245 = vst [vmem:[#allocation23_spill] sm:$0xff] %v3672_v14  ;;  %5246 = vst [vmem:[#allocation24_spill] sm:$0xff] %v3674_v11  ;;  %v2249_v14 = vrot.slane %v2245_v1, 2  ;;  %v2294_v11 = vrot.slane %v2290_v54, 3 }
 0x173   :  { %2253 = vrot.lane.b32.xlu1 %v2250_v58, %s5221_s29  ;;  %2281 = vrot.lane.b32.xlu0 %v2278_v20, %s5223_s0  ;;  %v1180_v20 = vadd.f32 %v3364_v16, %v1166_v30  ;;  %v2310_v58 = vrot.slane %v2306_v44, 3  ;;  %v1202_v30 = vrot.slane %v1198_v4, 1 }
 0x175   :  { %v3683_v7 = vpop.permute.xlu1 %1401  ;;  %v3685_v61 = vpop.permute.xlu0 %1839  ;;  %v1194_v17 = vadd.f32 %v3373_v23, %v1180_v20  ;;  %v2305_v23 = vmul.f32 %v2304_v55, %v3168_v12 }
 0x176   :  { %5247 = vst [vmem:[#allocation25_spill] sm:$0xff] %v3685_v61  ;;  %v2289_v61 = vmul.f32 %v2288_v9, %v3168_v12 }
 0x177   :  { %2251 = vrot.lane.b32.xlu1 %v2249_v14, %s5221_s29  ;;  %2297 = vrot.lane.b32.xlu0 %v2294_v11, %s5225_s25  ;;  %v2322_v14 = vmul.f32 %v2320_v25, %v3159_v6  ;;  %v1151_v11 = vadd.f32 %v3362_v15, %v1135_v8  ;;  %v1206_v20 = vadd.f32 %v1202_v30, %v1194_v17  ;;  %v319_v30 = vstv %s3707_s17  ;;  %s3938_s17 = sld [smem:[#allocation2 + $0x46]] }
 0x178   :  { %v2293_v15 = vrot.slane %v2289_v61, 3  ;;  %v1272_v61 = vstv %s3697_s16  ;;  %v2321_v17 = vmul.f32 %v2320_v25, %v3168_v12  ;;  %v321_v25 = vmul.f32 %v319_v30, %v3159_v6  ;;  %s3927_s16 = sld [smem:[#allocation2 + $0x97]] }
 0x179   :  { %v3699_v54 = vpop.permute.xlu1 %1629  ;;  %v3701_v1 = vpop.permute.xlu0 %2071  ;;  %v1165_v16 = vadd.f32 %v3371_v22, %v1151_v11  ;;  %v2326_v44 = vrot.slane %v2322_v14, 3  ;;  %v1222_v4 = vadd.f32 %v3478_v26, %v1206_v20 }
 0x17a   :  { %v2325_v20 = vrot.slane %v2321_v17, 3 }
 0x17b   :  { %2279 = vrot.lane.b32.xlu1 %v2277_v43, %s5223_s0  ;;  %2313 = vrot.lane.b32.xlu0 %v2310_v58, %s5219_s27  ;;  %v1179_v8 = vadd.f32 %v3383_v28, %v1165_v16  ;;  %v1197_v43 = vmul.f32 %v1196_v38, %v3168_v12  ;;  %v305_v58 = vstv %s3690_s15  ;;  %v2309_v28 = vrot.slane %v2305_v23, 3  ;;  %s3920_s15 = sld [smem:[#allocation2 + $0xa6]] }
 0x17c   :  { %v307_v11 = vmul.f32 %v305_v58, %v3159_v6  ;;  %v1238_v16 = vadd.f32 %v3532_v13, %v1222_v4  ;;  %v306_v17 = vmul.f32 %v305_v58, %v3168_v12 }
 0x17d   :  { %v3714_v9 = vpop.permute.xlu1 %1857  ;;  %v3716_v51 = vpop.permute.xlu0 %1399  ;;  %v1193_v22 = vadd.f32 %v3396_v34, %v1179_v8  ;;  %v1201_v38 = vrot.slane %v1197_v43, 1 }
 0x17e   :  { %v1254_v26 = vadd.f32 %v3543_v21, %v1238_v16 }
 0x17f   :  { %2295 = vrot.lane.b32.xlu1 %v2293_v15, %s5225_s25  ;;  %2329 = vrot.lane.b32.xlu0 %v2326_v44, %s5221_s29  ;;  %v345_v15 = vstv %s3709_s18  ;;  %v1205_v34 = vadd.f32 %v1201_v38, %v1193_v22  ;;  %v1274_v44 = vmul.f32 %v1272_v61, %v3159_v6  ;;  %s3943_s18 = sld [smem:[#allocation2 + $0x88]] }
 0x180   :  { %v347_v13 = vmul.f32 %v345_v15, %v3159_v6  ;;  %v1270_v4 = vadd.f32 %v3552_v33, %v1254_v26  ;;  %v346_v33 = vmul.f32 %v345_v15, %v3168_v12 }
 0x181   :  { %v3727_v14 = vpop.permute.xlu1 %2087  ;;  %v3729_v55 = vpop.permute.xlu0 %1627  ;;  %v1221_v43 = vadd.f32 %v3490_v37, %v1205_v34  ;;  %v1278_v22 = vrot.slane %v1274_v44, 2  ;;  %v1273_v34 = vmul.f32 %v1272_v61, %v3168_v12 }
 0x182   :  { %v351_v37 = vrot.slane %v347_v13, 1  ;;  %v350_v26 = vrot.slane %v346_v33, 1  ;;  %v1348_v33 = vstv %s3765_s22  ;;  %s3955_s22 = sld [smem:[#allocation2 + $0x9c]] }
 0x183   :  { %2311 = vrot.lane.b32.xlu1 %v2309_v28, %s5219_s27  ;;  %312 = vrot.lane.b32.xlu0 %v307_v11, %s5223_s0  ;;  %v1237_v21 = vadd.f32 %v3501_v45, %v1221_v43  ;;  %v1282_v16 = vadd.f32 %v1278_v22, %v1270_v4  ;;  %v1277_v44 = vrot.slane %v1273_v34, 2  ;;  %s4503_s27 = sld [smem:[#allocation2 + $0x10]] }
 0x185   :  { %v3740_v8 = vpop.permute.xlu1 %1417  ;;  %v3742_v23 = vpop.permute.xlu0 %1855  ;;  %v1253_v38 = vadd.f32 %v3512_v56, %v1237_v21  ;;  %v320_v56 = vmul.f32 %v319_v30, %v3168_v12  ;;  %v1298_v61 = vadd.f32 %v3534_v19, %v1282_v16 }
 0x187   :  { %2327 = vrot.lane.b32.xlu1 %v2325_v20, %s5221_s29  ;;  %326 = vrot.lane.b32.xlu0 %v321_v25, %s5225_s25  ;;  %v1269_v45 = vadd.f32 %v3523_v2, %v1253_v38  ;;  %v485_v20 = vstv %s3748_s1  ;;  %v361_v25 = vstv %s3750_s20  ;;  %v1314_v22 = vadd.f32 %v3545_v32, %v1298_v61  ;;  %s3945_s1 = sld [smem:[#allocation2 + $0x35]]  ;;  %s4505_s29 = sld [smem:[#allocation2 + $0x8]] }
 0x188   :  { %v487_v30 = vmul.f32 %v485_v20, %v3159_v6  ;;  %v486_v4 = vmul.f32 %v485_v20, %v3168_v12  ;;  %v363_v19 = vmul.f32 %v361_v25, %v3159_v6  ;;  %v362_v21 = vmul.f32 %v361_v25, %v3168_v12  ;;  %s3947_s20 = sld [smem:[#allocation2 + $0x8d]] }
 0x189   :  { %v3755_v28 = vpop.permute.xlu1 %1645  ;;  %v3757_v11 = vpop.permute.xlu0 %2085  ;;  %v1281_v2 = vadd.f32 %v1277_v44, %v1269_v45  ;;  %v1350_v44 = vmul.f32 %v1348_v33, %v3159_v6 }
 0x18a   :  { %v367_v45 = vrot.slane %v363_v19, 1  ;;  %v366_v32 = vrot.slane %v362_v21, 1 }
 0x18b   :  { %310 = vrot.lane.b32.xlu1 %v306_v17, %s5223_s0  ;;  %354 = vrot.lane.b32.xlu0 %v351_v37, %s5223_s0  ;;  %v1297_v17 = vadd.f32 %v3572_v24, %v1281_v2  ;;  %v389_v37 = vstv %s3763_s21  ;;  %v499_v24 = vstv %s3775_s23  ;;  %v1354_v19 = vrot.slane %v1350_v44, 3  ;;  %s3949_s21 = sld [smem:[#allocation2 + $0xab]]  ;;  %s3957_s23 = sld [smem:[#allocation2 + $0xa1]] }
 0x18c   :  { %v541_v44 = vstv %s3813_s30  ;;  %s3982_s30 = sld [smem:[#allocation2 + $0x40]] }
 0x18d   :  { %v3770_v58 = vpop.permute.xlu1 %1873  ;;  %v3772_v15 = vpop.permute.xlu0 %1415  ;;  %v1313_v38 = vadd.f32 %v3588_v46, %v1297_v17  ;;  %v1349_v46 = vmul.f32 %v1348_v33, %v3168_v12  ;;  %v405_v17 = vstv %s3797_s28  ;;  %s3976_s28 = sld [smem:[#allocation2 + $0xb0]] }
 0x18f   :  { %324 = vrot.lane.b32.xlu1 %v320_v56, %s5225_s25  ;;  %352 = vrot.lane.b32.xlu0 %v350_v26, %s5223_s0  ;;  %v391_v56 = vmul.f32 %v389_v37, %v3159_v6  ;;  %v1330_v26 = vadd.f32 %v3566_v5, %v1314_v22  ;;  %v1329_v61 = vadd.f32 %v3604_v62, %v1313_v38  ;;  %v1353_v21 = vrot.slane %v1349_v46, 3 }
 0x190   :  { %v501_v62 = vmul.f32 %v499_v24, %v3159_v6  ;;  %v525_v22 = vstv %s3795_s26  ;;  %s3974_s26 = sld [smem:[#allocation2 + $0x47]] }
 0x191   :  { %v3782_v13 = vpop.permute.xlu1 %2101  ;;  %v3784_v43 = vpop.permute.xlu0 %1871  ;;  %v1346_v20 = vadd.f32 %v3582_v42, %v1330_v26  ;;  %v1345_v25 = vadd.f32 %v3620_v50, %v1329_v61  ;;  %v407_v26 = vmul.f32 %v405_v17, %v3159_v6 }
 0x193   :  { %492 = vrot.lane.b32.xlu1 %v487_v30, %s5223_s0  ;;  %490 = vrot.lane.b32.xlu0 %v486_v4, %s5223_s0  ;;  %v395_v30 = vrot.slane %v391_v56, 2  ;;  %v665_v4 = vstv %s3790_s24  ;;  %v1358_v42 = vadd.f32 %v1354_v19, %v1346_v20  ;;  %v1357_v50 = vadd.f32 %v1353_v21, %v1345_v25  ;;  %s3970_s24 = sld [smem:[#allocation2 + $0x3e]] }
 0x194   :  { %v527_v56 = vmul.f32 %v525_v22, %v3159_v6  ;;  %v543_v19 = vmul.f32 %v541_v44, %v3159_v6 }
 0x195   :  { %v3803_v16 = vpop.permute.xlu1 %1643  ;;  %v3805_v34 = vpop.permute.xlu0 %1673  ;;  %v1374_v61 = vadd.f32 %v3606_v60, %v1358_v42  ;;  %v1373_v46 = vadd.f32 %v3622_v18, %v1357_v50  ;;  %v411_v60 = vrot.slane %v407_v26, 2  ;;  %v1424_v50 = vstv %s3829_s4  ;;  %s3984_s4 = sld [smem:[#allocation2 + $0x37]] }
 0x196   :  { %v679_v26 = vstv %s3845_s5  ;;  %s3988_s5 = sld [smem:[#allocation2 + $0x49]] }
 0x197   :  { %370 = vrot.lane.b32.xlu1 %v367_v45, %s5225_s25  ;;  %368 = vrot.lane.b32.xlu0 %v366_v32, %s5225_s25  ;;  %v500_v45 = vmul.f32 %v499_v24, %v3168_v12  ;;  %v667_v32 = vmul.f32 %v665_v4, %v3159_v6  ;;  %v1390_v24 = vadd.f32 %v3644_v36, %v1374_v61 }
 0x198   :  { %v1389_v21 = vadd.f32 %v3661_v0, %v1373_v46  ;;  %v681_v46 = vmul.f32 %v679_v26, %v3159_v6 }
 0x199   :  { %v3819_v2 = vpop.permute.xlu1 %2099  ;;  %v3821_v5 = vpop.permute.xlu0 %2129  ;;  %v1406_v18 = vadd.f32 %v3683_v7, %v1390_v24  ;;  %v547_v7 = vrot.slane %v543_v19, 1  ;;  %v542_v24 = vmul.f32 %v541_v44, %v3168_v12 }
 0x19a   :  { %v1405_v36 = vadd.f32 %v3716_v51, %v1389_v21  ;;  %v666_v21 = vmul.f32 %v665_v4, %v3168_v12  ;;  %v5215_v4 = vstv %s3877_s9 }
 0x19b   :  { %506 = vrot.lane.b32.xlu1 %v501_v62, %s5225_s25  ;;  %398 = vrot.lane.b32.xlu0 %v395_v30, %s5223_s0  ;;  %v531_v62 = vrot.slane %v527_v56, 1  ;;  %v390_v30 = vmul.f32 %v389_v37, %v3168_v12  ;;  %v1422_v42 = vadd.f32 %v3740_v8, %v1406_v18  ;;  %v1438_v8 = vstv %s3851_s6  ;;  %s3990_s6 = sld [smem:[#allocation2 + $0x38]] }
 0x19c   :  { %v1421_v56 = vadd.f32 %v3772_v15, %v1405_v36  ;;  %v1430_v18 = vstv %s3868_s8  ;;  %v546_v44 = vrot.slane %v542_v24, 1  ;;  %s4003_s8 = sld [smem:[#allocation2 + $0xb5]] }
 0x19d   :  { %v3831_v33 = vpop.permute.xlu1 %1901  ;;  %v3833_v38 = vpop.permute.xlu0 %1689  ;;  %v394_v0 = vrot.slane %v390_v30, 2  ;;  %v1426_v51 = vadd.f32 %v1424_v50, %v1422_v42  ;;  %v1440_v30 = vmul.f32 %v1438_v8, %v3159_v6 }
 0x19f   :  { %504 = vrot.lane.b32.xlu1 %v500_v45, %s5225_s25  ;;  %672 = vrot.lane.b32.xlu0 %v667_v32, %s5223_s0  ;;  %v526_v32 = vmul.f32 %v525_v22, %v3168_v12  ;;  %v1428_v19 = vmax.f32 %v1426_v51, 0.0 }
 0x1a1   :  { %v3853_v20 = vpop.permute.xlu1 %1671  ;;  %v3855_v25 = vpop.permute.xlu0 %1917  ;;  %v530_v61 = vrot.slane %v526_v32, 1 }
 0x1a3   :  { %534 = vrot.lane.b32.xlu1 %v531_v62, %s5223_s0  ;;  %414 = vrot.lane.b32.xlu0 %v411_v60, %s5225_s25  ;;  %v1425_v62 = vadd.f32 %v1424_v50, %v1421_v56  ;;  %v5212_v60 = vstv %s3861_s7  ;;  %v406_v50 = vmul.f32 %v405_v17, %v3168_v12  ;;  %v1500_v56 = vstv %s3879_s10  ;;  %s4009_s10 = sld [smem:[#allocation2 + $0x41]] }
 0x1a4   :  { %v1439_v17 = vmul.f32 %v1438_v8, %v3168_v12 }
 0x1a5   :  { %v3870_v37 = vpop.permute.xlu1 %1899  ;;  %v3872_v45 = vpop.permute.xlu0 %2145  ;;  %v1427_v32 = vmax.f32 %v1425_v62, 0.0 }
 0x1a6   :  { %5248 = vst [vmem:[#allocation26_spill] sm:$0xff] %v3870_v37  ;;  %v1455_v8 = vadd.f32 %v3385_v29, %v1439_v17  ;;  %v5275_v37 = vld [vmem:[#allocation24_spill] sm:$0xff] }
 0x1a7   :  { %396 = vrot.lane.b32.xlu1 %v394_v0, %s5223_s0  ;;  %550 = vrot.lane.b32.xlu0 %v547_v7, %s5225_s25  ;;  %v435_v0 = vmul.f32 %v5212_v60, %v3159_v6  ;;  %v1456_v7 = vadd.f32 %v3407_v40, %v1440_v30  ;;  %v569_v40 = vstv %s3883_s11  ;;  %v410_v30 = vrot.slane %v406_v50, 2  ;;  %s4242_s11 = sld [smem:[#allocation2 + $0xbf]] }
 0x1a8   :  { %v1469_v29 = vadd.f32 %v3398_v35, %v1455_v8  ;;  %v571_v35 = vmul.f32 %v569_v40, %v3159_v6 }
 0x1a9   :  { %v3888_v22 = vpop.permute.xlu1 %2127  ;;  %v3890_v15 = vpop.permute.xlu0 %1705  ;;  %v1470_v51 = vadd.f32 %v3417_v47, %v1456_v7  ;;  %v439_v60 = vrot.slane %v435_v0, 3  ;;  %v680_v7 = vmul.f32 %v679_v26, %v3168_v12 }
 0x1ab   :  { %532 = vrot.lane.b32.xlu1 %v530_v61, %s5223_s0  ;;  %686 = vrot.lane.b32.xlu0 %v681_v46, %s5225_s25  ;;  %v1432_v61 = vmul.f32 %v1430_v18, %v1428_v19  ;;  %v1434_v46 = vstv %s3886_s12  ;;  %v1484_v47 = vadd.f32 %v3429_v53, %v1470_v51  ;;  %v1502_v19 = vmul.f32 %v1500_v56, %v3159_v6  ;;  %s4011_s12 = sld [smem:[#allocation2 + $0x4a]] }
 0x1ac   :  { %v1501_v51 = vmul.f32 %v1500_v56, %v3168_v12 }
 0x1ad   :  { %v3904_v36 = vpop.permute.xlu1 %1687  ;;  %v3906_v42 = vpop.permute.xlu0 %1933  ;;  %v1498_v53 = vadd.f32 %v3440_v59, %v1484_v47  ;;  %v1436_v50 = vadd.f32 %v1434_v46, %v1432_v61  ;;  %v1483_v59 = vadd.f32 %v3409_v41, %v1469_v29  ;;  %v1506_v17 = vrot.slane %v1502_v19, 1 }
 0x1ae   :  { %v575_v19 = vrot.slane %v571_v35, 2  ;;  %v5218_v35 = vstv %s3947_s20 }
 0x1af   :  { %670 = vrot.lane.b32.xlu1 %v666_v21, %s5223_s0  ;;  %548 = vrot.lane.b32.xlu0 %v546_v44, %s5225_s25  ;;  %v707_v21 = vmul.f32 %v5215_v4, %v3159_v6  ;;  %v1431_v44 = vmul.f32 %v1430_v18, %v1427_v32  ;;  %v1497_v41 = vadd.f32 %v3453_v3, %v1483_v59 }
 0x1b0   :  { %v1510_v56 = vadd.f32 %v1506_v17, %v1498_v53  ;;  %v1505_v53 = vrot.slane %v1501_v51, 1  ;;  %v5217_v17 = vstv %s3970_s24 }
 0x1b1   :  { %v3931_v24 = vpop.permute.xlu1 %1915  ;;  %v3933_v62 = vpop.permute.xlu0 %2161  ;;  %v711_v32 = vrot.slane %v707_v21, 1  ;;  %v1435_v61 = vadd.f32 %v1434_v46, %v1431_v44  ;;  %v1804_v46 = vstv %s3927_s16  ;;  %v2351_v21 = vrot.slane %v1436_v50, 7  ;;  %s4309_s16 = sld [smem:[#allocation2 + $0x44]] }
 0x1b2   :  { %5249 = vst [vmem:[#allocation27_spill] sm:$0xff] %v3931_v24  ;;  %v5214_v44 = vstv %s3938_s17  ;;  %v1526_v29 = vadd.f32 %v3564_v63, %v1510_v56  ;;  %v1509_v63 = vadd.f32 %v1505_v53, %v1497_v41 }
 0x1b3   :  { %412 = vrot.lane.b32.xlu1 %v410_v30, %s5225_s25  ;;  %442 = vrot.lane.b32.xlu0 %v439_v60, %s5223_s0  ;;  %v5213_v60 = vstv %s3914_s13  ;;  %v1742_v30 = vstv %s3918_s14  ;;  %v2352_v50 = vsel %vm1021_vm2, %v2351_v21, %v1435_v61  ;;  %v847_v21 = vmul.f32 %v5214_v44, %v3159_v6  ;;  %s4290_s14 = sld [smem:[#allocation2 + $0x4c]] }
 0x1b4   :  { %v451_v3 = vmul.f32 %v5213_v60, %v3159_v6  ;;  %v1542_v53 = vadd.f32 %v3554_v49, %v1526_v29  ;;  %v1525_v51 = vadd.f32 %v3580_v39, %v1509_v63 }
 0x1b5   :  { %v3959_v18 = vpop.permute.xlu1 %2143  ;;  %v3961_v0 = vpop.permute.xlu0 %1721 }
 0x1b7   :  { %684 = vrot.lane.b32.xlu1 %v680_v7, %s5225_s25  ;;  %714 = vrot.lane.b32.xlu0 %v711_v32, %s5223_s0  ;;  %v5216_v7 = vstv %s3945_s1  ;;  %v1576_v32 = vstv %s3943_s18  ;;  %s4319_s18 = sld [smem:[#allocation2 + $0xbc]] }
 0x1b8   :  { %v587_v41 = vmul.f32 %v5216_v7, %v3159_v6  ;;  %v1578_v7 = vmul.f32 %v1576_v32, %v3159_v6 }
 0x1b9   :  { %v3992_v8 = vpop.permute.xlu1 %1703  ;;  %v3994_v47 = vpop.permute.xlu0 %1949 }
 0x1ba   :  { %v591_v63 = vrot.slane %v587_v41, 2 }
 0x1bb   :  { %578 = vrot.lane.b32.xlu1 %v575_v19, %s5223_s0  ;;  %2353 = vrot.lane.b32.xlu0 %v2352_v50, %s3111_s19  ;;  %v455_v19 = vrot.slane %v451_v3, 3  ;;  %v5251_v50 = vstv %s3861_s7  ;;  %v4056_v3 = vmul.f32 %v1804_v46, %v3159_v6  ;;  %s4189_s7 = sld [smem:[#allocation2 + $0xbb]] }
 0x1bc   :  { %v434_v60 = vmul.f32 %v5251_v50, %v3168_v12  ;;  %v1541_v50 = vadd.f32 %v3596_v31, %v1525_v51  ;;  %v723_v31 = vmul.f32 %v5217_v17, %v3159_v6  ;;  %v1558_v51 = vadd.f32 %v3574_v27, %v1542_v53 }
 0x1bd   :  { %v4016_v61 = vpop.permute.xlu1 %1931  ;;  %v4018_v56 = vpop.permute.xlu0 %2177  ;;  %v1744_v27 = vmul.f32 %v1742_v30, %v3159_v6  ;;  %v4068_v53 = vmul.f32 %v1804_v46, %v3168_v12  ;;  %v1810_v59 = vrot.slane %v4056_v3, 1 }
 0x1be   :  { %5250 = vst [vmem:[#allocation28_spill] sm:$0xff] %v4016_v61  ;;  %v438_v29 = vrot.slane %v434_v60, 3  ;;  %v1577_v60 = vmul.f32 %v1576_v32, %v3168_v12  ;;  %v1743_v32 = vmul.f32 %v1742_v30, %v3168_v12  ;;  %v727_v4 = vrot.slane %v723_v31, 1 }
 0x1bf   :  { %852 = vrot.lane.b32.xlu1 %v847_v21, %s5223_s0  ;;  %458 = vrot.lane.b32.xlu0 %v455_v19, %s5225_s25  ;;  %v570_v21 = vmul.f32 %v569_v40, %v3168_v12  ;;  %v1557_v19 = vadd.f32 %v3612_v10, %v1541_v50  ;;  %v1574_v10 = vadd.f32 %v3590_v57, %v1558_v51  ;;  %v5254_v40 = vstv %s3877_s9  ;;  %s4233_s9 = sld [smem:[#allocation2 + $0x43]] }
 0x1c0   :  { %v4073_v50 = vmul.f32 %v5218_v35, %v3159_v6  ;;  %v706_v57 = vmul.f32 %v5254_v40, %v3168_v12  ;;  %v5255_v51 = vstv %s3920_s15  ;;  %v1582_v35 = vrot.slane %v1578_v7, 2  ;;  %v5258_v40 = vld [vmem:[#allocation16_spill] sm:$0xff]  ;;  %s4307_s15 = sld [smem:[#allocation2 + $0x21]] }
 0x1c1   :  { %v4041_v49 = vpop.permute.xlu1 %2159  ;;  %v4043_v39 = vpop.permute.xlu0 %1947  ;;  %v574_v41 = vrot.slane %v570_v21, 2  ;;  %v2047_v46 = vmul.f32 %v5255_v51, %v3168_v12  ;;  %v5256_v26 = vmov %v5255_v51  ;;  %v1573_v17 = vadd.f32 %v3598_v52, %v1557_v19 }
 0x1c2   :  { %5252 = vst [vmem:[#allocation29_spill] sm:$0xff] %v4043_v39  ;;  %v2048_v44 = vmul.f32 %v5256_v26, %v3159_v6  ;;  %v1760_v30 = vadd.f32 %v3419_v48, %v1744_v27  ;;  %v1581_v21 = vrot.slane %v1577_v60, 2  ;;  %v5257_v31 = vstv %s3949_s21  ;;  %v5259_v48 = vld [vmem:[#allocation8_spill] sm:$0xff] }
 0x1c3   :  { %440 = vrot.lane.b32.xlu1 %v438_v29, %s5223_s0  ;;  %594 = vrot.lane.b32.xlu0 %v591_v63, %s5225_s25  ;;  %v1586_v52 = vadd.f32 %v1582_v35, %v1574_v10  ;;  %v1658_v19 = vrot.slane %v4073_v50, 3  ;;  %v710_v51 = vrot.slane %v706_v57, 1  ;;  %v5264_v10 = vld [vmem:[#allocation19_spill] sm:$0xff]  ;;  %v5265_v50 = vstv %s3955_s22 }
 0x1c4   :  { %v2064_v26 = vadd.f32 %v5258_v40, %v2048_v44  ;;  %v1774_v3 = vadd.f32 %v5259_v48, %v1760_v30  ;;  %v5263_v40 = vld [vmem:[#allocation17_spill] sm:$0xff]  ;;  %v1585_v39 = vadd.f32 %v1581_v21, %v1573_v17  ;;  %v4118_v61 = vmul.f32 %v5265_v50, %v3159_v6  ;;  %v5270_v21 = vld [vmem:[#allocation20_spill] sm:$0xff] }
 0x1c5   :  { %v4078_v29 = vpop.permute.xlu1 %1719  ;;  %v4080_v63 = vpop.permute.xlu0 %1977  ;;  %v1602_v7 = vadd.f32 %v5264_v10, %v1586_v52  ;;  %v5266_v30 = vld [vmem:[#allocation9_spill] sm:$0xff]  ;;  %v5267_v57 = vstv %s3947_s20  ;;  %v5269_v52 = vld [vmem:[#allocation12_spill] sm:$0xff]  ;;  %s4328_s20 = sld [smem:[#allocation2 + $0x4d]] }
 0x1c6   :  { %5253 = vst [vmem:[#allocation30_spill] sm:$0xff] %v4080_v63  ;;  %v2110_v63 = vmul.f32 %v5257_v31, %v3159_v6  ;;  %v2078_v35 = vadd.f32 %v5263_v40, %v2064_v26  ;;  %v1788_v48 = vadd.f32 %v5266_v30, %v1774_v3  ;;  %v1653_v24 = vmul.f32 %v5267_v57, %v3168_v12  ;;  %v5271_v40 = vld [vmem:[#allocation22_spill] sm:$0xff]  ;;  %v5273_v30 = vld [vmem:[#allocation11_spill] sm:$0xff] }
 0x1c7   :  { %576 = vrot.lane.b32.xlu1 %v574_v41, %s5223_s0  ;;  %730 = vrot.lane.b32.xlu0 %v727_v4, %s5225_s25  ;;  %v5261_v41 = vstv %s3974_s26  ;;  %v5262_v4 = vstv %s3945_s1  ;;  %v2063_v17 = vadd.f32 %v5269_v52, %v2047_v46  ;;  %v1618_v10 = vadd.f32 %v5271_v40, %v1602_v7  ;;  %s4324_s1 = sld [smem:[#allocation2 + $0x4f]] }
 0x1c8   :  { %v861_v31 = vmul.f32 %v5261_v41, %v3159_v6  ;;  %v586_v44 = vmul.f32 %v5262_v4, %v3168_v12  ;;  %v5268_v26 = vstv %s3938_s17  ;;  %v1601_v4 = vadd.f32 %v5270_v21, %v1585_v39  ;;  %s4315_s17 = sld [smem:[#allocation2 + $0x24]] }
 0x1c9   :  { %v4103_v60 = vpop.permute.xlu1 %2175  ;;  %v4105_v27 = vpop.permute.xlu0 %1975  ;;  %v846_v41 = vmul.f32 %v5268_v26, %v3168_v12  ;;  %v2092_v3 = vadd.f32 %v3727_v14, %v2078_v35  ;;  %v1759_v57 = vadd.f32 %v5273_v30, %v1743_v32  ;;  %v5274_v46 = vstv %s3914_s13  ;;  %s4262_s13 = sld [smem:[#allocation2 + $0xc3]] }
 0x1ca   :  { %5260 = vst [vmem:[#allocation16_spill] sm:$0xff] %v4105_v27  ;;  %v2114_v27 = vrot.slane %v2110_v63, 1  ;;  %v5272_v63 = vld [vmem:[#allocation10_spill] sm:$0xff]  ;;  %v590_v26 = vrot.slane %v586_v44, 2  ;;  %v450_v52 = vmul.f32 %v5274_v46, %v3168_v12  ;;  %v1617_v39 = vadd.f32 %v5275_v37, %v1601_v4 }
 0x1cb   :  { %712 = vrot.lane.b32.xlu1 %v710_v51, %s5223_s0  ;;  %866 = vrot.lane.b32.xlu0 %v861_v31, %s5225_s25  ;;  %v1802_v50 = vadd.f32 %v5272_v63, %v1788_v48  ;;  %v1634_v7 = vadd.f32 %v3699_v54, %v1618_v10  ;;  %v2077_v14 = vadd.f32 %v3701_v1, %v2063_v17  ;;  %v5276_v48 = vld [vmem:[#allocation13_spill] sm:$0xff]  ;;  %v1886_v21 = vrot.slane %v4118_v61, 2  ;;  %v5280_v10 = vld [vmem:[#allocation14_spill] sm:$0xff] }
 0x1cc   :  { %v2106_v35 = vadd.f32 %v3782_v13, %v2092_v3  ;;  %v1773_v32 = vadd.f32 %v5276_v48, %v1759_v57  ;;  %v5277_v40 = vstv %s3949_s21  ;;  %v5278_v37 = vstv %s3974_s26  ;;  %v5283_v48 = vld [vmem:[#allocation15_spill] sm:$0xff]  ;;  %s4337_s21 = sld [smem:[#allocation2 + $0x50]]  ;;  %s4370_s26 = sld [smem:[#allocation2 + $0x27]] }
 0x1cd   :  { %v4135_v51 = vpop.permute.xlu1 %2205  ;;  %v4137_v31 = vpop.permute.xlu0 %2203  ;;  %v2109_v63 = vmul.f32 %v5277_v40, %v3168_v12  ;;  %v860_v54 = vmul.f32 %v5278_v37, %v3168_v12  ;;  %v1633_v1 = vadd.f32 %v3729_v55, %v1617_v39  ;;  %v1650_v13 = vadd.f32 %v3755_v28, %v1634_v7 }
 0x1ce   :  { %v2091_v44 = vadd.f32 %v3757_v11, %v2077_v14  ;;  %v5279_v17 = vstv %s3970_s24  ;;  %v1787_v3 = vadd.f32 %v5280_v10, %v1773_v32  ;;  %v1814_v30 = vadd.f32 %v1810_v59, %v1802_v50  ;;  %v5284_v50 = vld [vmem:[#allocation18_spill] sm:$0xff]  ;;  %s4365_s24 = sld [smem:[#allocation2 + $0xc4]] }
 0x1cf   :  { %850 = vrot.lane.b32.xlu1 %v846_v41, %s5223_s0  ;;  %592 = vrot.lane.b32.xlu0 %v590_v26, %s5225_s25  ;;  %v722_v4 = vmul.f32 %v5279_v17, %v3168_v12  ;;  %v454_v26 = vrot.slane %v450_v52, 3  ;;  %v5281_v46 = vstv %s3982_s30  ;;  %v1649_v28 = vadd.f32 %v3803_v16, %v1633_v1 }
 0x1d0   :  { %v751_v55 = vmul.f32 %v5281_v46, %v3159_v6  ;;  %v2105_v11 = vadd.f32 %v3819_v2, %v2091_v44  ;;  %v2118_v39 = vadd.f32 %v2114_v27, %v2106_v35  ;;  %v5282_v7 = vstv %s3955_s22  ;;  %v5287_v44 = vld [vmem:[#allocation23_spill] sm:$0xff]  ;;  %s4340_s22 = sld [smem:[#allocation2 + $0xbd]] }
 0x1d1   :  { %v4163_v41 = vpop.permute.xlu1 %1993  ;;  %v4165_v57 = vpop.permute.xlu0 %1991  ;;  %v4175_v14 = vmul.f32 %v5282_v7, %v3168_v12  ;;  %v1801_v59 = vadd.f32 %v5283_v48, %v1787_v3  ;;  %v1830_v32 = vadd.f32 %v5284_v50, %v1814_v30  ;;  %v1657_v40 = vrot.slane %v1653_v24, 3 }
 0x1d2   :  { %v5285_v52 = vstv %s3984_s4  ;;  %v1662_v37 = vadd.f32 %v1658_v19, %v1650_v13  ;;  %v2134_v2 = vadd.f32 %v3821_v5, %v2118_v39  ;;  %v2113_v27 = vrot.slane %v2109_v63, 1  ;;  %s4393_s4 = sld [smem:[#allocation2 + $0x2d]] }
 0x1d3   :  { %456 = vrot.lane.b32.xlu1 %v454_v26, %s5225_s25  ;;  %864 = vrot.lane.b32.xlu0 %v860_v54, %s5225_s25  ;;  %v615_v16 = vmul.f32 %v5285_v52, %v3159_v6  ;;  %v5286_v35 = vstv %s3976_s28  ;;  %v1846_v17 = vadd.f32 %v5287_v44, %v1830_v32  ;;  %v726_v54 = vrot.slane %v722_v4, 1  ;;  %s4374_s28 = sld [smem:[#allocation2 + $0xc1]] }
 0x1d4   :  { %v2186_v1 = vmul.f32 %v5286_v35, %v3159_v6  ;;  %v755_v3 = vrot.slane %v751_v55, 2  ;;  %v5288_v30 = vmov %v5285_v52  ;;  %v1678_v5 = vadd.f32 %v3805_v34, %v1662_v37 }
 0x1d5   :  { %v4191_v24 = vpop.permute.xlu1 %2221  ;;  %v4193_v10 = vpop.permute.xlu0 %2219  ;;  %v614_v19 = vmul.f32 %v5288_v30, %v3168_v12  ;;  %v1661_v63 = vadd.f32 %v1657_v40, %v1649_v28  ;;  %v2150_v13 = vadd.f32 %v3872_v45, %v2134_v2  ;;  %v2117_v26 = vadd.f32 %v2113_v27, %v2105_v11  ;;  %v5291_v11 = vld [vmem:[#allocation21_spill] sm:$0xff] }
 0x1d6   :  { %v5289_v46 = vrot.slane %v4068_v53, 1  ;;  %v1862_v7 = vadd.f32 %v3714_v9, %v1846_v17  ;;  %v619_v4 = vrot.slane %v615_v16, 3  ;;  %v5290_v55 = vstv %s3988_s5  ;;  %s4406_s5 = sld [smem:[#allocation2 + $0x30]] }
 0x1d7   :  { %728 = vrot.lane.b32.xlu1 %v726_v54, %s5225_s25  ;;  %758 = vrot.lane.b32.xlu0 %v755_v3, %s5223_s0  ;;  %v887_v48 = vmul.f32 %v5290_v55, %v3159_v6  ;;  %v1694_v34 = vadd.f32 %v3833_v38, %v1678_v5  ;;  %v1677_v45 = vadd.f32 %v3853_v20, %v1661_v63  ;;  %v618_v40 = vrot.slane %v614_v19, 3 }
 0x1d8   :  { %v1813_v39 = vadd.f32 %v5289_v46, %v1801_v59  ;;  %v2133_v28 = vadd.f32 %v3888_v22, %v2117_v26  ;;  %v2166_v53 = vadd.f32 %v3933_v62, %v2150_v13  ;;  %v1878_v59 = vadd.f32 %v3770_v58, %v1862_v7 }
 0x1d9   :  { %v4214_v50 = vpop.permute.xlu1 %2009  ;;  %v4216_v32 = vpop.permute.xlu0 %2007  ;;  %v5292_v52 = vstv %s3982_s30  ;;  %v1710_v38 = vadd.f32 %v3890_v15, %v1694_v34  ;;  %v1693_v20 = vadd.f32 %v3904_v36, %v1677_v45  ;;  %v2190_v37 = vrot.slane %v2186_v1, 2  ;;  %v5295_v36 = vld [vmem:[#allocation25_spill] sm:$0xff]  ;;  %s4384_s30 = sld [smem:[#allocation2 + $0xc5]] }
 0x1da   :  { %v1829_v9 = vadd.f32 %v5291_v11, %v1813_v39  ;;  %v750_v16 = vmul.f32 %v5292_v52, %v3168_v12  ;;  %v2149_v22 = vadd.f32 %v3959_v18, %v2133_v28  ;;  %v2182_v62 = vadd.f32 %v4018_v56, %v2166_v53 }
 0x1db   :  { %v5293_v58 = vmov %v5286_v35  ;;  %622 = vrot.lane.b32.xlu1 %v619_v4, %s5223_s0  ;;  %620 = vrot.lane.b32.xlu0 %v618_v40, %s5223_s0  ;;  %v891_v27 = vrot.slane %v887_v48, 1  ;;  %v5294_v35 = vstv %s3990_s6  ;;  %v1726_v18 = vadd.f32 %v3961_v0, %v1710_v38  ;;  %s4427_s6 = sld [smem:[#allocation2 + $0x39]] }
 0x1dc   :  { %v2185_v2 = vmul.f32 %v5293_v58, %v3168_v12  ;;  %v631_v15 = vmul.f32 %v5294_v35, %v3159_v6  ;;  %v1845_v44 = vadd.f32 %v5295_v36, %v1829_v9  ;;  %v1709_v56 = vadd.f32 %v3992_v8, %v1693_v20  ;;  %v5304_v36 = vld [vmem:[#allocation26_spill] sm:$0xff] }
 0x1dd   :  { %v2165_v1 = vadd.f32 %v4041_v49, %v2149_v22  ;;  %v1890_v17 = vadd.f32 %v1886_v21, %v1878_v59  ;;  %v1728_v54 = vstv %s4189_s7  ;;  %v2238_v3 = vpop.permute.xlu1 %2237  ;;  %v4244_v30 = vpop.permute.xlu0 %2235  ;;  %v754_v19 = vrot.slane %v750_v16, 2  ;;  %s4459_s7 = sld [smem:[#allocation2 + $0x3f]] }
 0x1de   :  { %v5296_v5 = vmov %v5290_v55  ;;  %v1861_v0 = vadd.f32 %v3742_v23, %v1845_v44  ;;  %v1725_v13 = vadd.f32 %v4078_v29, %v1709_v56  ;;  %v2194_v49 = vadd.f32 %v2190_v37, %v2182_v62 }
 0x1df   :  { %v886_v63 = vmul.f32 %v5296_v5, %v3168_v12  ;;  %v2181_v8 = vadd.f32 %v4103_v60, %v2165_v1  ;;  %v1906_v61 = vadd.f32 %v3831_v33, %v1890_v17  ;;  %v1885_v21 = vrot.slane %v4175_v14, 2  ;;  %894 = vrot.lane.b32.xlu1 %v891_v27, %s5223_s0  ;;  %756 = vrot.lane.b32.xlu0 %v754_v19, %s5223_s0 }
 0x1e0   :  { %v5297_v26 = vstv %s3957_s23  ;;  %v2189_v39 = vrot.slane %v2185_v2, 2  ;;  %v1877_v23 = vadd.f32 %v3784_v43, %v1861_v0  ;;  %v1730_v29 = vadd.f32 %v1728_v54, %v1726_v18  ;;  %s4349_s23 = sld [smem:[#allocation2 + $0xc0]] }
 0x1e1   :  { %v1958_v46 = vmul.f32 %v5297_v26, %v3159_v6  ;;  %v2210_v60 = vadd.f32 %v4135_v51, %v2194_v49  ;;  %v635_v7 = vrot.slane %v631_v15, 3  ;;  %v1922_v33 = vadd.f32 %v3855_v25, %v1906_v61  ;;  %v4264_v14 = vpop.permute.xlu1 %2025  ;;  %v4266_v4 = vpop.permute.xlu0 %2023 }
 0x1e2   :  { %v890_v55 = vrot.slane %v886_v63, 1  ;;  %v5298_v48 = vstv %s4009_s10  ;;  %v5299_v43 = vmov %v5294_v35  ;;  %v1729_v45 = vadd.f32 %v1728_v54, %v1725_v13  ;;  %v5307_v63 = vld [vmem:[#allocation27_spill] sm:$0xff]  ;;  %s4451_s10 = sld [smem:[#allocation2 + $0x33]] }
 0x1e3   :  { %v767_v34 = vmul.f32 %v5298_v48, %v3159_v6  ;;  %v630_v51 = vmul.f32 %v5299_v43, %v3168_v12  ;;  %v5300_v28 = vmov %v5297_v26  ;;  %v2193_v53 = vadd.f32 %v2189_v39, %v2181_v8  ;;  %638 = vrot.lane.b32.xlu1 %v635_v7, %s5225_s25  ;;  %v5310_v43 = vld [vmem:[#allocation30_spill] sm:$0xff] }
 0x1e4   :  { %v4277_v25 = vmul.f32 %v5300_v28, %v3168_v12  ;;  %v2226_v11 = vadd.f32 %v4191_v24, %v2210_v60  ;;  %v1938_v9 = vadd.f32 %v3906_v42, %v1922_v33  ;;  %892 = vrot.lane.b32.xlu0 %v890_v55, %s5223_s0  ;;  %v5301_v59 = vstv %s4003_s8  ;;  %s4449_s8 = sld [smem:[#allocation2 + $0x3c]] }
 0x1e5   :  { %v2262_v40 = vmul.f32 %v5301_v59, %v3159_v6  ;;  %v5302_v52 = vstv %s4011_s12  ;;  %v793_v38 = vstv %s4233_s9  ;;  %v1889_v20 = vadd.f32 %v1885_v21, %v1877_v23  ;;  %v2254_v2 = vpop.permute.xlu1 %2253  ;;  %v2282_v27 = vpop.permute.xlu0 %2281  ;;  %v5308_v23 = vld [vmem:[#allocation28_spill] sm:$0xff]  ;;  %s4453_s12 = sld [smem:[#allocation2 + $0x45]]  ;;  %s4461_s9 = sld [smem:[#allocation2 + $0x36]] }
 0x1e6   :  { %v903_v16 = vmul.f32 %v5302_v52, %v3159_v6  ;;  %v1732_v22 = vmax.f32 %v1730_v29, 0.0  ;;  %v2242_v62 = vadd.f32 %v2238_v3, %v2226_v11  ;;  %v5303_v24 = vmov %v5302_v52 }
 0x1e7   :  { %v902_v42 = vmul.f32 %v5303_v24, %v3168_v12  ;;  %v1734_v37 = vstv %s4242_s11  ;;  %v1954_v58 = vadd.f32 %v3994_v47, %v1938_v9  ;;  %v771_v35 = vrot.slane %v767_v34, 2  ;;  %s4463_s11 = sld [smem:[#allocation2 + $0x48]] }
 0x1e8   :  { %v634_v15 = vrot.slane %v630_v51, 3  ;;  %v1905_v44 = vadd.f32 %v5304_v36, %v1889_v20  ;;  %v1731_v18 = vmax.f32 %v1729_v45, 0.0  ;;  %v2209_v56 = vadd.f32 %v4137_v31, %v2193_v53 }
 0x1e9   :  { %v2258_v1 = vadd.f32 %v2254_v2, %v2242_v62  ;;  %v1962_v17 = vrot.slane %v1958_v46, 3  ;;  %v2266_v54 = vrot.slane %v2262_v40, 3  ;;  %774 = vrot.lane.b32.xlu1 %v771_v35, %s5225_s25  ;;  %v5305_v3 = vmov %v5301_v59  ;;  %v2252_v21 = vpop.permute.xlu1 %2251  ;;  %v2298_v26 = vpop.permute.xlu0 %2297 }
 0x1ea   :  { %636 = vrot.lane.b32.xlu0 %v634_v15, %s5225_s25  ;;  %v2261_v47 = vmul.f32 %v5305_v3, %v3168_v12  ;;  %v5306_v19 = vmov %v5298_v48  ;;  %v1921_v0 = vadd.f32 %v5307_v63, %v1905_v44  ;;  %v1736_v31 = vmul.f32 %v1734_v37, %v1732_v22  ;;  %v5309_v48 = vld [vmem:[#allocation29_spill] sm:$0xff]  ;;  %v5311_v15 = vld [vmem:[#allocation16_spill] sm:$0xff] }
 0x1eb   :  { %v766_v5 = vmul.f32 %v5306_v19, %v3168_v12  ;;  %v2225_v13 = vadd.f32 %v4193_v10, %v2209_v56  ;;  %v907_v8 = vrot.slane %v903_v16, 1  ;;  %v1738_v49 = vstv %s4262_s13  ;;  %s4465_s13 = sld [smem:[#allocation2 + $0x42]] }
 0x1ec   :  { %v1966_v61 = vadd.f32 %v1962_v17, %v1954_v58  ;;  %v906_v46 = vrot.slane %v902_v42, 1  ;;  %v795_v39 = vmul.f32 %v793_v38, %v3159_v6  ;;  %v1937_v29 = vadd.f32 %v5308_v23, %v1921_v0 }
 0x1ed   :  { %v1735_v60 = vmul.f32 %v1734_v37, %v1731_v18  ;;  %v2241_v7 = vadd.f32 %v4244_v30, %v2225_v13  ;;  %v2270_v33 = vadd.f32 %v2266_v54, %v2258_v1  ;;  %910 = vrot.lane.b32.xlu1 %v907_v8, %s5225_s25  ;;  %v929_v10 = vstv %s4290_s14  ;;  %v2280_v28 = vpop.permute.xlu1 %2279  ;;  %v2314_v53 = vpop.permute.xlu0 %2313  ;;  %s4467_s14 = sld [smem:[#allocation2 + $0x4b]] }
 0x1ee   :  { %908 = vrot.lane.b32.xlu0 %v906_v46, %s5225_s25  ;;  %v1740_v55 = vadd.f32 %v1738_v49, %v1736_v31  ;;  %v1953_v34 = vadd.f32 %v5309_v48, %v1937_v29  ;;  %v1982_v51 = vadd.f32 %v5310_v43, %v1966_v61  ;;  %v1961_v30 = vrot.slane %v4277_v25, 3 }
 0x1ef   :  { %v2257_v45 = vadd.f32 %v2252_v21, %v2241_v7  ;;  %v770_v11 = vrot.slane %v766_v5, 2  ;;  %v799_v9 = vrot.slane %v795_v39, 3  ;;  %v794_v59 = vmul.f32 %v793_v38, %v3168_v12 }
 0x1f0   :  { %v1998_v40 = vadd.f32 %v4163_v41, %v1982_v51  ;;  %v2286_v52 = vadd.f32 %v2282_v27, %v2270_v33  ;;  %v2265_v16 = vrot.slane %v2261_v47, 3  ;;  %v1739_v20 = vadd.f32 %v1738_v49, %v1735_v60 }
 0x1f1   :  { %772 = vrot.lane.b32.xlu1 %v770_v11, %s5225_s25  ;;  %v299_v22 = vstv %s4307_s15  ;;  %v809_v62 = vstv %s4309_s16  ;;  %v1965_v25 = vadd.f32 %v1961_v30, %v1953_v34  ;;  %v2396_v38 = vrot.slane %v1740_v55, 7  ;;  %v2296_v37 = vpop.permute.xlu1 %2295  ;;  %v2330_v41 = vpop.permute.xlu0 %2329  ;;  %s4469_s15 = sld [smem:[#allocation2 + $0x4e]]  ;;  %s4471_s16 = sld [smem:[#allocation2]] }
 0x1f2   :  { %802 = vrot.lane.b32.xlu0 %v799_v9, %s5223_s0  ;;  %v2014_v24 = vadd.f32 %v4214_v50, %v1998_v40  ;;  %v2269_v42 = vadd.f32 %v2265_v16, %v2257_v45  ;;  %v798_v58 = vrot.slane %v794_v59, 3  ;;  %v930_v2 = vmul.f32 %v929_v10, %v3168_v12 }
 0x1f3   :  { %v931_v27 = vmul.f32 %v929_v10, %v3159_v6  ;;  %v333_v35 = vstv %s4315_s17  ;;  %v1981_v36 = vadd.f32 %v5311_v15, %v1965_v25  ;;  %v2302_v50 = vadd.f32 %v2298_v26, %v2286_v52  ;;  %s4473_s17 = sld [smem:[#allocation2 + $0x1]] }
 0x1f4   :  { %v2030_v44 = vadd.f32 %v4264_v14, %v2014_v24  ;;  %v2397_v18 = vsel %vm1021_vm2, %v2396_v38, %v1739_v20  ;;  %v2032_v56 = vstv %s4319_s18  ;;  %v810_v1 = vmul.f32 %v809_v62, %v3168_v12  ;;  %s4479_s18 = sld [smem:[#allocation2 + $0xc8]] }
 0x1f5   :  { %2398 = vrot.lane.b32.xlu1 %v2397_v18, %s3111_s19  ;;  %v973_v17 = vstv %s4324_s1  ;;  %v1997_v54 = vadd.f32 %v4165_v57, %v1981_v36  ;;  %v2285_v3 = vadd.f32 %v2280_v28, %v2269_v42  ;;  %v301_v14 = vmul.f32 %v299_v22, %v3159_v6  ;;  %v2312_v19 = vpop.permute.xlu1 %2311  ;;  %v313_v5 = vpop.permute.xlu0 %312  ;;  %s4481_s1 = sld [smem:[#allocation2 + $0xc7]] }
 0x1f6   :  { %800 = vrot.lane.b32.xlu0 %v798_v58, %s5223_s0  ;;  %v945_v47 = vstv %s4328_s20  ;;  %v934_v63 = vrot.slane %v930_v2, 2  ;;  %v935_v0 = vrot.slane %v931_v27, 2  ;;  %v811_v31 = vmul.f32 %v809_v62, %v3159_v6  ;;  %s4483_s20 = sld [smem:[#allocation2 + $0x2]] }
 0x1f7   :  { %v335_v13 = vmul.f32 %v333_v35, %v3159_v6  ;;  %v2013_v8 = vadd.f32 %v4216_v32, %v1997_v54  ;;  %v2034_v49 = vadd.f32 %v2032_v56, %v2030_v44  ;;  %v2318_v57 = vadd.f32 %v2314_v53, %v2302_v50 }
 0x1f8   :  { %v2301_v61 = vadd.f32 %v2296_v37, %v2285_v3  ;;  %v814_v21 = vrot.slane %v810_v1, 3  ;;  %v989_v26 = vstv %s4337_s21  ;;  %v317_v32 = vadd.f32 %v313_v5, %v301_v14  ;;  %s4485_s21 = sld [smem:[#allocation2 + $0x3]] }
 0x1f9   :  { %938 = vrot.lane.b32.xlu1 %v935_v0, %s5223_s0  ;;  %v2029_v46 = vadd.f32 %v4266_v4, %v2013_v8  ;;  %v2334_v39 = vadd.f32 %v2330_v41, %v2318_v57  ;;  %v2336_v29 = vstv %s4340_s22  ;;  %v2328_v60 = vpop.permute.xlu1 %2327  ;;  %v327_v7 = vpop.permute.xlu0 %326  ;;  %v815_v33 = vrot.slane %v811_v31, 3  ;;  %s4487_s22 = sld [smem:[#allocation2 + $0x4]] }
 0x1fa   :  { %936 = vrot.lane.b32.xlu0 %v934_v63, %s5223_s0  ;;  %v2317_v23 = vadd.f32 %v2312_v19, %v2301_v61  ;;  %v975_v10 = vmul.f32 %v973_v17, %v3159_v6  ;;  %v947_v55 = vmul.f32 %v945_v47, %v3159_v6  ;;  %v2036_v48 = vmax.f32 %v2034_v49, 0.0 }
 0x1fb   :  { %v331_v43 = vadd.f32 %v327_v7, %v317_v32  ;;  %v339_v51 = vrot.slane %v335_v13, 1  ;;  %v2038_v4 = vstv %s4349_s23  ;;  %v2033_v45 = vadd.f32 %v2032_v56, %v2029_v46  ;;  %s4489_s23 = sld [smem:[#allocation2 + $0x5]] }
 0x1fc   :  { %v2333_v34 = vadd.f32 %v2328_v60, %v2317_v23  ;;  %v2338_v30 = vadd.f32 %v2336_v29, %v2334_v39  ;;  %v991_v53 = vmul.f32 %v989_v26, %v3159_v6  ;;  %v300_v9 = vmul.f32 %v299_v22, %v3168_v12 }
 0x1fd   :  { %818 = vrot.lane.b32.xlu1 %v815_v33, %s5225_s25  ;;  %v343_v28 = vadd.f32 %v339_v51, %v331_v43  ;;  %v311_v11 = vpop.permute.xlu1 %310  ;;  %v355_v59 = vpop.permute.xlu0 %354  ;;  %v979_v40 = vrot.slane %v975_v10, 3  ;;  %v951_v52 = vrot.slane %v947_v55, 2  ;;  %v946_v16 = vmul.f32 %v945_v47, %v3168_v12 }
 0x1fe   :  { %816 = vrot.lane.b32.xlu0 %v814_v21, %s5225_s25  ;;  %v2040_v20 = vmul.f32 %v2038_v4, %v2036_v48  ;;  %v2337_v62 = vadd.f32 %v2336_v29, %v2333_v34  ;;  %v334_v24 = vmul.f32 %v333_v35, %v3168_v12  ;;  %v2042_v42 = vstv %s4365_s24  ;;  %s4491_s24 = sld [smem:[#allocation2 + $0x6]] }
 0x1ff   :  { %v359_v25 = vadd.f32 %v355_v59, %v343_v28  ;;  %v377_v22 = vstv %s4370_s26  ;;  %v2035_v38 = vmax.f32 %v2033_v45, 0.0  ;;  %v2340_v37 = vmax.f32 %v2338_v30, 0.0  ;;  %s4556_s26 = sld [smem:[#allocation2 + $0x51]] }
 0x200   :  { %v316_v41 = vadd.f32 %v311_v11, %v300_v9  ;;  %v995_v58 = vrot.slane %v991_v53, 3  ;;  %v2342_v2 = vstv %s4374_s28  ;;  %v950_v36 = vrot.slane %v946_v16, 2  ;;  %s4493_s28 = sld [smem:[#allocation2 + $0x7]] }
 0x201   :  { %954 = vrot.lane.b32.xlu1 %v951_v52, %s5225_s25  ;;  %v325_v27 = vpop.permute.xlu1 %324  ;;  %v353_v15 = vpop.permute.xlu0 %352  ;;  %v974_v35 = vmul.f32 %v973_v17, %v3168_v12  ;;  %v990_v44 = vmul.f32 %v989_v26, %v3168_v12  ;;  %v2044_v50 = vadd.f32 %v2042_v42, %v2040_v20  ;;  %v2339_v18 = vmax.f32 %v2337_v62, 0.0 }
 0x202   :  { %982 = vrot.lane.b32.xlu0 %v979_v40, %s5223_s0  ;;  %v330_v56 = vadd.f32 %v325_v27, %v316_v41  ;;  %v338_v1 = vrot.slane %v334_v24, 1  ;;  %v2039_v54 = vmul.f32 %v2038_v4, %v2035_v38  ;;  %v2344_v3 = vmul.f32 %v2342_v2, %v2340_v37 }
 0x203   :  { %v2346_v47 = vstv %s4384_s30  ;;  %v978_v5 = vrot.slane %v974_v35, 3  ;;  %v994_v63 = vrot.slane %v990_v44, 3  ;;  %v379_v0 = vmul.f32 %v377_v22, %v3159_v6  ;;  %s4499_s30 = sld [smem:[#allocation2 + $0xca]] }
 0x204   :  { %v342_v14 = vadd.f32 %v338_v1, %v330_v56  ;;  %v2343_v31 = vmul.f32 %v2342_v2, %v2339_v18  ;;  %v479_v8 = vstv %s4393_s4  ;;  %v2441_v49 = vrot.slane %v2044_v50, 7  ;;  %s4501_s4 = sld [smem:[#allocation2 + $0xc9]] }
 0x205   :  { %952 = vrot.lane.b32.xlu1 %v950_v36, %s5225_s25  ;;  %v493_v19 = vpop.permute.xlu1 %492  ;;  %v491_v17 = vpop.permute.xlu0 %490  ;;  %v2348_v57 = vadd.f32 %v2346_v47, %v2344_v3  ;;  %v2043_v61 = vadd.f32 %v2042_v42, %v2039_v54  ;;  %v481_v21 = vmul.f32 %v479_v8, %v3159_v6  ;;  %v383_v39 = vrot.slane %v379_v0, 2 }
 0x206   :  { %998 = vrot.lane.b32.xlu0 %v995_v58, %s5225_s25  ;;  %v358_v13 = vadd.f32 %v353_v15, %v342_v14  ;;  %v2347_v23 = vadd.f32 %v2346_v47, %v2343_v31  ;;  %v513_v7 = vstv %s4406_s5  ;;  %v480_v48 = vmul.f32 %v479_v8, %v3168_v12  ;;  %s5315_s5 = smov 124  }
 0x207   :  { %v2442_v60 = vsel %vm1021_vm2, %v2441_v49, %v2043_v61  ;;  %v2486_v33 = vrot.slane %v2348_v57, 7  ;;  %v497_v10 = vadd.f32 %v493_v19, %v481_v21  ;;  %v515_v30 = vmul.f32 %v513_v7, %v3159_v6 }
 0x208   :  { %v496_v28 = vadd.f32 %v491_v17, %v480_v48  ;;  %v693_v56 = vstv %s4449_s8  ;;  %v557_v1 = vstv %s4451_s10  ;;  %v839_v54 = vstv %s4453_s12  ;;  %s5313_s8 = smov 126   ;;  %s5314_s10 = smov 127  }
 0x209   :  { %980 = vrot.lane.b32.xlu1 %v978_v5, %s5223_s0  ;;  %v371_v26 = vpop.permute.xlu1 %370  ;;  %v369_v46 = vpop.permute.xlu0 %368  ;;  %v2487_v45 = vsel %vm1021_vm2, %v2486_v33, %v2347_v23  ;;  %v519_v59 = vrot.slane %v515_v30, 1  ;;  %s4509_s0 = sld [smem:[#allocation2 + $0x14]]  ;;  %v737_v3 = vstv %s4459_s7  ;;  %v601_v14 = vstv %s4461_s9  ;;  %s4625_s12 = sld [smem:[#allocation2 + $0x55]] }
 0x20a   :  { %996 = vrot.lane.b32.xlu0 %v994_v63, %s5225_s25  ;;  %v375_v32 = vadd.f32 %v371_v26, %v359_v25  ;;  %v4416_v29 = vadd.f32 %v369_v46, %v358_v13  ;;  %v659_v25 = vstv %s4427_s6  ;;  %s4511_s25 = sld [smem:[#allocation2 + $0x9]]  ;;  %v2371_v17 = vstv %s4479_s18  ;;  %s5316_s6 = smov 125  }
 0x20b   :  { %v661_v38 = vmul.f32 %v659_v25, %v3159_v6  ;;  %v2363_v5 = vstv %s4481_s1  ;;  %v873_v63 = vstv %s4463_s11  ;;  %v781_v0 = vstv %s4465_s13  ;;  %s4659_s7 = sld [smem:[#allocation2 + $0x59]]  ;;  %s4735_s11 = sld [smem:[#allocation2 + $0x15]] }
 0x20c   :  { %v387_v55 = vadd.f32 %v383_v39, %v375_v32  ;;  %v917_v13 = vstv %s4467_s14  ;;  %v45_v49 = vstv %s4471_s16  ;;  %v51_v61 = vstv %s4473_s17  ;;  %s4726_s9 = sld [smem:[#allocation2 + $0x11]]  ;;  %s4755_s14 = sld [smem:[#allocation2 + $0xa]] }
 0x20d   :  { %2443 = vrot.lane.b32.xlu1 %v2442_v60, %s3111_s19  ;;  %v507_v34 = vpop.permute.xlu1 %506  ;;  %v399_v43 = vpop.permute.xlu0 %398  ;;  %v63_v21 = vstv %s4483_s20  ;;  %v75_v26 = vstv %s4485_s21  ;;  %v378_v60 = vmul.f32 %v377_v22, %v3168_v12  ;;  %v2379_v48 = vstv %s4501_s4  ;;  %s4742_s13 = sld [smem:[#allocation2 + $0x19]]  ;;  %s4757_s16 = sld [smem:[#allocation2 + $0x52]] }
 0x20e   :  { %v511_v51 = vadd.f32 %v507_v34, %v497_v10  ;;  %v403_v4 = vadd.f32 %v399_v43, %v387_v55  ;;  %v2387_v55 = vstv %s4499_s30  ;;  %v107_v34 = vstv %s4489_s23  ;;  %s4787_s17 = sld [smem:[#allocation2 + $0x12]]  ;;  %s4841_s1 = sld [smem:[#allocation2 + $0xcd]] }
 0x20f   :  { %v4550_v43 = vmul.f32 %v513_v7, %v3168_v12  ;;  %v64_v30 = vmul.f32 %v63_v21, %v3168_v12  ;;  %s4794_s18 = sld [smem:[#allocation2 + $0x5a]]  ;;  %s4847_s20 = sld [smem:[#allocation2 + $0xcc]] }
 0x210   :  { %v523_v40 = vadd.f32 %v519_v59, %v511_v51  ;;  %s4861_s21 = sld [smem:[#allocation2 + $0x5e]]  ;;  %s4879_s23 = sld [smem:[#allocation2 + $0xf]] }
 0x211   :  { %2488 = vrot.lane.b32.xlu1 %v2487_v45, %s3111_s19  ;;  %v505_v53 = vpop.permute.xlu1 %504  ;;  %v673_v11 = vpop.permute.xlu0 %672  ;;  %s4447_s19 = sld [smem:[#allocation2 + $0x2a]]  ;;  %s4896_s30 = sld [smem:[#allocation2 + $0xcf]] }
 0x212   :  { %v4429_v9 = vadd.f32 %v505_v53, %v496_v28  ;;  %v677_v37 = vadd.f32 %v673_v11, %v661_v38  ;;  %v4563_v11 = vmul.f32 %v693_v56, %v3159_v6  ;;  %v4678_v28 = vmul.f32 %v781_v0, %v3168_v12  ;;  %s4907_s4 = sld [smem:[#allocation2 + $0x61]] }
 0x215   :  { %v535_v52 = vpop.permute.xlu1 %534  ;;  %v415_v16 = vpop.permute.xlu0 %414 }
 0x216   :  { %v4431_v20 = vadd.f32 %v535_v52, %v523_v40  ;;  %v4433_v62 = vadd.f32 %v415_v16, %v403_v4  ;;  %v382_v40 = vrot.slane %v378_v60, 2  ;;  %v4570_v52 = vmul.f32 %v659_v25, %v3168_v12 }
 0x217   :  { %v421_v18 = vstv %s4447_s19  ;;  %s4523_s19 = sld [smem:[#allocation2 + $0x18]]  ;;  %v4573_v16 = vmul.f32 %v557_v1, %v3159_v6  ;;  %v4586_v25 = vmul.f32 %v557_v1, %v3168_v12  ;;  %v4605_v1 = vmul.f32 %v839_v54, %v3168_v12 }
 0x218   :  { %v423_v46 = vmul.f32 %v421_v18, %v3159_v6  ;;  %v4608_v60 = vmul.f32 %v601_v14, %v3168_v12  ;;  %v77_v4 = vmul.f32 %v75_v26, %v3159_v6 }
 0x219   :  { %v4436_v24 = vpop.permute.xlu1 %396  ;;  %v4438_v42 = vpop.permute.xlu0 %550 }
 0x21a   :  { %v427_v53 = vrot.slane %v423_v46, 3  ;;  %v4592_v46 = vmul.f32 %v693_v56, %v3168_v12  ;;  %v68_v56 = vrot.slane %v64_v30, 2 }
 0x21d   :  { %v4443_v41 = vpop.permute.xlu1 %532  ;;  %v687_v58 = vpop.permute.xlu0 %686 }
 0x21e   :  { %v4445_v2 = vadd.f32 %v687_v58, %v677_v37  ;;  %v465_v58 = vstv %s4556_s26  ;;  %s4921_s26 = sld [smem:[#allocation2 + $0x57]] }
 0x221   :  { %v4455_v27 = vpop.permute.xlu1 %670  ;;  %v4457_v15 = vpop.permute.xlu0 %548 }
 0x225   :  { %v4475_v36 = vpop.permute.xlu1 %412  ;;  %v4477_v35 = vpop.permute.xlu0 %442 }
 0x229   :  { %v4495_v44 = vpop.permute.xlu1 %684  ;;  %v4497_v50 = vpop.permute.xlu0 %714 }
 0x22d   :  { %v4517_v47 = vpop.permute.xlu1 %578  ;;  %v2354_v19 = vpop.permute.xlu0 %2353 }
 0x22e   :  { %v2356_v31 = vsel %vm38_vm0, 0.0, %v2354_v19  ;;  %v471_v19 = vstv %s4625_s12  ;;  %s4940_s12 = sld [smem:[#allocation2 + $0x5b]] }
 0x22f   :  { %v4530_v57 = vsel %vm41_vm1, %v2356_v31, 0.0  ;;  %v4589_v31 = vmul.f32 %v839_v54, %v3159_v6  ;;  %v53_v54 = vmul.f32 %v51_v61, %v3159_v6 }
 0x230   :  { %5312 = vst [vmem:[#allocation8_spill] sm:$0xff] %v4530_v57  ;;  %v2372_v39 = vmul.f32 %v2371_v17, %v4530_v57  ;;  %v2364_v23 = vmul.f32 %v2363_v5, %v4530_v57  ;;  %v2388_v7 = vmul.f32 %v2387_v55, %v4530_v57  ;;  %v2380_v59 = vmul.f32 %v2379_v48, %v4530_v57 }
 0x231   :  { %v4542_v33 = vpop.permute.xlu1 %852  ;;  %v459_v10 = vpop.permute.xlu0 %458  ;;  %v431_v17 = vadd.f32 %v427_v53, %v4433_v62  ;;  %v422_v5 = vmul.f32 %v421_v18, %v3168_v12  ;;  %v4600_v62 = vmul.f32 %v601_v14, %v3159_v6  ;;  %v4618_v53 = vmul.f32 %v873_v63, %v3159_v6 }
 0x232   :  { %2374 = vrot.lane.b32.xlu1 %v2372_v39, %s5313_s8  ;;  %2366 = vrot.lane.b32.xlu0 %v2364_v23, %s5314_s10  ;;  %v4597_v39 = vmul.f32 %v737_v3, %v3159_v6 }
 0x233   :  { %v447_v18 = vadd.f32 %v4477_v35, %v431_v17  ;;  %5317 = vst [vmem:[#allocation17_spill] sm:$0xff] %v4618_v53  ;;  %v52_v35 = vmul.f32 %v51_v61, %v3168_v12 }
 0x235   :  { %v4575_v38 = vpop.permute.xlu1 %440  ;;  %v4577_v37 = vpop.permute.xlu0 %594  ;;  %v463_v14 = vadd.f32 %v459_v10, %v447_v18  ;;  %v4635_v10 = vmul.f32 %v737_v3, %v3168_v12  ;;  %v56_v45 = vrot.slane %v52_v35, 1  ;;  %v57_v3 = vrot.slane %v53_v54, 1 }
 0x236   :  { %2390 = vrot.lane.b32.xlu1 %v2388_v7, %s5315_s5  ;;  %2382 = vrot.lane.b32.xlu0 %v2380_v59, %s5316_s6  ;;  %v386_v7 = vadd.f32 %v382_v40, %v4416_v29  ;;  %v426_v59 = vrot.slane %v422_v5, 3  ;;  %v4640_v40 = vmul.f32 %v873_v63, %v3168_v12  ;;  %v46_v29 = vmul.f32 %v45_v49, %v3168_v12 }
 0x237   :  { %v467_v63 = vadd.f32 %v465_v58, %v463_v14  ;;  %v65_v35 = vmul.f32 %v63_v21, %v3159_v6  ;;  %v109_v54 = vmul.f32 %v107_v34, %v3159_v6 }
 0x238   :  { %v402_v61 = vadd.f32 %v4436_v24, %v386_v7  ;;  %5318 = vst [vmem:[#allocation19_spill] sm:$0xff] %v4640_v40  ;;  %v4650_v7 = vmul.f32 %v781_v0, %v3159_v6  ;;  %v47_v24 = vmul.f32 %v45_v49, %v3159_v6  ;;  %v76_v49 = vmul.f32 %v75_v26, %v3168_v12 }
 0x239   :  { %v4611_v55 = vpop.permute.xlu1 %576  ;;  %v4613_v48 = vpop.permute.xlu0 %730  ;;  %v60_v14 = vadd.f32 %v56_v45, %v46_v29  ;;  %v469_v22 = vmax.f32 %v467_v63, 0.0  ;;  %v69_v51 = vrot.slane %v65_v35, 2  ;;  %v113_v57 = vrot.slane %v109_v54, 1 }
 0x23a   :  { %v418_v23 = vadd.f32 %v4475_v36, %v402_v61  ;;  %v108_v36 = vmul.f32 %v107_v34, %v3168_v12  ;;  %v4690_v34 = vmul.f32 %v917_v13, %v3159_v6  ;;  %v4695_v61 = vmul.f32 %v917_v13, %v3168_v12 }
 0x23b   :  { %v61_v0 = vadd.f32 %v57_v3, %v47_v24  ;;  %v80_v53 = vrot.slane %v76_v49, 3  ;;  %v5320_v13 = vstv %s4487_s22  ;;  %v5321_v29 = vstv %s4491_s24  ;;  %s4872_s22 = sld [smem:[#allocation2 + $0xce]]  ;;  %s4884_s24 = sld [smem:[#allocation2 + $0x5f]] }
 0x23c   :  { %v430_v8 = vadd.f32 %v426_v59, %v418_v23  ;;  %v112_v32 = vrot.slane %v108_v36, 1  ;;  %v102_v45 = vmul.f32 %v5320_v13, %v3168_v12  ;;  %v120_v24 = vmul.f32 %v5321_v29, %v3168_v12 }
 0x23d   :  { %v4642_v5 = vpop.permute.xlu1 %712  ;;  %v4644_v18 = vpop.permute.xlu0 %866  ;;  %v72_v30 = vadd.f32 %v68_v56, %v60_v14  ;;  %v73_v26 = vadd.f32 %v69_v51, %v61_v0  ;;  %v5323_v3 = vmov %v5320_v13  ;;  %v5324_v35 = vmov %v5321_v29 }
 0x23e   :  { %v446_v40 = vadd.f32 %v4575_v38, %v430_v8  ;;  %v103_v63 = vmul.f32 %v5323_v3, %v3159_v6  ;;  %v121_v36 = vmul.f32 %v5324_v35, %v3159_v6  ;;  %v555_v8 = vadd.f32 %v4438_v42, %v4431_v20 }
 0x23f   :  { %v5325_v38 = vrot.slane %v4550_v43, 1  ;;  %v473_v49 = vmul.f32 %v471_v19, %v469_v22  ;;  %v475_v29 = vstv %s4659_s7  ;;  %v116_v56 = vadd.f32 %v112_v32, %v102_v45  ;;  %s4944_s7 = sld [smem:[#allocation2 + $0x62]] }
 0x240   :  { %v117_v51 = vadd.f32 %v113_v57, %v103_v63  ;;  %v124_v3 = vrot.slane %v120_v24, 2  ;;  %v5326_v35 = vstv %s4493_s28  ;;  %v5328_v22 = vrot.slane %v4573_v16, 2  ;;  %s4892_s28 = sld [smem:[#allocation2 + $0x53]] }
 0x241   :  { %v4683_v21 = vpop.permute.xlu1 %850  ;;  %v4685_v17 = vpop.permute.xlu0 %592  ;;  %v522_v54 = vadd.f32 %v5325_v38, %v4429_v9  ;;  %v84_v9 = vadd.f32 %v80_v53, %v72_v30  ;;  %v5327_v57 = vmov %v5326_v35  ;;  %v787_v53 = vrot.slane %v4650_v7, 3 }
 0x242   :  { %5319 = vst [vmem:[#allocation9_spill] sm:$0xff] %v4683_v21  ;;  %v132_v21 = vmul.f32 %v5326_v35, %v3168_v12  ;;  %v133_v32 = vmul.f32 %v5327_v57, %v3159_v6  ;;  %v786_v24 = vrot.slane %v4678_v28, 3  ;;  %v922_v57 = vrot.slane %v4695_v61, 2 }
 0x243   :  { %v538_v14 = vadd.f32 %v4443_v41, %v522_v54  ;;  %v5331_v54 = vstv %s4503_s27  ;;  %s4774_s27 = sld [smem:[#allocation2 + $0xb]] }
 0x245   :  { %v457_v23 = vpop.permute.xlu1 %456  ;;  %v4708_v59 = vpop.permute.xlu0 %864  ;;  %v554_v41 = vadd.f32 %v4457_v15, %v538_v14  ;;  %v5329_v15 = vstv %s4469_s15  ;;  %s4780_s15 = sld [smem:[#allocation2 + $0x56]] }
 0x246   :  { %5322 = vst [vmem:[#allocation12_spill] sm:$0xff] %v4708_v59  ;;  %v462_v13 = vadd.f32 %v457_v23, %v446_v40  ;;  %v81_v59 = vrot.slane %v77_v4, 3  ;;  %v125_v4 = vrot.slane %v121_v36, 2  ;;  %v477_v40 = vadd.f32 %v475_v29, %v473_v49 }
 0x247   :  { %v128_v23 = vadd.f32 %v124_v3, %v116_v56  ;;  %v4748_v63 = vmul.f32 %v5329_v15, %v3159_v6  ;;  %v5330_v16 = vmov %v5329_v15  ;;  %v88_v49 = vadd.f32 %v5331_v54, %v84_v9 }
 0x248   :  { %v466_v0 = vadd.f32 %v465_v58, %v462_v13  ;;  %v85_v43 = vadd.f32 %v81_v59, %v73_v26  ;;  %v567_v58 = vadd.f32 %v5328_v22, %v555_v8  ;;  %v129_v59 = vadd.f32 %v125_v4, %v117_v51 }
 0x249   :  { %v4728_v20 = vpop.permute.xlu1 %728  ;;  %v4730_v42 = vpop.permute.xlu0 %758  ;;  %v4753_v36 = vmul.f32 %v5330_v16, %v3168_v12  ;;  %v5332_v13 = vmov %v5331_v54  ;;  %v137_v56 = vrot.slane %v133_v32, 3  ;;  %v1020_v51 = vrot.slane %v477_v40, 7 }
 0x24a   :  { %v468_v45 = vmax.f32 %v466_v0, 0.0  ;;  %v583_v30 = vadd.f32 %v4517_v47, %v567_v58  ;;  %v89_v47 = vadd.f32 %v5332_v13, %v85_v43  ;;  %v5333_v0 = vrot.slane %v4586_v25, 2 }
 0x24b   :  { %v923_v4 = vrot.slane %v4690_v34, 2  ;;  %v141_v58 = vadd.f32 %v137_v56, %v129_v59  ;;  %v967_v43 = vrot.slane %v4748_v63, 3  ;;  %v966_v32 = vrot.slane %v4753_v36, 3 }
 0x24c   :  { %v472_v26 = vmul.f32 %v471_v19, %v468_v45  ;;  %v136_v19 = vrot.slane %v132_v21, 3  ;;  %v599_v14 = vadd.f32 %v4577_v37, %v583_v30  ;;  %v566_v3 = vadd.f32 %v5333_v0, %v554_v41 }
 0x24d   :  { %v623_v8 = vpop.permute.xlu1 %622  ;;  %v621_v38 = vpop.permute.xlu0 %620  ;;  %v143_v37 = vstv %s4726_s9  ;;  %v149_v41 = vstv %s4735_s11  ;;  %v5334_v40 = vstv %s4511_s25  ;;  %v5335_v30 = vrot.slane %v4600_v62, 3  ;;  %s4812_s25 = sld [smem:[#allocation2 + $0xc]]  ;;  %s4951_s9 = sld [smem:[#allocation2 + $0x16]] }
 0x24e   :  { %v476_v35 = vadd.f32 %v475_v29, %v472_v26  ;;  %v140_v22 = vadd.f32 %v136_v19, %v128_v23  ;;  %v582_v9 = vadd.f32 %v4611_v55, %v566_v3  ;;  %v90_v55 = vmax.f32 %v88_v49, 0.0  ;;  %s4959_s11 = sld [smem:[#allocation2 + $0x54]] }
 0x24f   :  { %v164_v45 = vmul.f32 %v5334_v40, %v3168_v12  ;;  %v676_v23 = vadd.f32 %v4455_v27, %v4570_v52  ;;  %v611_v26 = vadd.f32 %v5335_v30, %v599_v14  ;;  %v91_v15 = vmax.f32 %v89_v47, 0.0 }
 0x250   :  { %v4770_v21 = vsel %vm1021_vm2, %v1020_v51, %v476_v35  ;;  %v598_v59 = vadd.f32 %v4685_v17, %v582_v9  ;;  %v144_v16 = vadd.f32 %v143_v37, %v140_v22  ;;  %v145_v54 = vadd.f32 %v143_v37, %v141_v58 }
 0x251   :  { %v4776_v25 = vpop.permute.xlu1 %894  ;;  %v4778_v29 = vpop.permute.xlu0 %756  ;;  %v5336_v13 = vmov %v5334_v40  ;;  %v690_v56 = vadd.f32 %v4495_v44, %v676_v23  ;;  %v627_v27 = vadd.f32 %v623_v8, %v611_v26  ;;  %v5337_v52 = vstv %s4505_s29  ;;  %s4834_s29 = sld [smem:[#allocation2 + $0xe]] }
 0x252   :  { %v165_v19 = vmul.f32 %v5336_v13, %v3159_v6  ;;  %v158_v17 = vmul.f32 %v5337_v52, %v3168_v12  ;;  %v175_v51 = vstv %s4755_s14  ;;  %v645_v62 = vstv %s4757_s16  ;;  %s4970_s14 = sld [smem:[#allocation2 + $0x13]]  ;;  %s4976_s16 = sld [smem:[#allocation2 + $0x1a]] }
 0x253   :  { %v5338_v0 = vmov %v5337_v52  ;;  %v168_v35 = vrot.slane %v164_v45, 1  ;;  %v176_v22 = vmul.f32 %v175_v51, %v3168_v12  ;;  %v5339_v44 = vrot.slane %v4608_v60, 3 }
 0x254   :  { %v159_v3 = vmul.f32 %v5338_v0, %v3159_v6  ;;  %v5340_v9 = vstv %s4509_s0  ;;  %v146_v30 = vmax.f32 %v144_v16, 0.0  ;;  %v147_v26 = vmax.f32 %v145_v54, 0.0  ;;  %s4832_s0 = sld [smem:[#allocation2 + $0xd]] }
 0x255   :  { %v639_v14 = vpop.permute.xlu1 %638  ;;  %v610_v8 = vadd.f32 %v5339_v44, %v598_v59  ;;  %v4818_v37 = vmul.f32 %v5340_v9, %v90_v55  ;;  %v5341_v40 = vmov %v5340_v9  ;;  %v169_v13 = vrot.slane %v165_v19, 1 }
 0x256   :  { %v4806_v47 = vpop.permute.xlu0 %892  ;;  %v643_v58 = vadd.f32 %v639_v14, %v627_v27  ;;  %v4822_v23 = vmul.f32 %v5341_v40, %v91_v15  ;;  %v177_v45 = vmul.f32 %v175_v51, %v3159_v6  ;;  %v5342_v52 = vrot.slane %v4592_v46, 1 }
 0x257   :  { %v626_v49 = vadd.f32 %v621_v38, %v610_v8  ;;  %v187_v59 = vstv %s4774_s27  ;;  %v651_v27 = vstv %s4780_s15  ;;  %v172_v44 = vadd.f32 %v168_v35, %v158_v17  ;;  %s4983_s27 = sld [smem:[#allocation2 + $0x17]]  ;;  %s4985_s15 = sld [smem:[#allocation2 + $0xd1]] }
 0x258   :  { %v702_v0 = vadd.f32 %v5342_v52, %v690_v56  ;;  %v647_v60 = vadd.f32 %v645_v62, %v643_v58  ;;  %v180_v9 = vrot.slane %v176_v22, 2  ;;  %v199_v15 = vstv %s4787_s17  ;;  %s4987_s17 = sld [smem:[#allocation2 + $0xd4]] }
 0x259   :  { %v5343_v16 = vrot.slane %v4563_v11, 1  ;;  %v655_v56 = vstv %s4794_s18  ;;  %v173_v51 = vadd.f32 %v169_v13, %v159_v3  ;;  %v188_v17 = vmul.f32 %v187_v59, %v3168_v12  ;;  %s4992_s18 = sld [smem:[#allocation2 + $0x58]] }
 0x25a   :  { %v718_v54 = vadd.f32 %v4642_v5, %v702_v0  ;;  %v649_v38 = vmax.f32 %v647_v60, 0.0  ;;  %v189_v35 = vmul.f32 %v187_v59, %v3159_v6  ;;  %v4855_v40 = vmul.f32 %v149_v41, %v147_v26 }
 0x25b   :  { %v4829_v14 = vpop.permute.xlu1 %774  ;;  %v703_v46 = vadd.f32 %v5343_v16, %v4445_v2  ;;  %v181_v3 = vrot.slane %v177_v45, 2  ;;  %v213_v13 = vstv %s4812_s25  ;;  %v192_v59 = vrot.slane %v188_v17, 3  ;;  %s4998_s25 = sld [smem:[#allocation2 + $0x1c]] }
 0x25c   :  { %v637_v55 = vpop.permute.xlu0 %636  ;;  %v734_v8 = vadd.f32 %v4728_v20, %v718_v54  ;;  %v653_v58 = vmul.f32 %v651_v27, %v649_v38  ;;  %v184_v20 = vadd.f32 %v180_v9, %v172_v44  ;;  %v231_v16 = vstv %s4834_s29  ;;  %s5004_s29 = sld [smem:[#allocation2 + $0xd2]] }
 0x25d   :  { %v642_v19 = vadd.f32 %v637_v55, %v626_v49  ;;  %v719_v22 = vadd.f32 %v4497_v50, %v703_v46  ;;  %v4853_v49 = vmul.f32 %v149_v41, %v146_v30  ;;  %v185_v60 = vadd.f32 %v181_v3, %v173_v51 }
 0x25e   :  { %v657_v0 = vadd.f32 %v655_v56, %v653_v58  ;;  %v193_v30 = vrot.slane %v189_v35, 3  ;;  %v5344_v41 = vrot.slane %v4635_v10, 2  ;;  %v4869_v55 = vmul.f32 %v213_v13, %v3159_v6 }
 0x25f   :  { %v646_v11 = vadd.f32 %v645_v62, %v642_v19  ;;  %v4849_v2 = vpop.permute.xlu1 %910  ;;  %v735_v52 = vadd.f32 %v4613_v48, %v719_v22  ;;  %v857_v62 = vadd.f32 %v4542_v33, %v4589_v31  ;;  %v4866_v48 = vmul.f32 %v213_v13, %v3168_v12  ;;  %v5346_v19 = vld [vmem:[#allocation9_spill] sm:$0xff] }
 0x260   :  { %v4851_v5 = vpop.permute.xlu0 %908  ;;  %v746_v26 = vadd.f32 %v5344_v41, %v734_v8  ;;  %v219_v31 = vstv %s4832_s0  ;;  %v5345_v10 = vrot.slane %v4597_v39, 2  ;;  %v1050_v54 = vrot.slane %v657_v0, 7  ;;  %s5000_s0 = sld [smem:[#allocation2 + $0x1d]] }
 0x261   :  { %v648_v50 = vmax.f32 %v646_v11, 0.0  ;;  %v871_v44 = vadd.f32 %v4644_v18, %v857_v62  ;;  %v856_v18 = vadd.f32 %v5346_v19, %v4605_v1  ;;  %v2416_v51 = vstv %s4841_s1  ;;  %s5006_s1 = sld [smem:[#allocation2 + $0x65]] }
 0x262   :  { %v762_v46 = vadd.f32 %v4778_v29, %v746_v26  ;;  %v196_v17 = vadd.f32 %v192_v59, %v184_v20  ;;  %v197_v35 = vadd.f32 %v193_v30, %v185_v60  ;;  %v2408_v58 = vstv %s4847_s20  ;;  %v5347_v29 = vld [vmem:[#allocation12_spill] sm:$0xff]  ;;  %s5013_s20 = sld [smem:[#allocation2 + $0x5c]] }
 0x263   :  { %v652_v45 = vmul.f32 %v651_v27, %v648_v50  ;;  %v773_v9 = vpop.permute.xlu1 %772  ;;  %v747_v27 = vadd.f32 %v5345_v10, %v735_v52  ;;  %v870_v11 = vadd.f32 %v5347_v29, %v856_v18  ;;  %v1025_v1 = vsel %vm1024_vm3, 0.0, %v4770_v21 }
 0x264   :  { %v803_v33 = vpop.permute.xlu0 %802  ;;  %v778_v39 = vadd.f32 %v773_v9, %v762_v46  ;;  %v220_v20 = vmul.f32 %v219_v31, %v3168_v12  ;;  %v221_v62 = vmul.f32 %v219_v31, %v3159_v6  ;;  %v1033_v30 = vstv %s4861_s21  ;;  %s5027_s21 = sld [smem:[#allocation2 + $0x1e]] }
 0x265   :  { %v656_v38 = vadd.f32 %v655_v56, %v652_v45  ;;  %v763_v22 = vadd.f32 %v4730_v42, %v747_v27  ;;  %v5348_v56 = vld [vmem:[#allocation17_spill] sm:$0xff]  ;;  %v4910_v21 = vmul.f32 %v231_v16, %v3168_v12  ;;  %v5350_v45 = vld [vmem:[#allocation19_spill] sm:$0xff]  ;;  %v2424_v27 = vstv %s4872_s22  ;;  %s5033_s22 = sld [smem:[#allocation2 + $0xd7]] }
 0x266   :  { %v5349_v3 = vrot.slane %v5348_v56, 1  ;;  %v4926_v28 = vadd.f32 %v199_v15, %v196_v17  ;;  %v243_v19 = vstv %s4879_s23  ;;  %v225_v7 = vrot.slane %v221_v62, 1  ;;  %s5054_s23 = sld [smem:[#allocation2 + $0xd8]] }
 0x267   :  { %v1051_v8 = vsel %vm1021_vm2, %v1050_v54, %v656_v38  ;;  %v2399_v52 = vpop.permute.xlu1 %2398  ;;  %v779_v42 = vadd.f32 %v4829_v14, %v763_v22  ;;  %v790_v14 = vadd.f32 %v786_v24, %v778_v39  ;;  %v233_v24 = vmul.f32 %v231_v16, %v3159_v6 }
 0x268   :  { %v883_v13 = vadd.f32 %v5349_v3, %v871_v44  ;;  %v801_v0 = vpop.permute.xlu0 %800  ;;  %v2401_v50 = vsel %vm38_vm0, 0.0, %v2399_v52  ;;  %v5351_v44 = vrot.slane %v5350_v45, 1  ;;  %v4936_v38 = vadd.f32 %v199_v15, %v197_v35 }
 0x269   :  { %v4904_v59 = vsel %vm41_vm1, %v2401_v50, 0.0  ;;  %v791_v54 = vadd.f32 %v787_v53, %v779_v42  ;;  %v1053_v22 = vsel %vm1024_vm3, 0.0, %v1051_v8  ;;  %v825_v35 = vstv %s4892_s28  ;;  %s5062_s28 = sld [smem:[#allocation2 + $0x1f]] }
 0x26a   :  { %v899_v60 = vadd.f32 %v4776_v25, %v883_v13  ;;  %v2417_v41 = vmul.f32 %v2416_v51, %v4904_v59  ;;  %v2409_v26 = vmul.f32 %v2408_v58, %v4904_v59  ;;  %v4917_v25 = vsel %vm1026_vm4, %v1025_v1, 0.0 }
 0x26b   :  { %v882_v9 = vadd.f32 %v5351_v44, %v870_v11  ;;  %v939_v31 = vpop.permute.xlu1 %938  ;;  %v1034_v16 = vmul.f32 %v1033_v30, %v4917_v25  ;;  %v807_v53 = vadd.f32 %v803_v33, %v791_v54  ;;  %v806_v51 = vadd.f32 %v801_v0, %v790_v14 }
 0x26c   :  { %v937_v10 = vpop.permute.xlu0 %936  ;;  %v915_v46 = vadd.f32 %v4849_v2, %v899_v60  ;;  %2419 = vrot.lane.b32.xlu1 %v2417_v41, %s5313_s8  ;;  %2411 = vrot.lane.b32.xlu0 %v2409_v26, %s5314_s10  ;;  %v1041_v2 = vstv %s4884_s24  ;;  %v2425_v17 = vmul.f32 %v2424_v27, %v4904_v59  ;;  %v2432_v58 = vstv %s4896_s30  ;;  %s5056_s24 = sld [smem:[#allocation2 + $0x64]]  ;;  %s5072_s30 = sld [smem:[#allocation2 + $0xd9]] }
 0x26d   :  { %v898_v18 = vadd.f32 %v4806_v47, %v882_v9  ;;  %v224_v29 = vrot.slane %v220_v20, 1  ;;  %v1042_v8 = vmul.f32 %v1041_v2, %v4917_v25  ;;  %v4962_v3 = vsel %vm1026_vm4, %v1053_v22, 0.0 }
 0x26e   :  { %v927_v11 = vadd.f32 %v923_v4, %v915_v46  ;;  %v1060_v13 = vstv %s4907_s4  ;;  %v229_v34 = vadd.f32 %v225_v7, %v4869_v55  ;;  %v2433_v1 = vmul.f32 %v2432_v58, %v4904_v59  ;;  %s5074_s4 = sld [smem:[#allocation2 + $0xd6]] }
 0x26f   :  { %v914_v15 = vadd.f32 %v4851_v5, %v898_v18  ;;  %v819_v39 = vpop.permute.xlu1 %818  ;;  %v236_v5 = vrot.slane %v4910_v21, 2  ;;  %v831_v42 = vstv %s4921_s26  ;;  %v228_v62 = vadd.f32 %v224_v29, %v4866_v48  ;;  %s5083_s26 = sld [smem:[#allocation2 + $0x20]] }
 0x270   :  { %v817_v47 = vpop.permute.xlu0 %816  ;;  %v823_v33 = vadd.f32 %v819_v39, %v807_v53  ;;  %2427 = vrot.lane.b32.xlu0 %v2425_v17, %s5316_s6  ;;  %1036 = vrot.lane.b32.xlu1 %v1034_v16, %s5314_s10  ;;  %v943_v52 = vadd.f32 %v939_v31, %v927_v11  ;;  %v237_v60 = vrot.slane %v233_v24, 2  ;;  %v245_v30 = vmul.f32 %v243_v19, %v3159_v6 }
 0x271   :  { %v822_v56 = vadd.f32 %v817_v47, %v806_v51  ;;  %v926_v55 = vadd.f32 %v922_v57, %v914_v15  ;;  %v835_v26 = vstv %s4940_s12  ;;  %v1061_v48 = vmul.f32 %v1060_v13, %v4962_v3  ;;  %s5087_s12 = sld [smem:[#allocation2 + $0x67]] }
 0x272   :  { %v827_v4 = vadd.f32 %v825_v35, %v823_v33  ;;  %v1068_v45 = vstv %s4944_s7  ;;  %v241_v6 = vadd.f32 %v237_v60, %v229_v34  ;;  %v203_v24 = vmax.f32 %v4936_v38, 0.0  ;;  %s5097_s7 = sld [smem:[#allocation2 + $0x68]] }
 0x273   :  { %v826_v0 = vadd.f32 %v825_v35, %v822_v56  ;;  %v955_v50 = vpop.permute.xlu1 %954  ;;  %v942_v44 = vadd.f32 %v937_v10, %v926_v55  ;;  %v205_v46 = vstv %s4951_s9  ;;  %v244_v54 = vmul.f32 %v243_v19, %v3168_v12 }
 0x274   :  { %v983_v20 = vpop.permute.xlu0 %982  ;;  %v829_v21 = vmax.f32 %v827_v4, 0.0  ;;  %v959_v41 = vadd.f32 %v955_v50, %v943_v52  ;;  %2435 = vrot.lane.b32.xlu0 %v2433_v1, %s5315_s5  ;;  %1044 = vrot.lane.b32.xlu1 %v1042_v8, %s5313_s8  ;;  %v249_v10 = vrot.slane %v245_v30, 3  ;;  %v202_v63 = vmax.f32 %v4926_v28, 0.0 }
 0x275   :  { %v828_v14 = vmax.f32 %v826_v0, 0.0  ;;  %v1069_v7 = vmul.f32 %v1068_v45, %v4962_v3  ;;  %v240_v53 = vadd.f32 %v236_v5, %v228_v62  ;;  %v5352_v22 = vstv %s4523_s19  ;;  %s5031_s19 = sld [smem:[#allocation2 + $0xd3]] }
 0x276   :  { %v833_v9 = vmul.f32 %v831_v42, %v829_v21  ;;  %v971_v61 = vadd.f32 %v967_v43, %v959_v41  ;;  %v1005_v43 = vstv %s4959_s11  ;;  %v253_v38 = vadd.f32 %v249_v10, %v241_v6 }
 0x277   :  { %v832_v31 = vmul.f32 %v831_v42, %v828_v14  ;;  %v953_v57 = vpop.permute.xlu1 %952  ;;  %v98_v15 = vadd.f32 %v5352_v22, %v4818_v37  ;;  %v207_v35 = vmul.f32 %v205_v46, %v203_v24  ;;  %v248_v39 = vrot.slane %v244_v54, 3 }
 0x278   :  { %v999_v27 = vpop.permute.xlu0 %998  ;;  %v837_v18 = vadd.f32 %v835_v26, %v833_v9  ;;  %v987_v16 = vadd.f32 %v983_v20, %v971_v61  ;;  %v958_v2 = vadd.f32 %v953_v57, %v942_v44  ;;  %1063 = vrot.lane.b32.xlu1 %v1061_v48, %s5314_s10  ;;  %v255_v47 = vstv %s4970_s14 }
 0x279   :  { %v836_v19 = vadd.f32 %v835_v26, %v832_v31  ;;  %v209_v29 = vstv %s4976_s16  ;;  %v5353_v33 = vmov %v5352_v22  ;;  %v5354_v56 = vstv %s4742_s13  ;;  %s5040_s13 = sld [smem:[#allocation2 + $0x1b]]  ;;  %s2860_s16 = sld [smem:[#allocation2 + $0x69]] }
 0x27a   :  { %v1077_v12 = vrot.slane %v837_v18, 7  ;;  %v1003_v51 = vadd.f32 %v999_v27, %v987_v16  ;;  %v970_v17 = vadd.f32 %v966_v32, %v958_v2  ;;  %v99_v37 = vadd.f32 %v5353_v33, %v4822_v23 }
 0x27b   :  { %v981_v28 = vpop.permute.xlu1 %980  ;;  %v154_v5 = vadd.f32 %v5354_v56, %v4853_v49  ;;  %v5355_v8 = vmov %v5354_v56  ;;  %v252_v34 = vadd.f32 %v248_v39, %v240_v53  ;;  %v206_v4 = vmul.f32 %v205_v46, %v202_v63 }
 0x27c   :  { %v1078_v58 = vsel %vm1021_vm2, %v1077_v12, %v836_v19  ;;  %v1007_v36 = vadd.f32 %v1005_v43, %v1003_v51  ;;  %v986_v32 = vadd.f32 %v981_v28, %v970_v17  ;;  %1071 = vrot.lane.b32.xlu1 %v1069_v7, %s5313_s8  ;;  %v997_v11 = vpop.permute.xlu0 %996  ;;  %v155_v13 = vadd.f32 %v5355_v8, %v4855_v40 }
 0x27d   :  { %v257_v0 = vadd.f32 %v255_v47, %v253_v38  ;;  %v261_v1 = vstv %s4983_s27  ;;  %v2453_v20 = vstv %s4985_s15  ;;  %v2477_v23 = vstv %s4987_s17  ;;  %s3119_s27 = smov 64  }
 0x27e   :  { %v1002_v52 = vadd.f32 %v997_v11, %v986_v32  ;;  %v1009_v42 = vmax.f32 %v1007_v36, 0.0  ;;  %v211_v49 = vadd.f32 %v209_v29, %v207_v35  ;;  %v1011_v40 = vstv %s4992_s18 }
 0x27f   :  { %v2444_v50 = vpop.permute.xlu1 %2443  ;;  %v1080_v30 = vsel %vm1024_vm3, 0.0, %v1078_v58  ;;  %v256_v21 = vadd.f32 %v255_v47, %v252_v34  ;;  %v269_v14 = vstv %s4998_s25  ;;  %v275_v41 = vstv %s5000_s0 }
 0x280   :  { %v1006_v62 = vadd.f32 %v1005_v43, %v1002_v52  ;;  %v2446_v60 = vsel %vm38_vm0, 0.0, %v2444_v50  ;;  %v259_v6 = vmax.f32 %v257_v0, 0.0  ;;  %v1013_v44 = vmul.f32 %v1011_v40, %v1009_v42 }
 0x281   :  { %v5043_v55 = vsel %vm41_vm1, %v2446_v60, 0.0  ;;  %v2461_v31 = vstv %s5004_s29  ;;  %v5051_v61 = vsel %vm1026_vm4, %v1080_v30, 0.0  ;;  %v1095_v57 = vstv %s5006_s1  ;;  %s2953_s29 = sld [smem:[#allocation2 + $0xc6]] }
 0x282   :  { %v1008_v26 = vmax.f32 %v1006_v62, 0.0  ;;  %v2454_v48 = vmul.f32 %v2453_v20, %v5043_v55  ;;  %v2478_v45 = vmul.f32 %v2477_v23, %v5043_v55  ;;  %v1015_v27 = vstv %s5013_s20 }
 0x283   :  { %v2489_v9 = vpop.permute.xlu1 %2488  ;;  %v270_v46 = vmul.f32 %v269_v14, %v98_v15  ;;  %v271_v54 = vmul.f32 %v269_v14, %v99_v37  ;;  %v258_v18 = vmax.f32 %v256_v21, 0.0  ;;  %v276_v16 = vmul.f32 %v275_v41, %v154_v5 }
 0x284   :  { %v2491_v24 = vsel %vm38_vm0, 0.0, %v2489_v9  ;;  %2456 = vrot.lane.b32.xlu0 %v2454_v48, %s5314_s10  ;;  %2480 = vrot.lane.b32.xlu1 %v2478_v45, %s5315_s5  ;;  %v1012_v10 = vmul.f32 %v1011_v40, %v1008_v26  ;;  %v277_v2 = vmul.f32 %v275_v41, %v155_v13  ;;  %v2462_v63 = vmul.f32 %v2461_v31, %v5043_v55  ;;  %v2552_v41 = vld [vmem:[%s5210_s2] sm:$0xff]  ;;  %v2553_v26 = vld [vmem:[%s5210_s2 + $0x8] sm:$0xff] }
 0x285   :  { %v1096_v43 = vmul.f32 %v1095_v57, %v5051_v61  ;;  %v263_v7 = vmul.f32 %v261_v1, %v259_v6  ;;  %v281_v53 = vstv %s5027_s21  ;;  %v1017_v38 = vadd.f32 %v1015_v27, %v1013_v44  ;;  %v2554_v48 = vld [vmem:[%s5210_s2 + $0x10] sm:$0xff]  ;;  %v2555_v9 = vld [vmem:[%s5210_s2 + $0x18] sm:$0xff] }
 0x286   :  { %v5068_v12 = vsel %vm41_vm1, %v2491_v24, 0.0  ;;  %v2469_v19 = vstv %s5031_s19  ;;  %v2506_v51 = vstv %s5033_s22  ;;  %v265_v17 = vstv %s5040_s13 }
 0x287   :  { %v1016_v28 = vadd.f32 %v1015_v27, %v1012_v10  ;;  %v210_v22 = vadd.f32 %v209_v29, %v206_v4  ;;  %v262_v15 = vmul.f32 %v261_v1, %v258_v18  ;;  %v279_v35 = vadd.f32 %v277_v2, %v271_v54  ;;  %v2557_v54 = vld [vmem:[%s5210_s2 + $0x28] sm:$0xff] }
 0x288   :  { %2464 = vrot.lane.b32.xlu0 %v2462_v63, %s5313_s8  ;;  %1098 = vrot.lane.b32.xlu1 %v1096_v43, %s5313_s8  ;;  %v2470_v39 = vmul.f32 %v2469_v19, %v5043_v55  ;;  %v2507_v47 = vmul.f32 %v2506_v51, %v5068_v12  ;;  %v278_v58 = vadd.f32 %v276_v16, %v270_v46  ;;  %v1104_v32 = vrot.slane %v1017_v38, 7  ;;  %v2556_v46 = vld [vmem:[%s5210_s2 + $0x20] sm:$0xff]  ;;  %v2558_v63 = vld [vmem:[%s5210_s2 + $0x30] sm:$0xff] }
 0x289   :  { %v283_v36 = vmul.f32 %v281_v53, %v211_v49  ;;  %v2514_v11 = vstv %s5054_s23  ;;  %v1087_v33 = vstv %s5056_s24  ;;  %v267_v37 = vadd.f32 %v265_v17, %v263_v7  ;;  %v2559_v43 = vld [vmem:[%s5210_s2 + $0x38] sm:$0xff]  ;;  %v2560_v38 = vld [vmem:[%s5210_s2 + $0x40] sm:$0xff]  ;;  %s2958_s24 = sld [smem:[#allocation2 + $0xcb]] }
 0x28a   :  { %v287_v29 = vstv %s5062_s28  ;;  %v1105_v56 = vsel %vm1021_vm2, %v1104_v32, %v1016_v28  ;;  %v266_v5 = vadd.f32 %v265_v17, %v262_v15  ;;  %v282_v8 = vmul.f32 %v281_v53, %v210_v22  ;;  %v2561_v19 = vld [vmem:[%s5210_s2 + $0x48] sm:$0xff]  ;;  %s2851_s28 = sld [smem:[#allocation2 + $0x60]] }
 0x28b   :  { %v285_v13 = vadd.f32 %v283_v36, %v279_v35  ;;  %v2515_v34 = vmul.f32 %v2514_v11, %v5068_v12  ;;  %v1088_v52 = vmul.f32 %v1087_v33, %v5051_v61  ;;  %v2522_v4 = vstv %s5072_s30  ;;  %v5356_v28 = vld [vmem:[#allocation8_spill] sm:$0xff]  ;;  %s2963_s30 = sld [smem:[#allocation2 + $0xd0]] }
 0x28c   :  { %2472 = vrot.lane.b32.xlu0 %v2470_v39, %s5316_s6  ;;  %2509 = vrot.lane.b32.xlu1 %v2507_v47, %s5313_s8  ;;  %v2498_v0 = vstv %s5074_s4  ;;  %v284_v1 = vadd.f32 %v282_v8, %v278_v58  ;;  %v289_v42 = vmul.f32 %v287_v29, %v267_v37  ;;  %v1107_v50 = vsel %vm1024_vm3, 0.0, %v1105_v56  ;;  %s2854_s4 = sld [smem:[#allocation2 + $0x63]] }
 0x28d   :  { %v288_v20 = vmul.f32 %v287_v29, %v266_v5  ;;  %v2523_v49 = vmul.f32 %v2522_v4, %v5068_v12  ;;  %v2499_v40 = vmul.f32 %v2498_v0, %v5068_v12  ;;  %v293_v62 = vstv %s5083_s26  ;;  %s2968_s26 = sld [smem:[#allocation2 + $0xd5]] }
 0x28e   :  { %v291_v23 = vadd.f32 %v289_v42, %v285_v13  ;;  %v5106_v60 = vsel %vm1026_vm4, %v1107_v50, 0.0  ;;  %v1114_v30 = vstv %s5087_s12  ;;  %v3116_v6 = vmov 0.0|0.0   ;;  %s2857_s12 = sld [smem:[#allocation2 + $0x66]] }
 0x28f   :  { %v290_v21 = vadd.f32 %v288_v20, %v284_v1  ;;  %v1115_v45 = vmul.f32 %v1114_v30, %v5106_v60  ;;  %3036 = vmatprep.subr.bf16.mxu0 %v3116_v6  ;;  %v3037_v44 = vpack.c.bf16 %v2553_v26, %v2552_v41  ;;  %3054 = vmatprep.subr.bf16.mxu1 %v3116_v6  ;;  %v1122_v31 = vstv %s5097_s7  ;;  %s2973_s7 = sld [smem:[#allocation2 + $0xda]] }
 0x290   :  { %2517 = vrot.lane.b32.xlu1 %v2515_v34, %s5316_s6  ;;  %1090 = vrot.lane.b32.xlu0 %v1088_v52, %s5314_s10  ;;  %v295_v14 = vadd.f32 %v293_v62, %v291_v23  ;;  %v3040_v27 = vpack.c.bf16 %v2555_v9, %v2554_v48  ;;  %v1123_v10 = vmul.f32 %v1122_v31, %v5106_v60  ;;  %v2359_v51 = vstv %s2953_s29 }
 0x291   :  { %v294_v57 = vadd.f32 %v293_v62, %v290_v21  ;;  %3038 = vmatpush3.bf16.msra.mxu0 %v3037_v44  ;;  %v3043_v16 = vpack.c.bf16 %v2557_v54, %v2556_v46  ;;  %v3046_v53 = vpack.c.bf16 %v2559_v43, %v2558_v63  ;;  %v3049_v17 = vpack.c.bf16 %v2561_v19, %v2560_v38  ;;  %v2562_v19 = vld [vmem:[%s5210_s2 + $0x50] sm:$0xff] }
 0x292   :  { %v297_v24 = vmax.f32 %v295_v14, 0.0  ;;  %3039 = vmatprep.subr.bf16.mxu0 %v3116_v6  ;;  %v2360_v22 = vmul.f32 %v2359_v51, %v5356_v28  ;;  %v2404_v36 = vstv %s2958_s24  ;;  %v1056_v1 = vstv %s2851_s28  ;;  %v2563_v51 = vld [vmem:[%s5210_s2 + $0x58] sm:$0xff]  ;;  %s3121_s28 = smov [#allocation5]  }
 0x293   :  { %v296_v18 = vmax.f32 %v294_v57, 0.0  ;;  %v2405_v37 = vmul.f32 %v2404_v36, %v4904_v59  ;;  %v2449_v42 = vstv %s2963_s30  ;;  %v1057_v62 = vmul.f32 %v1056_v1, %v4962_v3  ;;  %s2747_s30 = sshll.u32 %s3121_s28, 4  ;;  %s2748_s30 = int_to_ptr.vmem [resolvable:$true] %s2747_s30 }
 0x294   :  { %2525 = vrot.lane.b32.xlu1 %v2523_v49, %s5315_s5  ;;  %2501 = vrot.lane.b32.xlu0 %v2499_v40, %s5314_s10  ;;  %v2535_v2 = vrot.slane %v297_v24, 7  ;;  %v2450_v30 = vmul.f32 %v2449_v42, %v5043_v55  ;;  %v1083_v26 = vstv %s2854_s4  ;;  %v2494_v55 = vstv %s2968_s26  ;;  %s3120_s5 = smov 32   ;;  %s3084_s4 = scalar_lea.vmem %s2748_s30, 32 }
 0x295   :  { %3041 = vmatpush3.bf16.msra.mxu0 %v3040_v27  ;;  %v1084_v44 = vmul.f32 %v1083_v26, %v5051_v61  ;;  %v1110_v43 = vstv %s2857_s12  ;;  %v2530_v36 = vstv %s2973_s7  ;;  %v2564_v42 = vld [vmem:[%s5210_s2 + $0x60] sm:$0xff]  ;;  %p3085_p5 = scmp.ne.s32.totalorder %s2748_s30, %s3084_s4  ;;  %p3089_p6 = scmp.lt.s32.totalorder %s2748_s30, %s2748_s30 }
 0x296   :  { %3042 = vmatprep.subr.bf16.mxu0 %v3116_v6  ;;  %v2536_v7 = vsel %vm1021_vm2, %v2535_v2, %v296_v18  ;;  %v2495_v2 = vmul.f32 %v2494_v55, %v5068_v12  ;;  %v1111_v38 = vmul.f32 %v1110_v43, %v5106_v60  ;;  %v3052_v12 = vpack.c.bf16 %v2563_v51, %v2562_v19  ;;  %v2977_v26 = vld [vmem:[%s5210_s2 + $0x82] ss:$0 sm:$0xff]  ;;  %p3090_p7 = scmp.lt.s32.totalorder %s3084_s4, %s3084_s4 }
 0x298   :  { %1117 = vrot.lane.b32.xlu0 %v1115_v45, %s5314_s10  ;;  %p3091_p8 = por %p3090_p7, %p3089_p6 }
 0x299   :  { %3044 = vmatpush3.bf16.msra.mxu0 %v3043_v16 }
 0x29a   :  { %3045 = vmatprep.subr.bf16.mxu0 %v3116_v6  ;;  %p3092_p9 = pnand %p3091_p8, %p3085_p5 }
 0x29c   :  { %1125 = vrot.lane.b32.xlu0 %v1123_v10, %s5313_s8 }
 0x29d   :  { %3047 = vmatpush3.bf16.msra.mxu0 %v3046_v53 }
 0x29e   :  { %3048 = vmatprep.subr.bf16.mxu0 %v3116_v6 }
 0x2a0   :  { %2537 = vrot.lane.b32.xlu0 %v2536_v7, %s5313_s8  ;;  %s2848_s8 = sld [smem:[#allocation2 + $0x5d]] }
 0x2a1   :  { %3050 = vmatpush3.bf16.msra.mxu0 %v3049_v17 }
 0x2a2   :  { %3051 = vmatprep.subr.bf16.mxu0 %v3116_v6 }
 0x2a4   :  { %v2375_v15 = vpop.permute.xlu1 %2374  ;;  %v2367_v35 = vpop.permute.xlu0 %2366 }
 0x2a5   :  { %v2369_v39 = vadd.f32 %v2367_v35, %v2360_v22  ;;  %3053 = vmatpush3.bf16.msra.mxu0 %v3052_v12 }
 0x2a6   :  { %v1029_v13 = vstv %s2848_s8 }
 0x2a7   :  { %v2377_v47 = vadd.f32 %v2375_v15, %v2369_v39  ;;  %v1030_v0 = vmul.f32 %v1029_v13, %v4917_v25  ;;  %v3118_v39 = vmov 0.0  }
 0x2a8   :  { %v2383_v58 = vpop.permute.xlu0 %2382  ;;  %v2391_v11 = vpop.permute.xlu1 %2390  ;;  %3022 = vmatprep.mubr.msk.f32.mxu0 %vm3117_vm5, %v3118_v39  ;;  %3033 = vmatprep.mubr.msk.f32.mxu1 %vm3117_vm5, %v3118_v39 }
 0x2a9   :  { %v2385_v32 = vadd.f32 %v2383_v58, %v2377_v47 }
 0x2ab   :  { %v2393_v33 = vadd.f32 %v2391_v11, %v2385_v32 }
 0x2ad   :  { %v2406_v29 = vadd.f32 %v2405_v37, %v2393_v33  ;;  %v1130_v33 = vstv %s2860_s16 }
 0x2de   :  { %v2420_v56 = vpop.permute.xlu1 %2419  ;;  %v2412_v5 = vpop.permute.xlu0 %2411 }
 0x2df   :  { %v2414_v8 = vadd.f32 %v2412_v5, %v2406_v29 }
 0x2e1   :  { %v2422_v34 = vadd.f32 %v2420_v56, %v2414_v8 }
 0x2e2   :  { %v1037_v52 = vpop.permute.xlu1 %1036  ;;  %v2428_v4 = vpop.permute.xlu0 %2427 }
 0x2e3   :  { %v1039_v50 = vadd.f32 %v1037_v52, %v1030_v0  ;;  %v2430_v20 = vadd.f32 %v2428_v4, %v2422_v34 }
 0x2e6   :  { %v1045_v23 = vpop.permute.xlu1 %1044  ;;  %v2436_v59 = vpop.permute.xlu0 %2435 }
 0x2e7   :  { %v1047_v49 = vadd.f32 %v1045_v23, %v1039_v50  ;;  %v2438_v40 = vadd.f32 %v2436_v59, %v2430_v20  ;;  %v2565_v50 = vld [vmem:[%s5210_s2 + $0x68] sm:$0xff]  ;;  %v2566_v20 = vld [vmem:[%s5210_s2 + $0x70] sm:$0xff]  ;;  %v2567_v59 = vld [vmem:[%s5210_s2 + $0x78] sm:$0xff] }
 0x2e8   :  { %v3055_v23 = vpack.c.bf16 %v2565_v50, %v2564_v42 }
 0x2e9   :  { %v1058_v21 = vadd.f32 %v1057_v62, %v1047_v49  ;;  %v2451_v14 = vadd.f32 %v2450_v30, %v2438_v40  ;;  %v3058_v49 = vpack.c.bf16 %v2567_v59, %v2566_v20  ;;  %v2974_v40 = vld [vmem:[%s5210_s2 + $0x80] ss:$0 sm:$0xff] }
 0x2ea   :  { %v1064_v41 = vpop.permute.xlu1 %1063  ;;  %3056 = vmatpush3.bf16.msra.mxu1 %v3055_v23 }
 0x2eb   :  { %v1066_v48 = vadd.f32 %v1064_v41, %v1058_v21  ;;  %3057 = vmatprep.subr.bf16.mxu1 %v3116_v6  ;;  %v2978_v6 = vld [vmem:[%s5210_s2 + $0x83] ss:$0 sm:$0xff] }
 0x2ee   :  { %v1072_v45 = vpop.permute.xlu1 %1071  ;;  %3059 = vmatpush3.bf16.msra.mxu1 %v3058_v49 }
 0x2ef   :  { %v1074_v25 = vadd.f32 %v1072_v45, %v1066_v48 }
 0x2f1   :  { %v1085_v9 = vadd.f32 %v1084_v44, %v1074_v25 }
 0x2f6   :  { %v2481_v31 = vpop.permute.xlu1 %2480  ;;  %v2457_v57 = vpop.permute.xlu0 %2456 }
 0x2f7   :  { %v2459_v46 = vadd.f32 %v2457_v57, %v2451_v14  ;;  %v2976_v14 = vld [vmem:[%s5210_s2 + $0x81] ss:$0 sm:$0xff] }
 0x2fa   :  { %v1099_v27 = vpop.permute.xlu1 %1098  ;;  %v2465_v24 = vpop.permute.xlu0 %2464 }
 0x2fb   :  { %v2467_v3 = vadd.f32 %v2465_v24, %v2459_v46 }
 0x2fe   :  { %v2473_v54 = vpop.permute.xlu0 %2472  ;;  %v2510_v18 = vpop.permute.xlu1 %2509 }
 0x2ff   :  { %v2475_v10 = vadd.f32 %v2473_v54, %v2467_v3 }
 0x301   :  { %v2483_v16 = vadd.f32 %v2481_v31, %v2475_v10 }
 0x302   :  { %v1091_v63 = vpop.permute.xlu0 %1090  ;;  %v2518_v17 = vpop.permute.xlu1 %2517 }
 0x303   :  { %v1093_v7 = vadd.f32 %v1091_v63, %v1085_v9  ;;  %v2496_v61 = vadd.f32 %v2495_v2, %v2483_v16 }
 0x305   :  { %v1101_v53 = vadd.f32 %v1099_v27, %v1093_v7 }
 0x306   :  { %v2502_v28 = vpop.permute.xlu0 %2501  ;;  %v2526_v58 = vpop.permute.xlu1 %2525 }
 0x307   :  { %v2504_v22 = vadd.f32 %v2502_v28, %v2496_v61  ;;  %v1112_v15 = vadd.f32 %v1111_v38, %v1101_v53 }
 0x309   :  { %v2512_v35 = vadd.f32 %v2510_v18, %v2504_v22 }
 0x30a   :  { %v1118_v60 = vpop.permute.xlu0 %1117 }
 0x30b   :  { %v2520_v47 = vadd.f32 %v2518_v17, %v2512_v35  ;;  %v1120_v11 = vadd.f32 %v1118_v60, %v1112_v15 }
 0x30d   :  { %v2528_v32 = vadd.f32 %v2526_v58, %v2520_v47 }
 0x30e   :  { %v1126_v37 = vpop.permute.xlu0 %1125 }
 0x30f   :  { %v1128_v29 = vadd.f32 %v1126_v37, %v1120_v11  ;;  %v2531_v56 = vadd.f32 %v2530_v36, %v2528_v32 }
 0x311   :  { %v1131_v5 = vadd.f32 %v1130_v33, %v1128_v29  ;;  %v2532_v8 = vmax.f32 %v2531_v56, 0.0 }
 0x312   :  { %v2538_v34 = vpop.permute.xlu0 %2537 }
 0x313   :  { %v1132_v13 = vmax.f32 %v1131_v5, 0.0  ;;  %2545 = vrot.lane.b32.xlu0 %v2532_v8, %s3119_s27 }
 0x315   :  { %2541 = vrot.lane.b32.xlu1 %v1132_v13, %s3120_s5 }
 0x385   :  { %v2546_v4 = vpop.permute.xlu0 %2545 }
 0x387   :  { %v2542_v52 = vpop.permute.xlu1 %2541 }
 0x388   :  { %v2549_v0 = vsel %vm2548_vm6, %v2538_v34, %v2542_v52 }
 0x389   :  { %v2551_v1 = vsel %vm2550_vm7, %v2549_v0, %v2546_v4 }
 0x38a   :  { %3023 = vmatmul.mubr.msk.f32.vlgmr.msra.gmra.mrb[0].mxu0 %vm2576_vm8, %v2551_v1 }
 0x45d   :  { %v2646_v62 = vpop.f32.mrb[0].mxu0 }
 0x45e   :  { %v2647_v30 = vadd.f32 %v2974_v40, %v2646_v62  ;;  %v3024_v21 = vpop.f32.mrb[1].mxu0 }
 0x460   :  { %v2650_v41 = vmax.f32 %v2647_v30, 0.0 }
 0x462   :  { %v2655_v48 = vmul.f32 %v2976_v14, %v2650_v41 }
 0x464   :  { %v2660_v45 = vadd.f32 %v2977_v26, %v2655_v48 }
 0x466   :  { %3034 = vmatmul.mubr.msk.f32.vlgmr.msra.gmra.mrb[0].mxu1 %vm2548_vm6, %v2660_v45 }
 0x539   :  { %v2734_v25 = vpop.f32.mrb[0].mxu1 }
 0x53a   :  { %v2735_v44 = vadd.f32 %v2978_v6, %v2734_v25  ;;  %v3035_v9 = vpop.f32.mrb[1].mxu1 }
 0x53c   :  { %v2738_v31 = vmax.f32 %v2735_v44, 0.0 }
 0x53e   :  { %2740 = vst.msk [vmem:[#allocation5] sm:$0x3] %vm2739_vm9, %v2738_v31 }
 0x53f   :  { %3095 = shalt.err (!%p3092_p9)
}
 0x540   :  { %s3096_s2 = scalar_lea.hbm %s5211_s3, 32 }
 0x541   :  { %p3097_p10 = scmp.ne.s32.totalorder %s5211_s3, %s3096_s2  ;;  %p3100_p11 = scmp.lt.u32.totalorder %s3096_s2, %s5211_s3 }
 0x543   :  { %p3102_p12 = pnand %p3100_p11, %p3097_p10 }
 0x545   :  { %3105 = shalt.err (!%p3102_p12)
}
 0x546   :  { %2750 = dma.vmem_to_hbm [thread:$0]  %s2748_s30, 32, %s5211_s3, [#allocation3]  }
 0x547   :  { %3108 = dma.done.wait [#allocation3], 32  }
 0x548   :  { %3109 = vsyncadd [#allocation3], 4294967264 }
 0x549   :  { %2754 = vsyncpa [#allocation3], 1 }
 0x54a   :  { %2755 = vsyncpa [#allocation4], 1 }

</bundles_post_ra>
